<compile_context>
chip_gen: v5e
topology: v5e:2x2
jax: 0.10.0
libtpu: 0.0.40
codegen_flags: <defaults>
</compile_context>

<pallas_src>
import functools
import math

import jax
import jax.numpy as jnp
from jax.experimental import pallas as pl
from jax.experimental.pallas import tpu as pltpu


def _round_up(x, m):
    return ((x + m - 1) // m) * m


def _weight_spec(shape):
    """Full-array BlockSpec for a grid-invariant weight; single-buffered if supported."""
    ndim = len(shape)
    index_map = lambda b: (0,) * ndim
    try:
        return pl.BlockSpec(shape, index_map, pipeline_mode=pl.Buffered(buffer_count=1))
    except Exception:  # older/newer API without pipeline_mode / Buffered
        return pl.BlockSpec(shape, index_map)


# ----------------------------------------------------------------------------- in-kernel helpers

def _layer_norm(x, g, b, eps):
    mu = jnp.mean(x, axis=-1, keepdims=True)
    var = jnp.mean((x - mu) * (x - mu), axis=-1, keepdims=True)
    return (x - mu) * jax.lax.rsqrt(var + eps) * g + b


def _gelu(x):
    c = math.sqrt(2.0 / math.pi)
    return 0.5 * x * (1.0 + jnp.tanh(c * (x + 0.044715 * x * x * x)))


def _mha(q, k, v, attn_scr, *, num_heads, scale):
    """Per-head softmax attention; each head's output is stored into the VMEM scratch
    (Sq, VO) -- no list building, no concatenate."""
    f32, bf16 = jnp.float32, jnp.bfloat16
    dqk = q.shape[-1] // num_heads
    dv = v.shape[-1] // num_heads
    for h in range(num_heads):  # static, small H; per-head outputs go straight to scratch
        qh = q[:, h * dqk:(h + 1) * dqk].astype(bf16)
        kh = k[:, h * dqk:(h + 1) * dqk].astype(bf16)
        vh = v[:, h * dv:(h + 1) * dv].astype(bf16)
        s = jax.lax.dot_general(qh, kh, (((1,), (1,)), ((), ())),
                                preferred_element_type=f32) * scale
        s = s - jnp.max(s, axis=-1, keepdims=True)
        p = jnp.exp(s)
        p = p * pl.reciprocal(jnp.sum(p, axis=-1, keepdims=True), approx=True)
        attn_scr[:, h * dv:(h + 1) * dv] = jnp.dot(p.astype(bf16), vh,
                                                   preferred_element_type=f32)
    return attn_scr[...]


def _gelu_mlp(x, g, b, w1, b1, w2, b2, eps):
    f32, bf16 = jnp.float32, jnp.bfloat16
    xn = _layer_norm(x, g, b, eps)
    h1 = jnp.dot(xn.astype(bf16), w1, preferred_element_type=f32) + b1
    h1 = _gelu(h1)
    return jnp.dot(h1.astype(bf16), w2, preferred_element_type=f32) + b2


# ----------------------------------------------------------------------------- cross-attention block kernel

def _cross_block_kernel(kv_ref, q_ref,
                        kv_g_ref, kv_b_ref, q_g_ref, q_b_ref,
                        wq_ref, bq_ref, wkv_ref, bkv_ref, wo_ref, bo_ref,
                        f_g_ref, f_b_ref, w1_ref, b1_ref, w2_ref, b2_ref,
                        o_ref, attn_scr,
                        *, num_heads, qk_out, scale, use_query_residual, eps):
    f32, bf16 = jnp.float32, jnp.bfloat16
    kv = kv_ref[0].astype(f32)                                     # (Skv, Dkv)
    qx = q_ref[0].astype(f32)                                      # (Sq, Dq)

    kvn = _layer_norm(kv, kv_g_ref[...], kv_b_ref[...], eps)
    qn = _layer_norm(qx, q_g_ref[...], q_b_ref[...], eps)

    q = jnp.dot(qn.astype(bf16), wq_ref[...], preferred_element_type=f32) + bq_ref[...]
    kvp = jnp.dot(kvn.astype(bf16), wkv_ref[...], preferred_element_type=f32) + bkv_ref[...]
    k = kvp[:, :qk_out]
    v = kvp[:, qk_out:]

    attn = _mha(q, k, v, attn_scr, num_heads=num_heads, scale=scale)
    proj = jnp.dot(attn.astype(bf16), wo_ref[...], preferred_element_type=f32) + bo_ref[...]
    x = qx + proj if use_query_residual else proj

    y = _gelu_mlp(x, f_g_ref[...], f_b_ref[...], w1_ref[...], b1_ref[...],
                  w2_ref[...], b2_ref[...], eps)
    o_ref[0] = (x + y).astype(o_ref.dtype)


def cross_attention_block(p, inputs_kv, inputs_q, *, num_heads, use_query_residual, eps=1e-5):
    B, Skv, Dkv = inputs_kv.shape
    _, Sq, Dq = inputs_q.shape
    qk_out = p["wq"].shape[-1]
    v_out = p["wo"].shape[0]
    scale = float(qk_out // num_heads) ** -0.5

    names = ("kv_ln_g", "kv_ln_b", "q_ln_g", "q_ln_b", "wq", "bq", "wkv", "bkv",
             "wo", "bo", "ffn_ln_g", "ffn_ln_b", "w1", "b1", "w2", "b2")
    weights = [p[n] for n in names]

    kernel = functools.partial(
        _cross_block_kernel, num_heads=num_heads, qk_out=qk_out,
        scale=scale, use_query_residual=use_query_residual, eps=eps)

    # TODO(synk): Dq < 128 gives masked output stores; pad model dims to 128 at real sizes.
    return pl.pallas_call(
        kernel,
        out_shape=jax.ShapeDtypeStruct((B, Sq, Dq), jnp.float32),
        grid=(B,),
        in_specs=[pl.BlockSpec((1, Skv, Dkv), lambda b: (b, 0, 0)),
                  pl.BlockSpec((1, Sq, Dq), lambda b: (b, 0, 0))]
                 + [_weight_spec(w.shape) for w in weights],
        out_specs=pl.BlockSpec((1, Sq, Dq), lambda b: (b, 0, 0)),
        scratch_shapes=[pltpu.VMEM((Sq, v_out), jnp.float32)],
        compiler_params=pltpu.CompilerParams(
            dimension_semantics=("parallel",),
            vmem_limit_bytes=32 * 1024 * 1024),
    )(inputs_kv, inputs_q, *weights)


# ----------------------------------------------------------------------------- fused self-attention stack kernel

def _self_stack_kernel(x_ref,
                       g_ref, b_ref, wqkv_ref, bqkv_ref, wo_ref, bo_ref,
                       fg_ref, fb_ref, w1_ref, b1_ref, w2_ref, b2_ref,
                       o_ref, attn_scr,
                       *, num_heads, qk_out, scale, eps, layer_order):
    """Whole self-attention stack for one batch element; latents stay VMEM-resident."""
    f32, bf16 = jnp.float32, jnp.bfloat16
    x = x_ref[0].astype(f32)                                       # (S, D)
    for l in layer_order:                                          # static layer loop
        xn = _layer_norm(x, g_ref[l], b_ref[l], eps)               # shared LN (self-attn)
        qkv = jnp.dot(xn.astype(bf16), wqkv_ref[l],
                      preferred_element_type=f32) + bqkv_ref[l]    # fused Q|K|V projection
        q = qkv[:, :qk_out]
        k = qkv[:, qk_out:2 * qk_out]
        v = qkv[:, 2 * qk_out:]
        attn = _mha(q, k, v, attn_scr, num_heads=num_heads, scale=scale)
        x = x + jnp.dot(attn.astype(bf16), wo_ref[l],
                        preferred_element_type=f32) + bo_ref[l]
        x = x + _gelu_mlp(x, fg_ref[l], fb_ref[l], w1_ref[l], b1_ref[l],
                          w2_ref[l], b2_ref[l], eps)
    o_ref[0] = x.astype(o_ref.dtype)


def self_attention_stack(p, x, *, num_heads, num_blocks, eps=1e-5):
    B, S, D = x.shape
    L = p["wqkv"].shape[0]
    v_out = p["wo"].shape[1]
    qk_out = (p["wqkv"].shape[-1] - v_out) // 2
    scale = float(qk_out // num_heads) ** -0.5
    layer_order = tuple(range(L)) * num_blocks

    names = ("ln_g", "ln_b", "wqkv", "bqkv", "wo", "bo",
             "ffn_ln_g", "ffn_ln_b", "w1", "b1", "w2", "b2")
    weights = [p[n] for n in names]

    kernel = functools.partial(
        _self_stack_kernel, num_heads=num_heads, qk_out=qk_out,
        scale=scale, eps=eps, layer_order=layer_order)

    return pl.pallas_call(
        kernel,
        out_shape=jax.ShapeDtypeStruct((B, S, D), jnp.float32),
        grid=(B,),
        in_specs=[pl.BlockSpec((1, S, D), lambda b: (b, 0, 0))]
                 + [_weight_spec(w.shape) for w in weights],
        out_specs=pl.BlockSpec((1, S, D), lambda b: (b, 0, 0)),
        scratch_shapes=[pltpu.VMEM((S, v_out), jnp.float32)],
        compiler_params=pltpu.CompilerParams(
            dimension_semantics=("parallel",),
            vmem_limit_bytes=32 * 1024 * 1024),
    )(x, *weights)


# ----------------------------------------------------------------------------- tied vocab projection kernel

def _logits_kernel(x_ref, e_ref, b_ref, o_ref, acc_ref):
    k = pl.program_id(2)

    @pl.when(k == 0)
    def _():
        acc_ref[...] = jnp.zeros_like(acc_ref)

    # bf16 x bf16 -> f32 accumulate; embedding is pre-transposed to (K, Vp): no RHS transpose.
    acc_ref[...] += jnp.dot(x_ref[...], e_ref[...], preferred_element_type=jnp.float32)

    @pl.when(k == pl.num_programs(2) - 1)
    def _():
        o_ref[...] = (acc_ref[...] + b_ref[...]).astype(o_ref.dtype)


def tied_logits(x, emb_kv, bias_p, *, tm=256, tn=512, tk=512):
    """x: (M, K) bf16; emb_kv: (K, Vp) bf16 (pre-transposed, vocab padded to 128);
    bias_p: (1, Vp) f32.  Returns (M, Vp) f32 logits (still vocab-padded)."""
    M, K = x.shape
    _, Vp = emb_kv.shape

    Mp = _round_up(M, 8)
    tm = min(tm, Mp)
    Mp = _round_up(Mp, tm)
    tn = min(tn, Vp)
    if Vp % tn != 0:
        tn = 128                       # Vp is always a multiple of 128
    tk = min(tk, K)
    if K % tk != 0:
        tk = K

    if Mp != M:
        x = jnp.pad(x, ((0, Mp - M), (0, 0)))

    out = pl.pallas_call(
        _logits_kernel,
        out_shape=jax.ShapeDtypeStruct((Mp, Vp), jnp.float32),
        grid=(Mp // tm, Vp // tn, K // tk),
        in_specs=[
            pl.BlockSpec((tm, tk), lambda i, j, k: (i, k)),
            pl.BlockSpec((tk, tn), lambda i, j, k: (k, j)),
            pl.BlockSpec((1, tn), lambda i, j, k: (0, j)),
        ],
        out_specs=pl.BlockSpec((tm, tn), lambda i, j, k: (i, j)),
        scratch_shapes=[pltpu.VMEM((tm, tn), jnp.float32)],
        compiler_params=pltpu.CompilerParams(
            dimension_semantics=("parallel", "parallel", "arbitrary"),
            vmem_limit_bytes=32 * 1024 * 1024),
    )(x, emb_kv, bias_p)
    return out[:M]


# ----------------------------------------------------------------------------- model glue

def perceiver_lm_forward(params, cfg, inputs):
    B, S = inputs.shape
    tok = jnp.take(params["token_emb"], inputs, axis=0)                  # (B, S, E) gather
    pos = params["pos_emb"][:S][None, :, :]
    embeddings = tok + pos
    query = jnp.broadcast_to(params["query_emb"][:S][None, :, :], (B, S, cfg["emb"]))

    enc = params["encoder"]
    latents = jnp.broadcast_to(enc["latents"][None, :, :],
                               (B, cfg["num_latents"], cfg["latent_dim"]))
    latents = cross_attention_block(enc["cross"], embeddings, latents,
                                    num_heads=cfg["num_cross_attn_heads"],
                                    use_query_residual=True)
    latents = self_attention_stack(enc["self_stack"], latents,
                                   num_heads=cfg["num_self_attn_heads"],
                                   num_blocks=cfg["num_blocks"])

    outputs = cross_attention_block(params["decoder"]["cross"], latents, query,
                                    num_heads=cfg["num_decoder_attn_heads"],
                                    use_query_residual=False)

    x = outputs.reshape(B * S, cfg["emb"]).astype(jnp.bfloat16)
    logits_p = tied_logits(x, params["emb_kv"], params["decoder_token_bias_p"])
    return logits_p[:, :cfg["vocab_size"]].reshape(B, S, cfg["vocab_size"])


# ----------------------------------------------------------------------------- params

def _init_linear(key, in_dim, out_dim):
    k1, k2 = jax.random.split(key)
    w = (jax.random.normal(k1, (in_dim, out_dim), jnp.float32) * 0.02).astype(jnp.bfloat16)
    b = jax.random.normal(k2, (1, out_dim), jnp.float32) * 0.02
    return w, b


def _init_ln(dim):
    return jnp.ones((1, dim), jnp.float32), jnp.zeros((1, dim), jnp.float32)


def _init_cross_block(key, kv_dim, q_dim, qk_out, v_out, widening):
    ks = jax.random.split(key, 6)
    wq, bq = _init_linear(ks[0], q_dim, qk_out)
    wk, bk = _init_linear(ks[1], kv_dim, qk_out)
    wv, bv = _init_linear(ks[2], kv_dim, v_out)
    wo, bo = _init_linear(ks[3], v_out, q_dim)
    w1, b1 = _init_linear(ks[4], q_dim, q_dim * widening)
    w2, b2 = _init_linear(ks[5], q_dim * widening, q_dim)
    kv_g, kv_b = _init_ln(kv_dim)
    q_g, q_b = _init_ln(q_dim)
    f_g, f_b = _init_ln(q_dim)
    return {
        "kv_ln_g": kv_g, "kv_ln_b": kv_b, "q_ln_g": q_g, "q_ln_b": q_b,
        "wq": wq, "bq": bq,
        "wkv": jnp.concatenate([wk, wv], axis=1),       # fused K|V weights (bf16)
        "bkv": jnp.concatenate([bk, bv], axis=1),
        "wo": wo, "bo": bo,
        "ffn_ln_g": f_g, "ffn_ln_b": f_b,
        "w1": w1, "b1": b1, "w2": w2, "b2": b2,
    }


def _init_self_stack(key, dim, qk_out, v_out, widening, num_layers):
    layers = []
    for k in jax.random.split(key, num_layers):
        ks = jax.random.split(k, 6)
        wq, bq = _init_linear(ks[0], dim, qk_out)
        wk, bk = _init_linear(ks[1], dim, qk_out)
        wv, bv = _init_linear(ks[2], dim, v_out)
        wo, bo = _init_linear(ks[3], v_out, dim)
        w1, b1 = _init_linear(ks[4], dim, dim * widening)
        w2, b2 = _init_linear(ks[5], dim * widening, dim)
        g, bn = _init_ln(dim)
        fg, fb = _init_ln(dim)
        layers.append({
            "ln_g": g, "ln_b": bn,
            "wqkv": jnp.concatenate([wq, wk, wv], axis=1),   # fused Q|K|V weights (bf16)
            "bqkv": jnp.concatenate([bq, bk, bv], axis=1),
            "wo": wo, "bo": bo, "ffn_ln_g": fg, "ffn_ln_b": fb,
            "w1": w1, "b1": b1, "w2": w2, "b2": b2,
        })
    # stack per-layer weights on a leading axis (one pallas_call for the whole stack)
    return {name: jnp.stack([lyr[name] for lyr in layers], axis=0) for name in layers[0]}


def init_perceiver_lm(key, cfg):
    keys = jax.random.split(key, 8)
    v_out_dim = cfg["latent_dim"]  # v_out_dim=None -> latent_dim

    token_emb = jax.random.normal(keys[0], (cfg["vocab_size"], cfg["emb"]), jnp.float32)
    vp = _round_up(cfg["vocab_size"], 128)
    # Pre-transposed (K, Vp) bf16 copy of the tied embedding + padded bias, built ONCE here
    # (no per-forward jnp.pad / transpose of the embedding).
    emb_kv = jnp.pad(token_emb, ((0, vp - cfg["vocab_size"]), (0, 0))).T.astype(jnp.bfloat16)
    bias = jax.random.normal(keys[3], (cfg["vocab_size"],), jnp.float32)
    bias_p = jnp.pad(bias, (0, vp - cfg["vocab_size"]))[None, :]

    return {
        "token_emb": token_emb,
        "emb_kv": emb_kv,
        "decoder_token_bias_p": bias_p,
        "pos_emb": jax.random.normal(keys[1], (cfg["max_seq_len"], cfg["emb"]), jnp.float32),
        "query_emb": jax.random.normal(keys[2], (cfg["max_seq_len"], cfg["emb"]), jnp.float32),
        "encoder": {
            "latents": jax.random.normal(keys[4], (cfg["num_latents"], cfg["latent_dim"]),
                                         jnp.float32),
            "cross": _init_cross_block(keys[6], cfg["emb"], cfg["latent_dim"],
                                       cfg["qk_out_dim"], v_out_dim,
                                       cfg["cross_attn_widening_factor"]),
            "self_stack": _init_self_stack(keys[5], cfg["latent_dim"], cfg["qk_out_dim"],
                                           v_out_dim, cfg["self_attn_widening_factor"],
                                           cfg["num_self_attn_per_block"]),
        },
        "decoder": {
            "cross": _init_cross_block(keys[7], cfg["latent_dim"], cfg["emb"],
                                       cfg["qk_out_dim"], cfg["emb"],
                                       cfg["cross_attn_widening_factor"]),
        },
    }


# ----------------------------------------------------------------------------- main

if __name__ == "__main__":
    cfg = dict(
        vocab_size=50, max_seq_len=16, emb=32,
        num_latents=16, latent_dim=64, qk_out_dim=32,
        num_self_attn_heads=4, num_cross_attn_heads=4, num_decoder_attn_heads=4,
        self_attn_widening_factor=1, cross_attn_widening_factor=1,
        num_blocks=1, num_self_attn_per_block=2,
    )
    B, S = 2, 8

    root = jax.random.PRNGKey(0)
    k_params, k_inputs = jax.random.split(root)
    params = init_perceiver_lm(k_params, cfg)
    inputs = jax.random.randint(k_inputs, (B, S), 0, cfg["vocab_size"], dtype=jnp.int32)

    fwd = jax.jit(lambda p, t: perceiver_lm_forward(p, cfg, t))
    logits = jax.block_until_ready(fwd(params, inputs))
    assert logits.shape == (B, S, cfg["vocab_size"]), logits.shape
    assert bool(jnp.all(jnp.isfinite(logits)))
    print("KERNEL_OK")
</pallas_src>

<mosaic_0001>
module attributes {stable_mosaic.version = 11 : i64} {
  func.func @_logits_kernel(%arg0: i32, %arg1: i32, %arg2: i32, %arg3: memref<16x32xbf16, #tpu.memory_space<vmem>>, %arg4: memref<32x128xbf16, #tpu.memory_space<vmem>>, %arg5: memref<1x128xf32, #tpu.memory_space<vmem>>, %arg6: memref<16x128xf32, #tpu.memory_space<vmem>>, %arg7: memref<16x128xf32, #tpu.memory_space<vmem>>) attributes {dimension_semantics = [#tpu.dimension_semantics<parallel>, #tpu.dimension_semantics<parallel>, #tpu.dimension_semantics<arbitrary>], iteration_bounds = array<i64: 1, 1, 1>, scalar_prefetch = 0 : i64, scratch_operands = 1 : i64, tpu.core_type = #tpu.core_type<tc>, window_params = [{transform_indices = @transform_0, window_bounds = array<i64: 16, 32>}, {transform_indices = @transform_1, window_bounds = array<i64: 32, 128>}, {transform_indices = @transform_2, window_bounds = array<i64: 1, 128>}, {transform_indices = @transform_3, window_bounds = array<i64: 16, 128>}]} {
    %c0_i32 = arith.constant 0 : i32
    %0 = arith.cmpi eq, %arg2, %c0_i32 : i32
    %1 = arith.extui %0 : i1 to i32
    %c0_i32_0 = arith.constant 0 : i32
    %2 = arith.cmpi ne, %1, %c0_i32_0 : i32
    scf.if %2 {
      %cst_10 = arith.constant 0.000000e+00 : f32
      %12 = vector.broadcast %cst_10 : f32 to vector<16x128xf32>
      %c0_11 = arith.constant 0 : index
      %c0_12 = arith.constant 0 : index
      %13 = vector.load %arg7[%c0_11, %c0_12] : memref<16x128xf32, #tpu.memory_space<vmem>>, vector<16x128xf32>
      tpu.vector_store %arg7[%c0_11, %c0_12], %12 {strides = array<i32>} : memref<16x128xf32, #tpu.memory_space<vmem>>, vector<16x128xf32>,
    } else {
    }
    %c0 = arith.constant 0 : index
    %c0_1 = arith.constant 0 : index
    %3 = vector.load %arg7[%c0, %c0_1] : memref<16x128xf32, #tpu.memory_space<vmem>>, vector<16x128xf32>
    %c0_2 = arith.constant 0 : index
    %c0_3 = arith.constant 0 : index
    %4 = vector.load %arg3[%c0_2, %c0_3] : memref<16x32xbf16, #tpu.memory_space<vmem>>, vector<16x32xbf16>
    %c0_4 = arith.constant 0 : index
    %c0_5 = arith.constant 0 : index
    %5 = vector.load %arg4[%c0_4, %c0_5] : memref<32x128xbf16, #tpu.memory_space<vmem>>, vector<32x128xbf16>
    %cst = arith.constant dense<0.000000e+00> : vector<16x128xf32>
    %6 = tpu.matmul %4, %5, %cst {dimension_numbers = #tpu.dot_dimension_numbers<[1], [0], [0], [1], [0, 0, 1, 1], [], []>} : vector<16x32xbf16>, vector<32x128xbf16>, vector<16x128xf32> -> vector<16x128xf32>
    %7 = arith.addf %3, %6 : vector<16x128xf32>
    %c0_6 = arith.constant 0 : index
    %c0_7 = arith.constant 0 : index
    %8 = vector.load %arg7[%c0_6, %c0_7] : memref<16x128xf32, #tpu.memory_space<vmem>>, vector<16x128xf32>
    tpu.vector_store %arg7[%c0_6, %c0_7], %7 {strides = array<i32>} : memref<16x128xf32, #tpu.memory_space<vmem>>, vector<16x128xf32>,
    %c0_i32_8 = arith.constant 0 : i32
    %9 = arith.cmpi eq, %arg2, %c0_i32_8 : i32
    %10 = arith.extui %9 : i1 to i32
    %c0_i32_9 = arith.constant 0 : i32
    %11 = arith.cmpi ne, %10, %c0_i32_9 : i32
    scf.if %11 {
      %c0_10 = arith.constant 0 : index
      %c0_11 = arith.constant 0 : index
      %12 = vector.load %arg7[%c0_10, %c0_11] : memref<16x128xf32, #tpu.memory_space<vmem>>, vector<16x128xf32>
      %c0_12 = arith.constant 0 : index
      %c0_13 = arith.constant 0 : index
      %13 = vector.load %arg5[%c0_12, %c0_13] : memref<1x128xf32, #tpu.memory_space<vmem>>, vector<1x128xf32>
      %14 = vector.broadcast %13 : vector<1x128xf32> to vector<16x128xf32>
      %15 = arith.addf %12, %14 : vector<16x128xf32>
      %c0_14 = arith.constant 0 : index
      %c0_15 = arith.constant 0 : index
      %16 = vector.load %arg6[%c0_14, %c0_15] : memref<16x128xf32, #tpu.memory_space<vmem>>, vector<16x128xf32>
      tpu.vector_store %arg6[%c0_14, %c0_15], %15 {strides = array<i32>} : memref<16x128xf32, #tpu.memory_space<vmem>>, vector<16x128xf32>,
    } else {
    }
    return
  }
  func.func @transform_0(%arg0: i32, %arg1: i32, %arg2: i32) -> (i32, i32) {
    %c0_i32 = arith.constant 0 : i32
    return %arg0, %arg2 : i32, i32
  }
  func.func @transform_1(%arg0: i32, %arg1: i32, %arg2: i32) -> (i32, i32) {
    %c0_i32 = arith.constant 0 : i32
    return %arg2, %arg1 : i32, i32
  }
  func.func @transform_2(%arg0: i32, %arg1: i32, %arg2: i32) -> (i32, i32) {
    %c0_i32 = arith.constant 0 : i32
    %c0_i32_0 = arith.constant 0 : i32
    return %c0_i32, %arg1 : i32, i32
  }
  func.func @transform_3(%arg0: i32, %arg1: i32, %arg2: i32) -> (i32, i32) {
    %c0_i32 = arith.constant 0 : i32
    return %arg0, %arg1 : i32, i32
  }
}

module attributes {stable_mosaic.version = 11 : i64} {
  func.func @_cross_block_kernel(%arg0: i32, %arg1: memref<1x8x32xf32, #tpu.memory_space<vmem>>, %arg2: memref<1x16x64xf32, #tpu.memory_space<vmem>>, %arg3: memref<1x32xf32, #tpu.memory_space<vmem>>, %arg4: memref<1x32xf32, #tpu.memory_space<vmem>>, %arg5: memref<1x64xf32, #tpu.memory_space<vmem>>, %arg6: memref<1x64xf32, #tpu.memory_space<vmem>>, %arg7: memref<64x32xbf16, #tpu.memory_space<vmem>>, %arg8: memref<1x32xf32, #tpu.memory_space<vmem>>, %arg9: memref<32x96xbf16, #tpu.memory_space<vmem>>, %arg10: memref<1x96xf32, #tpu.memory_space<vmem>>, %arg11: memref<64x64xbf16, #tpu.memory_space<vmem>>, %arg12: memref<1x64xf32, #tpu.memory_space<vmem>>, %arg13: memref<1x64xf32, #tpu.memory_space<vmem>>, %arg14: memref<1x64xf32, #tpu.memory_space<vmem>>, %arg15: memref<64x64xbf16, #tpu.memory_space<vmem>>, %arg16: memref<1x64xf32, #tpu.memory_space<vmem>>, %arg17: memref<64x64xbf16, #tpu.memory_space<vmem>>, %arg18: memref<1x64xf32, #tpu.memory_space<vmem>>, %arg19: memref<1x16x64xf32, #tpu.memory_space<vmem>>, %arg20: memref<16x64xf32, #tpu.memory_space<vmem>>) attributes {dimension_semantics = [#tpu.dimension_semantics<parallel>], iteration_bounds = array<i64: 2>, scalar_prefetch = 0 : i64, scratch_operands = 1 : i64, tpu.core_type = #tpu.core_type<tc>, window_params = [{transform_indices = @transform_0, window_bounds = array<i64: 1, 8, 32>}, {transform_indices = @transform_1, window_bounds = array<i64: 1, 16, 64>}, {pipeline_mode = #tpu.pipeline_mode<synchronous>, transform_indices = @transform_2, window_bounds = array<i64: 1, 32>}, {pipeline_mode = #tpu.pipeline_mode<synchronous>, transform_indices = @transform_3, window_bounds = array<i64: 1, 32>}, {pipeline_mode = #tpu.pipeline_mode<synchronous>, transform_indices = @transform_4, window_bounds = array<i64: 1, 64>}, {pipeline_mode = #tpu.pipeline_mode<synchronous>, transform_indices = @transform_5, window_bounds = array<i64: 1, 64>}, {pipeline_mode = #tpu.pipeline_mode<synchronous>, transform_indices = @transform_6, window_bounds = array<i64: 64, 32>}, {pipeline_mode = #tpu.pipeline_mode<synchronous>, transform_indices = @transform_7, window_bounds = array<i64: 1, 32>}, {pipeline_mode = #tpu.pipeline_mode<synchronous>, transform_indices = @transform_8, window_bounds = array<i64: 32, 96>}, {pipeline_mode = #tpu.pipeline_mode<synchronous>, transform_indices = @transform_9, window_bounds = array<i64: 1, 96>}, {pipeline_mode = #tpu.pipeline_mode<synchronous>, transform_indices = @transform_10, window_bounds = array<i64: 64, 64>}, {pipeline_mode = #tpu.pipeline_mode<synchronous>, transform_indices = @transform_11, window_bounds = array<i64: 1, 64>}, {pipeline_mode = #tpu.pipeline_mode<synchronous>, transform_indices = @transform_12, window_bounds = array<i64: 1, 64>}, {pipeline_mode = #tpu.pipeline_mode<synchronous>, transform_indices = @transform_13, window_bounds = array<i64: 1, 64>}, {pipeline_mode = #tpu.pipeline_mode<synchronous>, transform_indices = @transform_14, window_bounds = array<i64: 64, 64>}, {pipeline_mode = #tpu.pipeline_mode<synchronous>, transform_indices = @transform_15, window_bounds = array<i64: 1, 64>}, {pipeline_mode = #tpu.pipeline_mode<synchronous>, transform_indices = @transform_16, window_bounds = array<i64: 64, 64>}, {pipeline_mode = #tpu.pipeline_mode<synchronous>, transform_indices = @transform_17, window_bounds = array<i64: 1, 64>}, {transform_indices = @transform_18, window_bounds = array<i64: 1, 16, 64>}]} {
    %c0 = arith.constant 0 : index
    %c0_0 = arith.constant 0 : index
    %c0_1 = arith.constant 0 : index
    %0 = vector.load %arg1[%c0, %c0_0, %c0_1] : memref<1x8x32xf32, #tpu.memory_space<vmem>>, vector<1x8x32xf32>
    %1 = vector.shape_cast %0 : vector<1x8x32xf32> to vector<8x32xf32>
    %c0_2 = arith.constant 0 : index
    %c0_3 = arith.constant 0 : index
    %c0_4 = arith.constant 0 : index
    %2 = vector.load %arg2[%c0_2, %c0_3, %c0_4] : memref<1x16x64xf32, #tpu.memory_space<vmem>>, vector<1x16x64xf32>
    %3 = vector.shape_cast %2 : vector<1x16x64xf32> to vector<16x64xf32>
    %c0_5 = arith.constant 0 : index
    %c0_6 = arith.constant 0 : index
    %4 = vector.load %arg3[%c0_5, %c0_6] : memref<1x32xf32, #tpu.memory_space<vmem>>, vector<1x32xf32>
    %c0_7 = arith.constant 0 : index
    %c0_8 = arith.constant 0 : index
    %5 = vector.load %arg4[%c0_7, %c0_8] : memref<1x32xf32, #tpu.memory_space<vmem>>, vector<1x32xf32>
    %cst = arith.constant dense<0.000000e+00> : vector<8xf32>
    %6 = vector.multi_reduction <add>, %1, %cst [1] : vector<8x32xf32> to vector<8xf32>
    %7 = vector.shape_cast %6 : vector<8xf32> to vector<8x1xf32>
    %cst_9 = arith.constant 3.200000e+01 : f32
    %8 = vector.broadcast %cst_9 : f32 to vector<8x1xf32>
    %9 = arith.divf %7, %8 : vector<8x1xf32>
    %10 = vector.broadcast %9 : vector<8x1xf32> to vector<8x32xf32>
    %11 = arith.subf %1, %10 : vector<8x32xf32>
    %12 = vector.broadcast %9 : vector<8x1xf32> to vector<8x32xf32>
    %13 = arith.subf %1, %12 : vector<8x32xf32>
    %14 = arith.mulf %11, %13 : vector<8x32xf32>
    %cst_10 = arith.constant dense<0.000000e+00> : vector<8xf32>
    %15 = vector.multi_reduction <add>, %14, %cst_10 [1] : vector<8x32xf32> to vector<8xf32>
    %16 = vector.shape_cast %15 : vector<8xf32> to vector<8x1xf32>
    %cst_11 = arith.constant 3.200000e+01 : f32
    %17 = vector.broadcast %cst_11 : f32 to vector<8x1xf32>
    %18 = arith.divf %16, %17 : vector<8x1xf32>
    %19 = vector.broadcast %9 : vector<8x1xf32> to vector<8x32xf32>
    %20 = arith.subf %1, %19 : vector<8x32xf32>
    %cst_12 = arith.constant 9.99999974E-6 : f32
    %21 = vector.broadcast %cst_12 : f32 to vector<8x1xf32>
    %22 = arith.addf %18, %21 : vector<8x1xf32>
    %23 = math.rsqrt %22 : vector<8x1xf32>
    %24 = vector.broadcast %23 : vector<8x1xf32> to vector<8x32xf32>
    %25 = arith.mulf %20, %24 : vector<8x32xf32>
    %26 = vector.broadcast %4 : vector<1x32xf32> to vector<8x32xf32>
    %27 = arith.mulf %25, %26 : vector<8x32xf32>
    %28 = vector.broadcast %5 : vector<1x32xf32> to vector<8x32xf32>
    %29 = arith.addf %27, %28 : vector<8x32xf32>
    %c0_13 = arith.constant 0 : index
    %c0_14 = arith.constant 0 : index
    %30 = vector.load %arg5[%c0_13, %c0_14] : memref<1x64xf32, #tpu.memory_space<vmem>>, vector<1x64xf32>
    %c0_15 = arith.constant 0 : index
    %c0_16 = arith.constant 0 : index
    %31 = vector.load %arg6[%c0_15, %c0_16] : memref<1x64xf32, #tpu.memory_space<vmem>>, vector<1x64xf32>
    %cst_17 = arith.constant dense<0.000000e+00> : vector<16xf32>
    %32 = vector.multi_reduction <add>, %3, %cst_17 [1] : vector<16x64xf32> to vector<16xf32>
    %33 = vector.shape_cast %32 : vector<16xf32> to vector<16x1xf32>
    %cst_18 = arith.constant 6.400000e+01 : f32
    %34 = vector.broadcast %cst_18 : f32 to vector<16x1xf32>
    %35 = arith.divf %33, %34 : vector<16x1xf32>
    %36 = vector.broadcast %35 : vector<16x1xf32> to vector<16x64xf32>
    %37 = arith.subf %3, %36 : vector<16x64xf32>
    %38 = vector.broadcast %35 : vector<16x1xf32> to vector<16x64xf32>
    %39 = arith.subf %3, %38 : vector<16x64xf32>
    %40 = arith.mulf %37, %39 : vector<16x64xf32>
    %cst_19 = arith.constant dense<0.000000e+00> : vector<16xf32>
    %41 = vector.multi_reduction <add>, %40, %cst_19 [1] : vector<16x64xf32> to vector<16xf32>
    %42 = vector.shape_cast %41 : vector<16xf32> to vector<16x1xf32>
    %cst_20 = arith.constant 6.400000e+01 : f32
    %43 = vector.broadcast %cst_20 : f32 to vector<16x1xf32>
    %44 = arith.divf %42, %43 : vector<16x1xf32>
    %45 = vector.broadcast %35 : vector<16x1xf32> to vector<16x64xf32>
    %46 = arith.subf %3, %45 : vector<16x64xf32>
    %cst_21 = arith.constant 9.99999974E-6 : f32
    %47 = vector.broadcast %cst_21 : f32 to vector<16x1xf32>
    %48 = arith.addf %44, %47 : vector<16x1xf32>
    %49 = math.rsqrt %48 : vector<16x1xf32>
    %50 = vector.broadcast %49 : vector<16x1xf32> to vector<16x64xf32>
    %51 = arith.mulf %46, %50 : vector<16x64xf32>
    %52 = vector.broadcast %30 : vector<1x64xf32> to vector<16x64xf32>
    %53 = arith.mulf %51, %52 : vector<16x64xf32>
    %54 = vector.broadcast %31 : vector<1x64xf32> to vector<16x64xf32>
    %55 = arith.addf %53, %54 : vector<16x64xf32>
    %56 = arith.truncf %55 : vector<16x64xf32> to vector<16x64xbf16>
    %c0_22 = arith.constant 0 : index
    %c0_23 = arith.constant 0 : index
    %57 = vector.load %arg7[%c0_22, %c0_23] : memref<64x32xbf16, #tpu.memory_space<vmem>>, vector<64x32xbf16>
    %cst_24 = arith.constant dense<0.000000e+00> : vector<16x32xf32>
    %58 = tpu.matmul %56, %57, %cst_24 {dimension_numbers = #tpu.dot_dimension_numbers<[1], [0], [0], [1], [0, 0, 1, 1], [], []>} : vector<16x64xbf16>, vector<64x32xbf16>, vector<16x32xf32> -> vector<16x32xf32>
    %c0_25 = arith.constant 0 : index
    %c0_26 = arith.constant 0 : index
    %59 = vector.load %arg8[%c0_25, %c0_26] : memref<1x32xf32, #tpu.memory_space<vmem>>, vector<1x32xf32>
    %60 = vector.broadcast %59 : vector<1x32xf32> to vector<16x32xf32>
    %61 = arith.addf %58, %60 : vector<16x32xf32>
    %62 = arith.truncf %29 : vector<8x32xf32> to vector<8x32xbf16>
    %c0_27 = arith.constant 0 : index
    %c0_28 = arith.constant 0 : index
    %63 = vector.load %arg9[%c0_27, %c0_28] : memref<32x96xbf16, #tpu.memory_space<vmem>>, vector<32x96xbf16>
    %cst_29 = arith.constant dense<0.000000e+00> : vector<8x96xf32>
    %64 = tpu.matmul %62, %63, %cst_29 {dimension_numbers = #tpu.dot_dimension_numbers<[1], [0], [0], [1], [0, 0, 1, 1], [], []>} : vector<8x32xbf16>, vector<32x96xbf16>, vector<8x96xf32> -> vector<8x96xf32>
    %c0_30 = arith.constant 0 : index
    %c0_31 = arith.constant 0 : index
    %65 = vector.load %arg10[%c0_30, %c0_31] : memref<1x96xf32, #tpu.memory_space<vmem>>, vector<1x96xf32>
    %66 = vector.broadcast %65 : vector<1x96xf32> to vector<8x96xf32>
    %67 = arith.addf %64, %66 : vector<8x96xf32>
    %68 = vector.extract_strided_slice %67 {offsets = [0, 0], sizes = [8, 32], strides = [1, 1]} : vector<8x96xf32> to vector<8x32xf32>
    %69 = vector.extract_strided_slice %67 {offsets = [0, 32], sizes = [8, 64], strides = [1, 1]} : vector<8x96xf32> to vector<8x64xf32>
    %70 = vector.extract_strided_slice %61 {offsets = [0, 0], sizes = [16, 8], strides = [1, 1]} : vector<16x32xf32> to vector<16x8xf32>
    %71 = arith.truncf %70 : vector<16x8xf32> to vector<16x8xbf16>
    %72 = vector.extract_strided_slice %68 {offsets = [0, 0], sizes = [8, 8], strides = [1, 1]} : vector<8x32xf32> to vector<8x8xf32>
    %73 = arith.truncf %72 : vector<8x8xf32> to vector<8x8xbf16>
    %74 = vector.extract_strided_slice %69 {offsets = [0, 0], sizes = [8, 16], strides = [1, 1]} : vector<8x64xf32> to vector<8x16xf32>
    %75 = arith.truncf %74 : vector<8x16xf32> to vector<8x16xbf16>
    %cst_32 = arith.constant dense<0.000000e+00> : vector<16x8xf32>
    %76 = tpu.matmul %71, %73, %cst_32 {dimension_numbers = #tpu.dot_dimension_numbers<[1], [1], [0], [0], [0, 0, 1, 0], [], []>} : vector<16x8xbf16>, vector<8x8xbf16>, vector<16x8xf32> -> vector<16x8xf32>
    %cst_33 = arith.constant 0.353553385 : f32
    %77 = vector.broadcast %cst_33 : f32 to vector<16x8xf32>
    %78 = arith.mulf %76, %77 : vector<16x8xf32>
    %cst_34 = arith.constant dense<0xFF800000> : vector<16xf32>
    %79 = vector.multi_reduction <maximumf>, %78, %cst_34 [1] : vector<16x8xf32> to vector<16xf32>
    %80 = vector.shape_cast %79 : vector<16xf32> to vector<16x1xf32>
    %81 = vector.broadcast %80 : vector<16x1xf32> to vector<16x8xf32>
    %82 = arith.subf %78, %81 : vector<16x8xf32>
    %83 = math.exp %82 : vector<16x8xf32>
    %cst_35 = arith.constant dense<0.000000e+00> : vector<16xf32>
    %84 = vector.multi_reduction <add>, %83, %cst_35 [1] : vector<16x8xf32> to vector<16xf32>
    %85 = vector.shape_cast %84 : vector<16xf32> to vector<16x1xf32>
    %86 = tpu.reciprocal %85 {approx = true} : vector<16x1xf32> -> vector<16x1xf32>
    %87 = vector.broadcast %86 : vector<16x1xf32> to vector<16x8xf32>
    %88 = arith.mulf %83, %87 : vector<16x8xf32>
    %89 = arith.truncf %88 : vector<16x8xf32> to vector<16x8xbf16>
    %cst_36 = arith.constant dense<0.000000e+00> : vector<16x16xf32>
    %90 = tpu.matmul %89, %75, %cst_36 {dimension_numbers = #tpu.dot_dimension_numbers<[1], [0], [0], [1], [0, 0, 1, 1], [], []>} : vector<16x8xbf16>, vector<8x16xbf16>, vector<16x16xf32> -> vector<16x16xf32>
    %c0_37 = arith.constant 0 : index
    %c0_38 = arith.constant 0 : index
    %91 = vector.load %arg20[%c0_37, %c0_38] : memref<16x64xf32, #tpu.memory_space<vmem>>, vector<16x16xf32>
    tpu.vector_store %arg20[%c0_37, %c0_38], %90 {strides = array<i32>} : memref<16x64xf32, #tpu.memory_space<vmem>>, vector<16x16xf32>,
    %92 = vector.extract_strided_slice %61 {offsets = [0, 8], sizes = [16, 8], strides = [1, 1]} : vector<16x32xf32> to vector<16x8xf32>
    %93 = arith.truncf %92 : vector<16x8xf32> to vector<16x8xbf16>
    %94 = vector.extract_strided_slice %68 {offsets = [0, 8], sizes = [8, 8], strides = [1, 1]} : vector<8x32xf32> to vector<8x8xf32>
    %95 = arith.truncf %94 : vector<8x8xf32> to vector<8x8xbf16>
    %96 = vector.extract_strided_slice %69 {offsets = [0, 16], sizes = [8, 16], strides = [1, 1]} : vector<8x64xf32> to vector<8x16xf32>
    %97 = arith.truncf %96 : vector<8x16xf32> to vector<8x16xbf16>
    %cst_39 = arith.constant dense<0.000000e+00> : vector<16x8xf32>
    %98 = tpu.matmul %93, %95, %cst_39 {dimension_numbers = #tpu.dot_dimension_numbers<[1], [1], [0], [0], [0, 0, 1, 0], [], []>} : vector<16x8xbf16>, vector<8x8xbf16>, vector<16x8xf32> -> vector<16x8xf32>
    %cst_40 = arith.constant 0.353553385 : f32
    %99 = vector.broadcast %cst_40 : f32 to vector<16x8xf32>
    %100 = arith.mulf %98, %99 : vector<16x8xf32>
    %cst_41 = arith.constant dense<0xFF800000> : vector<16xf32>
    %101 = vector.multi_reduction <maximumf>, %100, %cst_41 [1] : vector<16x8xf32> to vector<16xf32>
    %102 = vector.shape_cast %101 : vector<16xf32> to vector<16x1xf32>
    %103 = vector.broadcast %102 : vector<16x1xf32> to vector<16x8xf32>
    %104 = arith.subf %100, %103 : vector<16x8xf32>
    %105 = math.exp %104 : vector<16x8xf32>
    %cst_42 = arith.constant dense<0.000000e+00> : vector<16xf32>
    %106 = vector.multi_reduction <add>, %105, %cst_42 [1] : vector<16x8xf32> to vector<16xf32>
    %107 = vector.shape_cast %106 : vector<16xf32> to vector<16x1xf32>
    %108 = tpu.reciprocal %107 {approx = true} : vector<16x1xf32> -> vector<16x1xf32>
    %109 = vector.broadcast %108 : vector<16x1xf32> to vector<16x8xf32>
    %110 = arith.mulf %105, %109 : vector<16x8xf32>
    %111 = arith.truncf %110 : vector<16x8xf32> to vector<16x8xbf16>
    %cst_43 = arith.constant dense<0.000000e+00> : vector<16x16xf32>
    %112 = tpu.matmul %111, %97, %cst_43 {dimension_numbers = #tpu.dot_dimension_numbers<[1], [0], [0], [1], [0, 0, 1, 1], [], []>} : vector<16x8xbf16>, vector<8x16xbf16>, vector<16x16xf32> -> vector<16x16xf32>
    %c0_44 = arith.constant 0 : index
    %c16 = arith.constant 16 : index
    %113 = vector.load %arg20[%c0_44, %c16] : memref<16x64xf32, #tpu.memory_space<vmem>>, vector<16x16xf32>
    tpu.vector_store %arg20[%c0_44, %c16], %112 {strides = array<i32>} : memref<16x64xf32, #tpu.memory_space<vmem>>, vector<16x16xf32>,
    %114 = vector.extract_strided_slice %61 {offsets = [0, 16], sizes = [16, 8], strides = [1, 1]} : vector<16x32xf32> to vector<16x8xf32>
    %115 = arith.truncf %114 : vector<16x8xf32> to vector<16x8xbf16>
    %116 = vector.extract_strided_slice %68 {offsets = [0, 16], sizes = [8, 8], strides = [1, 1]} : vector<8x32xf32> to vector<8x8xf32>
    %117 = arith.truncf %116 : vector<8x8xf32> to vector<8x8xbf16>
    %118 = vector.extract_strided_slice %69 {offsets = [0, 32], sizes = [8, 16], strides = [1, 1]} : vector<8x64xf32> to vector<8x16xf32>
    %119 = arith.truncf %118 : vector<8x16xf32> to vector<8x16xbf16>
    %cst_45 = arith.constant dense<0.000000e+00> : vector<16x8xf32>
    %120 = tpu.matmul %115, %117, %cst_45 {dimension_numbers = #tpu.dot_dimension_numbers<[1], [1], [0], [0], [0, 0, 1, 0], [], []>} : vector<16x8xbf16>, vector<8x8xbf16>, vector<16x8xf32> -> vector<16x8xf32>
    %cst_46 = arith.constant 0.353553385 : f32
    %121 = vector.broadcast %cst_46 : f32 to vector<16x8xf32>
    %122 = arith.mulf %120, %121 : vector<16x8xf32>
    %cst_47 = arith.constant dense<0xFF800000> : vector<16xf32>
    %123 = vector.multi_reduction <maximumf>, %122, %cst_47 [1] : vector<16x8xf32> to vector<16xf32>
    %124 = vector.shape_cast %123 : vector<16xf32> to vector<16x1xf32>
    %125 = vector.broadcast %124 : vector<16x1xf32> to vector<16x8xf32>
    %126 = arith.subf %122, %125 : vector<16x8xf32>
    %127 = math.exp %126 : vector<16x8xf32>
    %cst_48 = arith.constant dense<0.000000e+00> : vector<16xf32>
    %128 = vector.multi_reduction <add>, %127, %cst_48 [1] : vector<16x8xf32> to vector<16xf32>
    %129 = vector.shape_cast %128 : vector<16xf32> to vector<16x1xf32>
    %130 = tpu.reciprocal %129 {approx = true} : vector<16x1xf32> -> vector<16x1xf32>
    %131 = vector.broadcast %130 : vector<16x1xf32> to vector<16x8xf32>
    %132 = arith.mulf %127, %131 : vector<16x8xf32>
    %133 = arith.truncf %132 : vector<16x8xf32> to vector<16x8xbf16>
    %cst_49 = arith.constant dense<0.000000e+00> : vector<16x16xf32>
    %134 = tpu.matmul %133, %119, %cst_49 {dimension_numbers = #tpu.dot_dimension_numbers<[1], [0], [0], [1], [0, 0, 1, 1], [], []>} : vector<16x8xbf16>, vector<8x16xbf16>, vector<16x16xf32> -> vector<16x16xf32>
    %c0_50 = arith.constant 0 : index
    %c32 = arith.constant 32 : index
    %135 = vector.load %arg20[%c0_50, %c32] : memref<16x64xf32, #tpu.memory_space<vmem>>, vector<16x16xf32>
    tpu.vector_store %arg20[%c0_50, %c32], %134 {strides = array<i32>} : memref<16x64xf32, #tpu.memory_space<vmem>>, vector<16x16xf32>,
    %136 = vector.extract_strided_slice %61 {offsets = [0, 24], sizes = [16, 8], strides = [1, 1]} : vector<16x32xf32> to vector<16x8xf32>
    %137 = arith.truncf %136 : vector<16x8xf32> to vector<16x8xbf16>
    %138 = vector.extract_strided_slice %68 {offsets = [0, 24], sizes = [8, 8], strides = [1, 1]} : vector<8x32xf32> to vector<8x8xf32>
    %139 = arith.truncf %138 : vector<8x8xf32> to vector<8x8xbf16>
    %140 = vector.extract_strided_slice %69 {offsets = [0, 48], sizes = [8, 16], strides = [1, 1]} : vector<8x64xf32> to vector<8x16xf32>
    %141 = arith.truncf %140 : vector<8x16xf32> to vector<8x16xbf16>
    %cst_51 = arith.constant dense<0.000000e+00> : vector<16x8xf32>
    %142 = tpu.matmul %137, %139, %cst_51 {dimension_numbers = #tpu.dot_dimension_numbers<[1], [1], [0], [0], [0, 0, 1, 0], [], []>} : vector<16x8xbf16>, vector<8x8xbf16>, vector<16x8xf32> -> vector<16x8xf32>
    %cst_52 = arith.constant 0.353553385 : f32
    %143 = vector.broadcast %cst_52 : f32 to vector<16x8xf32>
    %144 = arith.mulf %142, %143 : vector<16x8xf32>
    %cst_53 = arith.constant dense<0xFF800000> : vector<16xf32>
    %145 = vector.multi_reduction <maximumf>, %144, %cst_53 [1] : vector<16x8xf32> to vector<16xf32>
    %146 = vector.shape_cast %145 : vector<16xf32> to vector<16x1xf32>
    %147 = vector.broadcast %146 : vector<16x1xf32> to vector<16x8xf32>
    %148 = arith.subf %144, %147 : vector<16x8xf32>
    %149 = math.exp %148 : vector<16x8xf32>
    %cst_54 = arith.constant dense<0.000000e+00> : vector<16xf32>
    %150 = vector.multi_reduction <add>, %149, %cst_54 [1] : vector<16x8xf32> to vector<16xf32>
    %151 = vector.shape_cast %150 : vector<16xf32> to vector<16x1xf32>
    %152 = tpu.reciprocal %151 {approx = true} : vector<16x1xf32> -> vector<16x1xf32>
    %153 = vector.broadcast %152 : vector<16x1xf32> to vector<16x8xf32>
    %154 = arith.mulf %149, %153 : vector<16x8xf32>
    %155 = arith.truncf %154 : vector<16x8xf32> to vector<16x8xbf16>
    %cst_55 = arith.constant dense<0.000000e+00> : vector<16x16xf32>
    %156 = tpu.matmul %155, %141, %cst_55 {dimension_numbers = #tpu.dot_dimension_numbers<[1], [0], [0], [1], [0, 0, 1, 1], [], []>} : vector<16x8xbf16>, vector<8x16xbf16>, vector<16x16xf32> -> vector<16x16xf32>
    %c0_56 = arith.constant 0 : index
    %c48 = arith.constant 48 : index
    %157 = vector.load %arg20[%c0_56, %c48] : memref<16x64xf32, #tpu.memory_space<vmem>>, vector<16x16xf32>
    tpu.vector_store %arg20[%c0_56, %c48], %156 {strides = array<i32>} : memref<16x64xf32, #tpu.memory_space<vmem>>, vector<16x16xf32>,
    %c0_57 = arith.constant 0 : index
    %c0_58 = arith.constant 0 : index
    %158 = vector.load %arg20[%c0_57, %c0_58] : memref<16x64xf32, #tpu.memory_space<vmem>>, vector<16x64xf32>
    %159 = arith.truncf %158 : vector<16x64xf32> to vector<16x64xbf16>
    %c0_59 = arith.constant 0 : index
    %c0_60 = arith.constant 0 : index
    %160 = vector.load %arg11[%c0_59, %c0_60] : memref<64x64xbf16, #tpu.memory_space<vmem>>, vector<64x64xbf16>
    %cst_61 = arith.constant dense<0.000000e+00> : vector<16x64xf32>
    %161 = tpu.matmul %159, %160, %cst_61 {dimension_numbers = #tpu.dot_dimension_numbers<[1], [0], [0], [1], [0, 0, 1, 1], [], []>} : vector<16x64xbf16>, vector<64x64xbf16>, vector<16x64xf32> -> vector<16x64xf32>
    %c0_62 = arith.constant 0 : index
    %c0_63 = arith.constant 0 : index
    %162 = vector.load %arg12[%c0_62, %c0_63] : memref<1x64xf32, #tpu.memory_space<vmem>>, vector<1x64xf32>
    %163 = vector.broadcast %162 : vector<1x64xf32> to vector<16x64xf32>
    %164 = arith.addf %161, %163 : vector<16x64xf32>
    %165 = arith.addf %3, %164 : vector<16x64xf32>
    %c0_64 = arith.constant 0 : index
    %c0_65 = arith.constant 0 : index
    %166 = vector.load %arg13[%c0_64, %c0_65] : memref<1x64xf32, #tpu.memory_space<vmem>>, vector<1x64xf32>
    %c0_66 = arith.constant 0 : index
    %c0_67 = arith.constant 0 : index
    %167 = vector.load %arg14[%c0_66, %c0_67] : memref<1x64xf32, #tpu.memory_space<vmem>>, vector<1x64xf32>
    %c0_68 = arith.constant 0 : index
    %c0_69 = arith.constant 0 : index
    %168 = vector.load %arg15[%c0_68, %c0_69] : memref<64x64xbf16, #tpu.memory_space<vmem>>, vector<64x64xbf16>
    %c0_70 = arith.constant 0 : index
    %c0_71 = arith.constant 0 : index
    %169 = vector.load %arg16[%c0_70, %c0_71] : memref<1x64xf32, #tpu.memory_space<vmem>>, vector<1x64xf32>
    %c0_72 = arith.constant 0 : index
    %c0_73 = arith.constant 0 : index
    %170 = vector.load %arg17[%c0_72, %c0_73] : memref<64x64xbf16, #tpu.memory_space<vmem>>, vector<64x64xbf16>
    %c0_74 = arith.constant 0 : index
    %c0_75 = arith.constant 0 : index
    %171 = vector.load %arg18[%c0_74, %c0_75] : memref<1x64xf32, #tpu.memory_space<vmem>>, vector<1x64xf32>
    %cst_76 = arith.constant dense<0.000000e+00> : vector<16xf32>
    %172 = vector.multi_reduction <add>, %165, %cst_76 [1] : vector<16x64xf32> to vector<16xf32>
    %173 = vector.shape_cast %172 : vector<16xf32> to vector<16x1xf32>
    %cst_77 = arith.constant 6.400000e+01 : f32
    %174 = vector.broadcast %cst_77 : f32 to vector<16x1xf32>
    %175 = arith.divf %173, %174 : vector<16x1xf32>
    %176 = vector.broadcast %175 : vector<16x1xf32> to vector<16x64xf32>
    %177 = arith.subf %165, %176 : vector<16x64xf32>
    %178 = vector.broadcast %175 : vector<16x1xf32> to vector<16x64xf32>
    %179 = arith.subf %165, %178 : vector<16x64xf32>
    %180 = arith.mulf %177, %179 : vector<16x64xf32>
    %cst_78 = arith.constant dense<0.000000e+00> : vector<16xf32>
    %181 = vector.multi_reduction <add>, %180, %cst_78 [1] : vector<16x64xf32> to vector<16xf32>
    %182 = vector.shape_cast %181 : vector<16xf32> to vector<16x1xf32>
    %cst_79 = arith.constant 6.400000e+01 : f32
    %183 = vector.broadcast %cst_79 : f32 to vector<16x1xf32>
    %184 = arith.divf %182, %183 : vector<16x1xf32>
    %185 = vector.broadcast %175 : vector<16x1xf32> to vector<16x64xf32>
    %186 = arith.subf %165, %185 : vector<16x64xf32>
    %cst_80 = arith.constant 9.99999974E-6 : f32
    %187 = vector.broadcast %cst_80 : f32 to vector<16x1xf32>
    %188 = arith.addf %184, %187 : vector<16x1xf32>
    %189 = math.rsqrt %188 : vector<16x1xf32>
    %190 = vector.broadcast %189 : vector<16x1xf32> to vector<16x64xf32>
    %191 = arith.mulf %186, %190 : vector<16x64xf32>
    %192 = vector.broadcast %166 : vector<1x64xf32> to vector<16x64xf32>
    %193 = arith.mulf %191, %192 : vector<16x64xf32>
    %194 = vector.broadcast %167 : vector<1x64xf32> to vector<16x64xf32>
    %195 = arith.addf %193, %194 : vector<16x64xf32>
    %196 = arith.truncf %195 : vector<16x64xf32> to vector<16x64xbf16>
    %cst_81 = arith.constant dense<0.000000e+00> : vector<16x64xf32>
    %197 = tpu.matmul %196, %168, %cst_81 {dimension_numbers = #tpu.dot_dimension_numbers<[1], [0], [0], [1], [0, 0, 1, 1], [], []>} : vector<16x64xbf16>, vector<64x64xbf16>, vector<16x64xf32> -> vector<16x64xf32>
    %198 = vector.broadcast %169 : vector<1x64xf32> to vector<16x64xf32>
    %199 = arith.addf %197, %198 : vector<16x64xf32>
    %cst_82 = arith.constant 5.000000e-01 : f32
    %200 = vector.broadcast %cst_82 : f32 to vector<16x64xf32>
    %201 = arith.mulf %200, %199 : vector<16x64xf32>
    %cst_83 = arith.constant 4.471500e-02 : f32
    %202 = vector.broadcast %cst_83 : f32 to vector<16x64xf32>
    %203 = arith.mulf %202, %199 : vector<16x64xf32>
    %204 = arith.mulf %203, %199 : vector<16x64xf32>
    %205 = arith.mulf %204, %199 : vector<16x64xf32>
    %206 = arith.addf %199, %205 : vector<16x64xf32>
    %cst_84 = arith.constant 0.797884583 : f32
    %207 = vector.broadcast %cst_84 : f32 to vector<16x64xf32>
    %208 = arith.mulf %207, %206 : vector<16x64xf32>
    %209 = math.tanh %208 : vector<16x64xf32>
    %cst_85 = arith.constant 1.000000e+00 : f32
    %210 = vector.broadcast %cst_85 : f32 to vector<16x64xf32>
    %211 = arith.addf %210, %209 : vector<16x64xf32>
    %212 = arith.mulf %201, %211 : vector<16x64xf32>
    %213 = arith.truncf %212 : vector<16x64xf32> to vector<16x64xbf16>
    %cst_86 = arith.constant dense<0.000000e+00> : vector<16x64xf32>
    %214 = tpu.matmul %213, %170, %cst_86 {dimension_numbers = #tpu.dot_dimension_numbers<[1], [0], [0], [1], [0, 0, 1, 1], [], []>} : vector<16x64xbf16>, vector<64x64xbf16>, vector<16x64xf32> -> vector<16x64xf32>
    %215 = vector.broadcast %171 : vector<1x64xf32> to vector<16x64xf32>
    %216 = arith.addf %214, %215 : vector<16x64xf32>
    %217 = arith.addf %165, %216 : vector<16x64xf32>
    %c0_87 = arith.constant 0 : index
    %c0_88 = arith.constant 0 : index
    %c0_89 = arith.constant 0 : index
    %218 = vector.load %arg19[%c0_87, %c0_88, %c0_89] : memref<1x16x64xf32, #tpu.memory_space<vmem>>, vector<1x16x64xf32>
    %219 = vector.shape_cast %218 : vector<1x16x64xf32> to vector<16x64xf32>
    %220 = vector.shape_cast %217 : vector<16x64xf32> to vector<1x16x64xf32>
    tpu.vector_store %arg19[%c0_87, %c0_88, %c0_89], %220 {strides = array<i32>} : memref<1x16x64xf32, #tpu.memory_space<vmem>>, vector<1x16x64xf32>,
    return
  }
  func.func @transform_0(%arg0: i32) -> (i32, i32, i32) {
    %c0_i32 = arith.constant 0 : i32
    %c0_i32_0 = arith.constant 0 : i32
    %c0_i32_1 = arith.constant 0 : i32
    return %arg0, %c0_i32, %c0_i32_0 : i32, i32, i32
  }
  func.func @transform_1(%arg0: i32) -> (i32, i32, i32) {
    %c0_i32 = arith.constant 0 : i32
    %c0_i32_0 = arith.constant 0 : i32
    %c0_i32_1 = arith.constant 0 : i32
    return %arg0, %c0_i32, %c0_i32_0 : i32, i32, i32
  }
  func.func @transform_2(%arg0: i32) -> (i32, i32) {
    %c0_i32 = arith.constant 0 : i32
    %c0_i32_0 = arith.constant 0 : i32
    %c0_i32_1 = arith.constant 0 : i32
    return %c0_i32, %c0_i32_0 : i32, i32
  }
  func.func @transform_3(%arg0: i32) -> (i32, i32) {
    %c0_i32 = arith.constant 0 : i32
    %c0_i32_0 = arith.constant 0 : i32
    %c0_i32_1 = arith.constant 0 : i32
    return %c0_i32, %c0_i32_0 : i32, i32
  }
  func.func @transform_4(%arg0: i32) -> (i32, i32) {
    %c0_i32 = arith.constant 0 : i32
    %c0_i32_0 = arith.constant 0 : i32
    %c0_i32_1 = arith.constant 0 : i32
    return %c0_i32, %c0_i32_0 : i32, i32
  }
  func.func @transform_5(%arg0: i32) -> (i32, i32) {
    %c0_i32 = arith.constant 0 : i32
    %c0_i32_0 = arith.constant 0 : i32
    %c0_i32_1 = arith.constant 0 : i32
    return %c0_i32, %c0_i32_0 : i32, i32
  }
  func.func @transform_6(%arg0: i32) -> (i32, i32) {
    %c0_i32 = arith.constant 0 : i32
    %c0_i32_0 = arith.constant 0 : i32
    %c0_i32_1 = arith.constant 0 : i32
    return %c0_i32, %c0_i32_0 : i32, i32
  }
  func.func @transform_7(%arg0: i32) -> (i32, i32) {
    %c0_i32 = arith.constant 0 : i32
    %c0_i32_0 = arith.constant 0 : i32
    %c0_i32_1 = arith.constant 0 : i32
    return %c0_i32, %c0_i32_0 : i32, i32
  }
  func.func @transform_8(%arg0: i32) -> (i32, i32) {
    %c0_i32 = arith.constant 0 : i32
    %c0_i32_0 = arith.constant 0 : i32
    %c0_i32_1 = arith.constant 0 : i32
    return %c0_i32, %c0_i32_0 : i32, i32
  }
  func.func @transform_9(%arg0: i32) -> (i32, i32) {
    %c0_i32 = arith.constant 0 : i32
    %c0_i32_0 = arith.constant 0 : i32
    %c0_i32_1 = arith.constant 0 : i32
    return %c0_i32, %c0_i32_0 : i32, i32
  }
  func.func @transform_10(%arg0: i32) -> (i32, i32) {
    %c0_i32 = arith.constant 0 : i32
    %c0_i32_0 = arith.constant 0 : i32
    %c0_i32_1 = arith.constant 0 : i32
    return %c0_i32, %c0_i32_0 : i32, i32
  }
  func.func @transform_11(%arg0: i32) -> (i32, i32) {
    %c0_i32 = arith.constant 0 : i32
    %c0_i32_0 = arith.constant 0 : i32
    %c0_i32_1 = arith.constant 0 : i32
    return %c0_i32, %c0_i32_0 : i32, i32
  }
  func.func @transform_12(%arg0: i32) -> (i32, i32) {
    %c0_i32 = arith.constant 0 : i32
    %c0_i32_0 = arith.constant 0 : i32
    %c0_i32_1 = arith.constant 0 : i32
    return %c0_i32, %c0_i32_0 : i32, i32
  }
  func.func @transform_13(%arg0: i32) -> (i32, i32) {
    %c0_i32 = arith.constant 0 : i32
    %c0_i32_0 = arith.constant 0 : i32
    %c0_i32_1 = arith.constant 0 : i32
    return %c0_i32, %c0_i32_0 : i32, i32
  }
  func.func @transform_14(%arg0: i32) -> (i32, i32) {
    %c0_i32 = arith.constant 0 : i32
    %c0_i32_0 = arith.constant 0 : i32
    %c0_i32_1 = arith.constant 0 : i32
    return %c0_i32, %c0_i32_0 : i32, i32
  }
  func.func @transform_15(%arg0: i32) -> (i32, i32) {
    %c0_i32 = arith.constant 0 : i32
    %c0_i32_0 = arith.constant 0 : i32
    %c0_i32_1 = arith.constant 0 : i32
    return %c0_i32, %c0_i32_0 : i32, i32
  }
  func.func @transform_16(%arg0: i32) -> (i32, i32) {
    %c0_i32 = arith.constant 0 : i32
    %c0_i32_0 = arith.constant 0 : i32
    %c0_i32_1 = arith.constant 0 : i32
    return %c0_i32, %c0_i32_0 : i32, i32
  }
  func.func @transform_17(%arg0: i32) -> (i32, i32) {
    %c0_i32 = arith.constant 0 : i32
    %c0_i32_0 = arith.constant 0 : i32
    %c0_i32_1 = arith.constant 0 : i32
    return %c0_i32, %c0_i32_0 : i32, i32
  }
  func.func @transform_18(%arg0: i32) -> (i32, i32, i32) {
    %c0_i32 = arith.constant 0 : i32
    %c0_i32_0 = arith.constant 0 : i32
    %c0_i32_1 = arith.constant 0 : i32
    return %arg0, %c0_i32, %c0_i32_0 : i32, i32, i32
  }
}

module attributes {stable_mosaic.version = 11 : i64} {
  func.func @_cross_block_kernel(%arg0: i32, %arg1: memref<1x16x64xf32, #tpu.memory_space<vmem>>, %arg2: memref<1x8x32xf32, #tpu.memory_space<vmem>>, %arg3: memref<1x64xf32, #tpu.memory_space<vmem>>, %arg4: memref<1x64xf32, #tpu.memory_space<vmem>>, %arg5: memref<1x32xf32, #tpu.memory_space<vmem>>, %arg6: memref<1x32xf32, #tpu.memory_space<vmem>>, %arg7: memref<32x32xbf16, #tpu.memory_space<vmem>>, %arg8: memref<1x32xf32, #tpu.memory_space<vmem>>, %arg9: memref<64x64xbf16, #tpu.memory_space<vmem>>, %arg10: memref<1x64xf32, #tpu.memory_space<vmem>>, %arg11: memref<32x32xbf16, #tpu.memory_space<vmem>>, %arg12: memref<1x32xf32, #tpu.memory_space<vmem>>, %arg13: memref<1x32xf32, #tpu.memory_space<vmem>>, %arg14: memref<1x32xf32, #tpu.memory_space<vmem>>, %arg15: memref<32x32xbf16, #tpu.memory_space<vmem>>, %arg16: memref<1x32xf32, #tpu.memory_space<vmem>>, %arg17: memref<32x32xbf16, #tpu.memory_space<vmem>>, %arg18: memref<1x32xf32, #tpu.memory_space<vmem>>, %arg19: memref<1x8x32xf32, #tpu.memory_space<vmem>>, %arg20: memref<8x32xf32, #tpu.memory_space<vmem>>) attributes {dimension_semantics = [#tpu.dimension_semantics<parallel>], iteration_bounds = array<i64: 2>, scalar_prefetch = 0 : i64, scratch_operands = 1 : i64, tpu.core_type = #tpu.core_type<tc>, window_params = [{transform_indices = @transform_0, window_bounds = array<i64: 1, 16, 64>}, {transform_indices = @transform_1, window_bounds = array<i64: 1, 8, 32>}, {pipeline_mode = #tpu.pipeline_mode<synchronous>, transform_indices = @transform_2, window_bounds = array<i64: 1, 64>}, {pipeline_mode = #tpu.pipeline_mode<synchronous>, transform_indices = @transform_3, window_bounds = array<i64: 1, 64>}, {pipeline_mode = #tpu.pipeline_mode<synchronous>, transform_indices = @transform_4, window_bounds = array<i64: 1, 32>}, {pipeline_mode = #tpu.pipeline_mode<synchronous>, transform_indices = @transform_5, window_bounds = array<i64: 1, 32>}, {pipeline_mode = #tpu.pipeline_mode<synchronous>, transform_indices = @transform_6, window_bounds = array<i64: 32, 32>}, {pipeline_mode = #tpu.pipeline_mode<synchronous>, transform_indices = @transform_7, window_bounds = array<i64: 1, 32>}, {pipeline_mode = #tpu.pipeline_mode<synchronous>, transform_indices = @transform_8, window_bounds = array<i64: 64, 64>}, {pipeline_mode = #tpu.pipeline_mode<synchronous>, transform_indices = @transform_9, window_bounds = array<i64: 1, 64>}, {pipeline_mode = #tpu.pipeline_mode<synchronous>, transform_indices = @transform_10, window_bounds = array<i64: 32, 32>}, {pipeline_mode = #tpu.pipeline_mode<synchronous>, transform_indices = @transform_11, window_bounds = array<i64: 1, 32>}, {pipeline_mode = #tpu.pipeline_mode<synchronous>, transform_indices = @transform_12, window_bounds = array<i64: 1, 32>}, {pipeline_mode = #tpu.pipeline_mode<synchronous>, transform_indices = @transform_13, window_bounds = array<i64: 1, 32>}, {pipeline_mode = #tpu.pipeline_mode<synchronous>, transform_indices = @transform_14, window_bounds = array<i64: 32, 32>}, {pipeline_mode = #tpu.pipeline_mode<synchronous>, transform_indices = @transform_15, window_bounds = array<i64: 1, 32>}, {pipeline_mode = #tpu.pipeline_mode<synchronous>, transform_indices = @transform_16, window_bounds = array<i64: 32, 32>}, {pipeline_mode = #tpu.pipeline_mode<synchronous>, transform_indices = @transform_17, window_bounds = array<i64: 1, 32>}, {transform_indices = @transform_18, window_bounds = array<i64: 1, 8, 32>}]} {
    %c0 = arith.constant 0 : index
    %c0_0 = arith.constant 0 : index
    %c0_1 = arith.constant 0 : index
    %0 = vector.load %arg1[%c0, %c0_0, %c0_1] : memref<1x16x64xf32, #tpu.memory_space<vmem>>, vector<1x16x64xf32>
    %1 = vector.shape_cast %0 : vector<1x16x64xf32> to vector<16x64xf32>
    %c0_2 = arith.constant 0 : index
    %c0_3 = arith.constant 0 : index
    %c0_4 = arith.constant 0 : index
    %2 = vector.load %arg2[%c0_2, %c0_3, %c0_4] : memref<1x8x32xf32, #tpu.memory_space<vmem>>, vector<1x8x32xf32>
    %3 = vector.shape_cast %2 : vector<1x8x32xf32> to vector<8x32xf32>
    %c0_5 = arith.constant 0 : index
    %c0_6 = arith.constant 0 : index
    %4 = vector.load %arg3[%c0_5, %c0_6] : memref<1x64xf32, #tpu.memory_space<vmem>>, vector<1x64xf32>
    %c0_7 = arith.constant 0 : index
    %c0_8 = arith.constant 0 : index
    %5 = vector.load %arg4[%c0_7, %c0_8] : memref<1x64xf32, #tpu.memory_space<vmem>>, vector<1x64xf32>
    %cst = arith.constant dense<0.000000e+00> : vector<16xf32>
    %6 = vector.multi_reduction <add>, %1, %cst [1] : vector<16x64xf32> to vector<16xf32>
    %7 = vector.shape_cast %6 : vector<16xf32> to vector<16x1xf32>
    %cst_9 = arith.constant 6.400000e+01 : f32
    %8 = vector.broadcast %cst_9 : f32 to vector<16x1xf32>
    %9 = arith.divf %7, %8 : vector<16x1xf32>
    %10 = vector.broadcast %9 : vector<16x1xf32> to vector<16x64xf32>
    %11 = arith.subf %1, %10 : vector<16x64xf32>
    %12 = vector.broadcast %9 : vector<16x1xf32> to vector<16x64xf32>
    %13 = arith.subf %1, %12 : vector<16x64xf32>
    %14 = arith.mulf %11, %13 : vector<16x64xf32>
    %cst_10 = arith.constant dense<0.000000e+00> : vector<16xf32>
    %15 = vector.multi_reduction <add>, %14, %cst_10 [1] : vector<16x64xf32> to vector<16xf32>
    %16 = vector.shape_cast %15 : vector<16xf32> to vector<16x1xf32>
    %cst_11 = arith.constant 6.400000e+01 : f32
    %17 = vector.broadcast %cst_11 : f32 to vector<16x1xf32>
    %18 = arith.divf %16, %17 : vector<16x1xf32>
    %19 = vector.broadcast %9 : vector<16x1xf32> to vector<16x64xf32>
    %20 = arith.subf %1, %19 : vector<16x64xf32>
    %cst_12 = arith.constant 9.99999974E-6 : f32
    %21 = vector.broadcast %cst_12 : f32 to vector<16x1xf32>
    %22 = arith.addf %18, %21 : vector<16x1xf32>
    %23 = math.rsqrt %22 : vector<16x1xf32>
    %24 = vector.broadcast %23 : vector<16x1xf32> to vector<16x64xf32>
    %25 = arith.mulf %20, %24 : vector<16x64xf32>
    %26 = vector.broadcast %4 : vector<1x64xf32> to vector<16x64xf32>
    %27 = arith.mulf %25, %26 : vector<16x64xf32>
    %28 = vector.broadcast %5 : vector<1x64xf32> to vector<16x64xf32>
    %29 = arith.addf %27, %28 : vector<16x64xf32>
    %c0_13 = arith.constant 0 : index
    %c0_14 = arith.constant 0 : index
    %30 = vector.load %arg5[%c0_13, %c0_14] : memref<1x32xf32, #tpu.memory_space<vmem>>, vector<1x32xf32>
    %c0_15 = arith.constant 0 : index
    %c0_16 = arith.constant 0 : index
    %31 = vector.load %arg6[%c0_15, %c0_16] : memref<1x32xf32, #tpu.memory_space<vmem>>, vector<1x32xf32>
    %cst_17 = arith.constant dense<0.000000e+00> : vector<8xf32>
    %32 = vector.multi_reduction <add>, %3, %cst_17 [1] : vector<8x32xf32> to vector<8xf32>
    %33 = vector.shape_cast %32 : vector<8xf32> to vector<8x1xf32>
    %cst_18 = arith.constant 3.200000e+01 : f32
    %34 = vector.broadcast %cst_18 : f32 to vector<8x1xf32>
    %35 = arith.divf %33, %34 : vector<8x1xf32>
    %36 = vector.broadcast %35 : vector<8x1xf32> to vector<8x32xf32>
    %37 = arith.subf %3, %36 : vector<8x32xf32>
    %38 = vector.broadcast %35 : vector<8x1xf32> to vector<8x32xf32>
    %39 = arith.subf %3, %38 : vector<8x32xf32>
    %40 = arith.mulf %37, %39 : vector<8x32xf32>
    %cst_19 = arith.constant dense<0.000000e+00> : vector<8xf32>
    %41 = vector.multi_reduction <add>, %40, %cst_19 [1] : vector<8x32xf32> to vector<8xf32>
    %42 = vector.shape_cast %41 : vector<8xf32> to vector<8x1xf32>
    %cst_20 = arith.constant 3.200000e+01 : f32
    %43 = vector.broadcast %cst_20 : f32 to vector<8x1xf32>
    %44 = arith.divf %42, %43 : vector<8x1xf32>
    %45 = vector.broadcast %35 : vector<8x1xf32> to vector<8x32xf32>
    %46 = arith.subf %3, %45 : vector<8x32xf32>
    %cst_21 = arith.constant 9.99999974E-6 : f32
    %47 = vector.broadcast %cst_21 : f32 to vector<8x1xf32>
    %48 = arith.addf %44, %47 : vector<8x1xf32>
    %49 = math.rsqrt %48 : vector<8x1xf32>
    %50 = vector.broadcast %49 : vector<8x1xf32> to vector<8x32xf32>
    %51 = arith.mulf %46, %50 : vector<8x32xf32>
    %52 = vector.broadcast %30 : vector<1x32xf32> to vector<8x32xf32>
    %53 = arith.mulf %51, %52 : vector<8x32xf32>
    %54 = vector.broadcast %31 : vector<1x32xf32> to vector<8x32xf32>
    %55 = arith.addf %53, %54 : vector<8x32xf32>
    %56 = arith.truncf %55 : vector<8x32xf32> to vector<8x32xbf16>
    %c0_22 = arith.constant 0 : index
    %c0_23 = arith.constant 0 : index
    %57 = vector.load %arg7[%c0_22, %c0_23] : memref<32x32xbf16, #tpu.memory_space<vmem>>, vector<32x32xbf16>
    %cst_24 = arith.constant dense<0.000000e+00> : vector<8x32xf32>
    %58 = tpu.matmul %56, %57, %cst_24 {dimension_numbers = #tpu.dot_dimension_numbers<[1], [0], [0], [1], [0, 0, 1, 1], [], []>} : vector<8x32xbf16>, vector<32x32xbf16>, vector<8x32xf32> -> vector<8x32xf32>
    %c0_25 = arith.constant 0 : index
    %c0_26 = arith.constant 0 : index
    %59 = vector.load %arg8[%c0_25, %c0_26] : memref<1x32xf32, #tpu.memory_space<vmem>>, vector<1x32xf32>
    %60 = vector.broadcast %59 : vector<1x32xf32> to vector<8x32xf32>
    %61 = arith.addf %58, %60 : vector<8x32xf32>
    %62 = arith.truncf %29 : vector<16x64xf32> to vector<16x64xbf16>
    %c0_27 = arith.constant 0 : index
    %c0_28 = arith.constant 0 : index
    %63 = vector.load %arg9[%c0_27, %c0_28] : memref<64x64xbf16, #tpu.memory_space<vmem>>, vector<64x64xbf16>
    %cst_29 = arith.constant dense<0.000000e+00> : vector<16x64xf32>
    %64 = tpu.matmul %62, %63, %cst_29 {dimension_numbers = #tpu.dot_dimension_numbers<[1], [0], [0], [1], [0, 0, 1, 1], [], []>} : vector<16x64xbf16>, vector<64x64xbf16>, vector<16x64xf32> -> vector<16x64xf32>
    %c0_30 = arith.constant 0 : index
    %c0_31 = arith.constant 0 : index
    %65 = vector.load %arg10[%c0_30, %c0_31] : memref<1x64xf32, #tpu.memory_space<vmem>>, vector<1x64xf32>
    %66 = vector.broadcast %65 : vector<1x64xf32> to vector<16x64xf32>
    %67 = arith.addf %64, %66 : vector<16x64xf32>
    %68 = vector.extract_strided_slice %67 {offsets = [0, 0], sizes = [16, 32], strides = [1, 1]} : vector<16x64xf32> to vector<16x32xf32>
    %69 = vector.extract_strided_slice %67 {offsets = [0, 32], sizes = [16, 32], strides = [1, 1]} : vector<16x64xf32> to vector<16x32xf32>
    %70 = vector.extract_strided_slice %61 {offsets = [0, 0], sizes = [8, 8], strides = [1, 1]} : vector<8x32xf32> to vector<8x8xf32>
    %71 = arith.truncf %70 : vector<8x8xf32> to vector<8x8xbf16>
    %72 = vector.extract_strided_slice %68 {offsets = [0, 0], sizes = [16, 8], strides = [1, 1]} : vector<16x32xf32> to vector<16x8xf32>
    %73 = arith.truncf %72 : vector<16x8xf32> to vector<16x8xbf16>
    %74 = vector.extract_strided_slice %69 {offsets = [0, 0], sizes = [16, 8], strides = [1, 1]} : vector<16x32xf32> to vector<16x8xf32>
    %75 = arith.truncf %74 : vector<16x8xf32> to vector<16x8xbf16>
    %cst_32 = arith.constant dense<0.000000e+00> : vector<8x16xf32>
    %76 = tpu.matmul %71, %73, %cst_32 {dimension_numbers = #tpu.dot_dimension_numbers<[1], [1], [0], [0], [0, 0, 1, 0], [], []>} : vector<8x8xbf16>, vector<16x8xbf16>, vector<8x16xf32> -> vector<8x16xf32>
    %cst_33 = arith.constant 0.353553385 : f32
    %77 = vector.broadcast %cst_33 : f32 to vector<8x16xf32>
    %78 = arith.mulf %76, %77 : vector<8x16xf32>
    %cst_34 = arith.constant dense<0xFF800000> : vector<8xf32>
    %79 = vector.multi_reduction <maximumf>, %78, %cst_34 [1] : vector<8x16xf32> to vector<8xf32>
    %80 = vector.shape_cast %79 : vector<8xf32> to vector<8x1xf32>
    %81 = vector.broadcast %80 : vector<8x1xf32> to vector<8x16xf32>
    %82 = arith.subf %78, %81 : vector<8x16xf32>
    %83 = math.exp %82 : vector<8x16xf32>
    %cst_35 = arith.constant dense<0.000000e+00> : vector<8xf32>
    %84 = vector.multi_reduction <add>, %83, %cst_35 [1] : vector<8x16xf32> to vector<8xf32>
    %85 = vector.shape_cast %84 : vector<8xf32> to vector<8x1xf32>
    %86 = tpu.reciprocal %85 {approx = true} : vector<8x1xf32> -> vector<8x1xf32>
    %87 = vector.broadcast %86 : vector<8x1xf32> to vector<8x16xf32>
    %88 = arith.mulf %83, %87 : vector<8x16xf32>
    %89 = arith.truncf %88 : vector<8x16xf32> to vector<8x16xbf16>
    %cst_36 = arith.constant dense<0.000000e+00> : vector<8x8xf32>
    %90 = tpu.matmul %89, %75, %cst_36 {dimension_numbers = #tpu.dot_dimension_numbers<[1], [0], [0], [1], [0, 0, 1, 1], [], []>} : vector<8x16xbf16>, vector<16x8xbf16>, vector<8x8xf32> -> vector<8x8xf32>
    %c0_37 = arith.constant 0 : index
    %c0_38 = arith.constant 0 : index
    %91 = vector.load %arg20[%c0_37, %c0_38] : memref<8x32xf32, #tpu.memory_space<vmem>>, vector<8x8xf32>
    tpu.vector_store %arg20[%c0_37, %c0_38], %90 {strides = array<i32>} : memref<8x32xf32, #tpu.memory_space<vmem>>, vector<8x8xf32>,
    %92 = vector.extract_strided_slice %61 {offsets = [0, 8], sizes = [8, 8], strides = [1, 1]} : vector<8x32xf32> to vector<8x8xf32>
    %93 = arith.truncf %92 : vector<8x8xf32> to vector<8x8xbf16>
    %94 = vector.extract_strided_slice %68 {offsets = [0, 8], sizes = [16, 8], strides = [1, 1]} : vector<16x32xf32> to vector<16x8xf32>
    %95 = arith.truncf %94 : vector<16x8xf32> to vector<16x8xbf16>
    %96 = vector.extract_strided_slice %69 {offsets = [0, 8], sizes = [16, 8], strides = [1, 1]} : vector<16x32xf32> to vector<16x8xf32>
    %97 = arith.truncf %96 : vector<16x8xf32> to vector<16x8xbf16>
    %cst_39 = arith.constant dense<0.000000e+00> : vector<8x16xf32>
    %98 = tpu.matmul %93, %95, %cst_39 {dimension_numbers = #tpu.dot_dimension_numbers<[1], [1], [0], [0], [0, 0, 1, 0], [], []>} : vector<8x8xbf16>, vector<16x8xbf16>, vector<8x16xf32> -> vector<8x16xf32>
    %cst_40 = arith.constant 0.353553385 : f32
    %99 = vector.broadcast %cst_40 : f32 to vector<8x16xf32>
    %100 = arith.mulf %98, %99 : vector<8x16xf32>
    %cst_41 = arith.constant dense<0xFF800000> : vector<8xf32>
    %101 = vector.multi_reduction <maximumf>, %100, %cst_41 [1] : vector<8x16xf32> to vector<8xf32>
    %102 = vector.shape_cast %101 : vector<8xf32> to vector<8x1xf32>
    %103 = vector.broadcast %102 : vector<8x1xf32> to vector<8x16xf32>
    %104 = arith.subf %100, %103 : vector<8x16xf32>
    %105 = math.exp %104 : vector<8x16xf32>
    %cst_42 = arith.constant dense<0.000000e+00> : vector<8xf32>
    %106 = vector.multi_reduction <add>, %105, %cst_42 [1] : vector<8x16xf32> to vector<8xf32>
    %107 = vector.shape_cast %106 : vector<8xf32> to vector<8x1xf32>
    %108 = tpu.reciprocal %107 {approx = true} : vector<8x1xf32> -> vector<8x1xf32>
    %109 = vector.broadcast %108 : vector<8x1xf32> to vector<8x16xf32>
    %110 = arith.mulf %105, %109 : vector<8x16xf32>
    %111 = arith.truncf %110 : vector<8x16xf32> to vector<8x16xbf16>
    %cst_43 = arith.constant dense<0.000000e+00> : vector<8x8xf32>
    %112 = tpu.matmul %111, %97, %cst_43 {dimension_numbers = #tpu.dot_dimension_numbers<[1], [0], [0], [1], [0, 0, 1, 1], [], []>} : vector<8x16xbf16>, vector<16x8xbf16>, vector<8x8xf32> -> vector<8x8xf32>
    %c0_44 = arith.constant 0 : index
    %c8 = arith.constant 8 : index
    %113 = vector.load %arg20[%c0_44, %c8] : memref<8x32xf32, #tpu.memory_space<vmem>>, vector<8x8xf32>
    tpu.vector_store %arg20[%c0_44, %c8], %112 {strides = array<i32>} : memref<8x32xf32, #tpu.memory_space<vmem>>, vector<8x8xf32>,
    %114 = vector.extract_strided_slice %61 {offsets = [0, 16], sizes = [8, 8], strides = [1, 1]} : vector<8x32xf32> to vector<8x8xf32>
    %115 = arith.truncf %114 : vector<8x8xf32> to vector<8x8xbf16>
    %116 = vector.extract_strided_slice %68 {offsets = [0, 16], sizes = [16, 8], strides = [1, 1]} : vector<16x32xf32> to vector<16x8xf32>
    %117 = arith.truncf %116 : vector<16x8xf32> to vector<16x8xbf16>
    %118 = vector.extract_strided_slice %69 {offsets = [0, 16], sizes = [16, 8], strides = [1, 1]} : vector<16x32xf32> to vector<16x8xf32>
    %119 = arith.truncf %118 : vector<16x8xf32> to vector<16x8xbf16>
    %cst_45 = arith.constant dense<0.000000e+00> : vector<8x16xf32>
    %120 = tpu.matmul %115, %117, %cst_45 {dimension_numbers = #tpu.dot_dimension_numbers<[1], [1], [0], [0], [0, 0, 1, 0], [], []>} : vector<8x8xbf16>, vector<16x8xbf16>, vector<8x16xf32> -> vector<8x16xf32>
    %cst_46 = arith.constant 0.353553385 : f32
    %121 = vector.broadcast %cst_46 : f32 to vector<8x16xf32>
    %122 = arith.mulf %120, %121 : vector<8x16xf32>
    %cst_47 = arith.constant dense<0xFF800000> : vector<8xf32>
    %123 = vector.multi_reduction <maximumf>, %122, %cst_47 [1] : vector<8x16xf32> to vector<8xf32>
    %124 = vector.shape_cast %123 : vector<8xf32> to vector<8x1xf32>
    %125 = vector.broadcast %124 : vector<8x1xf32> to vector<8x16xf32>
    %126 = arith.subf %122, %125 : vector<8x16xf32>
    %127 = math.exp %126 : vector<8x16xf32>
    %cst_48 = arith.constant dense<0.000000e+00> : vector<8xf32>
    %128 = vector.multi_reduction <add>, %127, %cst_48 [1] : vector<8x16xf32> to vector<8xf32>
    %129 = vector.shape_cast %128 : vector<8xf32> to vector<8x1xf32>
    %130 = tpu.reciprocal %129 {approx = true} : vector<8x1xf32> -> vector<8x1xf32>
    %131 = vector.broadcast %130 : vector<8x1xf32> to vector<8x16xf32>
    %132 = arith.mulf %127, %131 : vector<8x16xf32>
    %133 = arith.truncf %132 : vector<8x16xf32> to vector<8x16xbf16>
    %cst_49 = arith.constant dense<0.000000e+00> : vector<8x8xf32>
    %134 = tpu.matmul %133, %119, %cst_49 {dimension_numbers = #tpu.dot_dimension_numbers<[1], [0], [0], [1], [0, 0, 1, 1], [], []>} : vector<8x16xbf16>, vector<16x8xbf16>, vector<8x8xf32> -> vector<8x8xf32>
    %c0_50 = arith.constant 0 : index
    %c16 = arith.constant 16 : index
    %135 = vector.load %arg20[%c0_50, %c16] : memref<8x32xf32, #tpu.memory_space<vmem>>, vector<8x8xf32>
    tpu.vector_store %arg20[%c0_50, %c16], %134 {strides = array<i32>} : memref<8x32xf32, #tpu.memory_space<vmem>>, vector<8x8xf32>,
    %136 = vector.extract_strided_slice %61 {offsets = [0, 24], sizes = [8, 8], strides = [1, 1]} : vector<8x32xf32> to vector<8x8xf32>
    %137 = arith.truncf %136 : vector<8x8xf32> to vector<8x8xbf16>
    %138 = vector.extract_strided_slice %68 {offsets = [0, 24], sizes = [16, 8], strides = [1, 1]} : vector<16x32xf32> to vector<16x8xf32>
    %139 = arith.truncf %138 : vector<16x8xf32> to vector<16x8xbf16>
    %140 = vector.extract_strided_slice %69 {offsets = [0, 24], sizes = [16, 8], strides = [1, 1]} : vector<16x32xf32> to vector<16x8xf32>
    %141 = arith.truncf %140 : vector<16x8xf32> to vector<16x8xbf16>
    %cst_51 = arith.constant dense<0.000000e+00> : vector<8x16xf32>
    %142 = tpu.matmul %137, %139, %cst_51 {dimension_numbers = #tpu.dot_dimension_numbers<[1], [1], [0], [0], [0, 0, 1, 0], [], []>} : vector<8x8xbf16>, vector<16x8xbf16>, vector<8x16xf32> -> vector<8x16xf32>
    %cst_52 = arith.constant 0.353553385 : f32
    %143 = vector.broadcast %cst_52 : f32 to vector<8x16xf32>
    %144 = arith.mulf %142, %143 : vector<8x16xf32>
    %cst_53 = arith.constant dense<0xFF800000> : vector<8xf32>
    %145 = vector.multi_reduction <maximumf>, %144, %cst_53 [1] : vector<8x16xf32> to vector<8xf32>
    %146 = vector.shape_cast %145 : vector<8xf32> to vector<8x1xf32>
    %147 = vector.broadcast %146 : vector<8x1xf32> to vector<8x16xf32>
    %148 = arith.subf %144, %147 : vector<8x16xf32>
    %149 = math.exp %148 : vector<8x16xf32>
    %cst_54 = arith.constant dense<0.000000e+00> : vector<8xf32>
    %150 = vector.multi_reduction <add>, %149, %cst_54 [1] : vector<8x16xf32> to vector<8xf32>
    %151 = vector.shape_cast %150 : vector<8xf32> to vector<8x1xf32>
    %152 = tpu.reciprocal %151 {approx = true} : vector<8x1xf32> -> vector<8x1xf32>
    %153 = vector.broadcast %152 : vector<8x1xf32> to vector<8x16xf32>
    %154 = arith.mulf %149, %153 : vector<8x16xf32>
    %155 = arith.truncf %154 : vector<8x16xf32> to vector<8x16xbf16>
    %cst_55 = arith.constant dense<0.000000e+00> : vector<8x8xf32>
    %156 = tpu.matmul %155, %141, %cst_55 {dimension_numbers = #tpu.dot_dimension_numbers<[1], [0], [0], [1], [0, 0, 1, 1], [], []>} : vector<8x16xbf16>, vector<16x8xbf16>, vector<8x8xf32> -> vector<8x8xf32>
    %c0_56 = arith.constant 0 : index
    %c24 = arith.constant 24 : index
    %157 = vector.load %arg20[%c0_56, %c24] : memref<8x32xf32, #tpu.memory_space<vmem>>, vector<8x8xf32>
    tpu.vector_store %arg20[%c0_56, %c24], %156 {strides = array<i32>} : memref<8x32xf32, #tpu.memory_space<vmem>>, vector<8x8xf32>,
    %c0_57 = arith.constant 0 : index
    %c0_58 = arith.constant 0 : index
    %158 = vector.load %arg20[%c0_57, %c0_58] : memref<8x32xf32, #tpu.memory_space<vmem>>, vector<8x32xf32>
    %159 = arith.truncf %158 : vector<8x32xf32> to vector<8x32xbf16>
    %c0_59 = arith.constant 0 : index
    %c0_60 = arith.constant 0 : index
    %160 = vector.load %arg11[%c0_59, %c0_60] : memref<32x32xbf16, #tpu.memory_space<vmem>>, vector<32x32xbf16>
    %cst_61 = arith.constant dense<0.000000e+00> : vector<8x32xf32>
    %161 = tpu.matmul %159, %160, %cst_61 {dimension_numbers = #tpu.dot_dimension_numbers<[1], [0], [0], [1], [0, 0, 1, 1], [], []>} : vector<8x32xbf16>, vector<32x32xbf16>, vector<8x32xf32> -> vector<8x32xf32>
    %c0_62 = arith.constant 0 : index
    %c0_63 = arith.constant 0 : index
    %162 = vector.load %arg12[%c0_62, %c0_63] : memref<1x32xf32, #tpu.memory_space<vmem>>, vector<1x32xf32>
    %163 = vector.broadcast %162 : vector<1x32xf32> to vector<8x32xf32>
    %164 = arith.addf %161, %163 : vector<8x32xf32>
    %c0_64 = arith.constant 0 : index
    %c0_65 = arith.constant 0 : index
    %165 = vector.load %arg13[%c0_64, %c0_65] : memref<1x32xf32, #tpu.memory_space<vmem>>, vector<1x32xf32>
    %c0_66 = arith.constant 0 : index
    %c0_67 = arith.constant 0 : index
    %166 = vector.load %arg14[%c0_66, %c0_67] : memref<1x32xf32, #tpu.memory_space<vmem>>, vector<1x32xf32>
    %c0_68 = arith.constant 0 : index
    %c0_69 = arith.constant 0 : index
    %167 = vector.load %arg15[%c0_68, %c0_69] : memref<32x32xbf16, #tpu.memory_space<vmem>>, vector<32x32xbf16>
    %c0_70 = arith.constant 0 : index
    %c0_71 = arith.constant 0 : index
    %168 = vector.load %arg16[%c0_70, %c0_71] : memref<1x32xf32, #tpu.memory_space<vmem>>, vector<1x32xf32>
    %c0_72 = arith.constant 0 : index
    %c0_73 = arith.constant 0 : index
    %169 = vector.load %arg17[%c0_72, %c0_73] : memref<32x32xbf16, #tpu.memory_space<vmem>>, vector<32x32xbf16>
    %c0_74 = arith.constant 0 : index
    %c0_75 = arith.constant 0 : index
    %170 = vector.load %arg18[%c0_74, %c0_75] : memref<1x32xf32, #tpu.memory_space<vmem>>, vector<1x32xf32>
    %cst_76 = arith.constant dense<0.000000e+00> : vector<8xf32>
    %171 = vector.multi_reduction <add>, %164, %cst_76 [1] : vector<8x32xf32> to vector<8xf32>
    %172 = vector.shape_cast %171 : vector<8xf32> to vector<8x1xf32>
    %cst_77 = arith.constant 3.200000e+01 : f32
    %173 = vector.broadcast %cst_77 : f32 to vector<8x1xf32>
    %174 = arith.divf %172, %173 : vector<8x1xf32>
    %175 = vector.broadcast %174 : vector<8x1xf32> to vector<8x32xf32>
    %176 = arith.subf %164, %175 : vector<8x32xf32>
    %177 = vector.broadcast %174 : vector<8x1xf32> to vector<8x32xf32>
    %178 = arith.subf %164, %177 : vector<8x32xf32>
    %179 = arith.mulf %176, %178 : vector<8x32xf32>
    %cst_78 = arith.constant dense<0.000000e+00> : vector<8xf32>
    %180 = vector.multi_reduction <add>, %179, %cst_78 [1] : vector<8x32xf32> to vector<8xf32>
    %181 = vector.shape_cast %180 : vector<8xf32> to vector<8x1xf32>
    %cst_79 = arith.constant 3.200000e+01 : f32
    %182 = vector.broadcast %cst_79 : f32 to vector<8x1xf32>
    %183 = arith.divf %181, %182 : vector<8x1xf32>
    %184 = vector.broadcast %174 : vector<8x1xf32> to vector<8x32xf32>
    %185 = arith.subf %164, %184 : vector<8x32xf32>
    %cst_80 = arith.constant 9.99999974E-6 : f32
    %186 = vector.broadcast %cst_80 : f32 to vector<8x1xf32>
    %187 = arith.addf %183, %186 : vector<8x1xf32>
    %188 = math.rsqrt %187 : vector<8x1xf32>
    %189 = vector.broadcast %188 : vector<8x1xf32> to vector<8x32xf32>
    %190 = arith.mulf %185, %189 : vector<8x32xf32>
    %191 = vector.broadcast %165 : vector<1x32xf32> to vector<8x32xf32>
    %192 = arith.mulf %190, %191 : vector<8x32xf32>
    %193 = vector.broadcast %166 : vector<1x32xf32> to vector<8x32xf32>
    %194 = arith.addf %192, %193 : vector<8x32xf32>
    %195 = arith.truncf %194 : vector<8x32xf32> to vector<8x32xbf16>
    %cst_81 = arith.constant dense<0.000000e+00> : vector<8x32xf32>
    %196 = tpu.matmul %195, %167, %cst_81 {dimension_numbers = #tpu.dot_dimension_numbers<[1], [0], [0], [1], [0, 0, 1, 1], [], []>} : vector<8x32xbf16>, vector<32x32xbf16>, vector<8x32xf32> -> vector<8x32xf32>
    %197 = vector.broadcast %168 : vector<1x32xf32> to vector<8x32xf32>
    %198 = arith.addf %196, %197 : vector<8x32xf32>
    %cst_82 = arith.constant 5.000000e-01 : f32
    %199 = vector.broadcast %cst_82 : f32 to vector<8x32xf32>
    %200 = arith.mulf %199, %198 : vector<8x32xf32>
    %cst_83 = arith.constant 4.471500e-02 : f32
    %201 = vector.broadcast %cst_83 : f32 to vector<8x32xf32>
    %202 = arith.mulf %201, %198 : vector<8x32xf32>
    %203 = arith.mulf %202, %198 : vector<8x32xf32>
    %204 = arith.mulf %203, %198 : vector<8x32xf32>
    %205 = arith.addf %198, %204 : vector<8x32xf32>
    %cst_84 = arith.constant 0.797884583 : f32
    %206 = vector.broadcast %cst_84 : f32 to vector<8x32xf32>
    %207 = arith.mulf %206, %205 : vector<8x32xf32>
    %208 = math.tanh %207 : vector<8x32xf32>
    %cst_85 = arith.constant 1.000000e+00 : f32
    %209 = vector.broadcast %cst_85 : f32 to vector<8x32xf32>
    %210 = arith.addf %209, %208 : vector<8x32xf32>
    %211 = arith.mulf %200, %210 : vector<8x32xf32>
    %212 = arith.truncf %211 : vector<8x32xf32> to vector<8x32xbf16>
    %cst_86 = arith.constant dense<0.000000e+00> : vector<8x32xf32>
    %213 = tpu.matmul %212, %169, %cst_86 {dimension_numbers = #tpu.dot_dimension_numbers<[1], [0], [0], [1], [0, 0, 1, 1], [], []>} : vector<8x32xbf16>, vector<32x32xbf16>, vector<8x32xf32> -> vector<8x32xf32>
    %214 = vector.broadcast %170 : vector<1x32xf32> to vector<8x32xf32>
    %215 = arith.addf %213, %214 : vector<8x32xf32>
    %216 = arith.addf %164, %215 : vector<8x32xf32>
    %c0_87 = arith.constant 0 : index
    %c0_88 = arith.constant 0 : index
    %c0_89 = arith.constant 0 : index
    %217 = vector.load %arg19[%c0_87, %c0_88, %c0_89] : memref<1x8x32xf32, #tpu.memory_space<vmem>>, vector<1x8x32xf32>
    %218 = vector.shape_cast %217 : vector<1x8x32xf32> to vector<8x32xf32>
    %219 = vector.shape_cast %216 : vector<8x32xf32> to vector<1x8x32xf32>
    tpu.vector_store %arg19[%c0_87, %c0_88, %c0_89], %219 {strides = array<i32>} : memref<1x8x32xf32, #tpu.memory_space<vmem>>, vector<1x8x32xf32>,
    return
  }
  func.func @transform_0(%arg0: i32) -> (i32, i32, i32) {
    %c0_i32 = arith.constant 0 : i32
    %c0_i32_0 = arith.constant 0 : i32
    %c0_i32_1 = arith.constant 0 : i32
    return %arg0, %c0_i32, %c0_i32_0 : i32, i32, i32
  }
  func.func @transform_1(%arg0: i32) -> (i32, i32, i32) {
    %c0_i32 = arith.constant 0 : i32
    %c0_i32_0 = arith.constant 0 : i32
    %c0_i32_1 = arith.constant 0 : i32
    return %arg0, %c0_i32, %c0_i32_0 : i32, i32, i32
  }
  func.func @transform_2(%arg0: i32) -> (i32, i32) {
    %c0_i32 = arith.constant 0 : i32
    %c0_i32_0 = arith.constant 0 : i32
    %c0_i32_1 = arith.constant 0 : i32
    return %c0_i32, %c0_i32_0 : i32, i32
  }
  func.func @transform_3(%arg0: i32) -> (i32, i32) {
    %c0_i32 = arith.constant 0 : i32
    %c0_i32_0 = arith.constant 0 : i32
    %c0_i32_1 = arith.constant 0 : i32
    return %c0_i32, %c0_i32_0 : i32, i32
  }
  func.func @transform_4(%arg0: i32) -> (i32, i32) {
    %c0_i32 = arith.constant 0 : i32
    %c0_i32_0 = arith.constant 0 : i32
    %c0_i32_1 = arith.constant 0 : i32
    return %c0_i32, %c0_i32_0 : i32, i32
  }
  func.func @transform_5(%arg0: i32) -> (i32, i32) {
    %c0_i32 = arith.constant 0 : i32
    %c0_i32_0 = arith.constant 0 : i32
    %c0_i32_1 = arith.constant 0 : i32
    return %c0_i32, %c0_i32_0 : i32, i32
  }
  func.func @transform_6(%arg0: i32) -> (i32, i32) {
    %c0_i32 = arith.constant 0 : i32
    %c0_i32_0 = arith.constant 0 : i32
    %c0_i32_1 = arith.constant 0 : i32
    return %c0_i32, %c0_i32_0 : i32, i32
  }
  func.func @transform_7(%arg0: i32) -> (i32, i32) {
    %c0_i32 = arith.constant 0 : i32
    %c0_i32_0 = arith.constant 0 : i32
    %c0_i32_1 = arith.constant 0 : i32
    return %c0_i32, %c0_i32_0 : i32, i32
  }
  func.func @transform_8(%arg0: i32) -> (i32, i32) {
    %c0_i32 = arith.constant 0 : i32
    %c0_i32_0 = arith.constant 0 : i32
    %c0_i32_1 = arith.constant 0 : i32
    return %c0_i32, %c0_i32_0 : i32, i32
  }
  func.func @transform_9(%arg0: i32) -> (i32, i32) {
    %c0_i32 = arith.constant 0 : i32
    %c0_i32_0 = arith.constant 0 : i32
    %c0_i32_1 = arith.constant 0 : i32
    return %c0_i32, %c0_i32_0 : i32, i32
  }
  func.func @transform_10(%arg0: i32) -> (i32, i32) {
    %c0_i32 = arith.constant 0 : i32
    %c0_i32_0 = arith.constant 0 : i32
    %c0_i32_1 = arith.constant 0 : i32
    return %c0_i32, %c0_i32_0 : i32, i32
  }
  func.func @transform_11(%arg0: i32) -> (i32, i32) {
    %c0_i32 = arith.constant 0 : i32
    %c0_i32_0 = arith.constant 0 : i32
    %c0_i32_1 = arith.constant 0 : i32
    return %c0_i32, %c0_i32_0 : i32, i32
  }
  func.func @transform_12(%arg0: i32) -> (i32, i32) {
    %c0_i32 = arith.constant 0 : i32
    %c0_i32_0 = arith.constant 0 : i32
    %c0_i32_1 = arith.constant 0 : i32
    return %c0_i32, %c0_i32_0 : i32, i32
  }
  func.func @transform_13(%arg0: i32) -> (i32, i32) {
    %c0_i32 = arith.constant 0 : i32
    %c0_i32_0 = arith.constant 0 : i32
    %c0_i32_1 = arith.constant 0 : i32
    return %c0_i32, %c0_i32_0 : i32, i32
  }
  func.func @transform_14(%arg0: i32) -> (i32, i32) {
    %c0_i32 = arith.constant 0 : i32
    %c0_i32_0 = arith.constant 0 : i32
    %c0_i32_1 = arith.constant 0 : i32
    return %c0_i32, %c0_i32_0 : i32, i32
  }
  func.func @transform_15(%arg0: i32) -> (i32, i32) {
    %c0_i32 = arith.constant 0 : i32
    %c0_i32_0 = arith.constant 0 : i32
    %c0_i32_1 = arith.constant 0 : i32
    return %c0_i32, %c0_i32_0 : i32, i32
  }
  func.func @transform_16(%arg0: i32) -> (i32, i32) {
    %c0_i32 = arith.constant 0 : i32
    %c0_i32_0 = arith.constant 0 : i32
    %c0_i32_1 = arith.constant 0 : i32
    return %c0_i32, %c0_i32_0 : i32, i32
  }
  func.func @transform_17(%arg0: i32) -> (i32, i32) {
    %c0_i32 = arith.constant 0 : i32
    %c0_i32_0 = arith.constant 0 : i32
    %c0_i32_1 = arith.constant 0 : i32
    return %c0_i32, %c0_i32_0 : i32, i32
  }
  func.func @transform_18(%arg0: i32) -> (i32, i32, i32) {
    %c0_i32 = arith.constant 0 : i32
    %c0_i32_0 = arith.constant 0 : i32
    %c0_i32_1 = arith.constant 0 : i32
    return %arg0, %c0_i32, %c0_i32_0 : i32, i32, i32
  }
}

module attributes {stable_mosaic.version = 11 : i64} {
  func.func @_self_stack_kernel(%arg0: i32, %arg1: memref<1x16x64xf32, #tpu.memory_space<vmem>>, %arg2: memref<2x1x64xf32, #tpu.memory_space<vmem>>, %arg3: memref<2x1x64xf32, #tpu.memory_space<vmem>>, %arg4: memref<2x64x128xbf16, #tpu.memory_space<vmem>>, %arg5: memref<2x1x128xf32, #tpu.memory_space<vmem>>, %arg6: memref<2x64x64xbf16, #tpu.memory_space<vmem>>, %arg7: memref<2x1x64xf32, #tpu.memory_space<vmem>>, %arg8: memref<2x1x64xf32, #tpu.memory_space<vmem>>, %arg9: memref<2x1x64xf32, #tpu.memory_space<vmem>>, %arg10: memref<2x64x64xbf16, #tpu.memory_space<vmem>>, %arg11: memref<2x1x64xf32, #tpu.memory_space<vmem>>, %arg12: memref<2x64x64xbf16, #tpu.memory_space<vmem>>, %arg13: memref<2x1x64xf32, #tpu.memory_space<vmem>>, %arg14: memref<1x16x64xf32, #tpu.memory_space<vmem>>, %arg15: memref<16x64xf32, #tpu.memory_space<vmem>>) attributes {dimension_semantics = [#tpu.dimension_semantics<parallel>], iteration_bounds = array<i64: 2>, scalar_prefetch = 0 : i64, scratch_operands = 1 : i64, tpu.core_type = #tpu.core_type<tc>, window_params = [{transform_indices = @transform_0, window_bounds = array<i64: 1, 16, 64>}, {pipeline_mode = #tpu.pipeline_mode<synchronous>, transform_indices = @transform_1, window_bounds = array<i64: 2, 1, 64>}, {pipeline_mode = #tpu.pipeline_mode<synchronous>, transform_indices = @transform_2, window_bounds = array<i64: 2, 1, 64>}, {pipeline_mode = #tpu.pipeline_mode<synchronous>, transform_indices = @transform_3, window_bounds = array<i64: 2, 64, 128>}, {pipeline_mode = #tpu.pipeline_mode<synchronous>, transform_indices = @transform_4, window_bounds = array<i64: 2, 1, 128>}, {pipeline_mode = #tpu.pipeline_mode<synchronous>, transform_indices = @transform_5, window_bounds = array<i64: 2, 64, 64>}, {pipeline_mode = #tpu.pipeline_mode<synchronous>, transform_indices = @transform_6, window_bounds = array<i64: 2, 1, 64>}, {pipeline_mode = #tpu.pipeline_mode<synchronous>, transform_indices = @transform_7, window_bounds = array<i64: 2, 1, 64>}, {pipeline_mode = #tpu.pipeline_mode<synchronous>, transform_indices = @transform_8, window_bounds = array<i64: 2, 1, 64>}, {pipeline_mode = #tpu.pipeline_mode<synchronous>, transform_indices = @transform_9, window_bounds = array<i64: 2, 64, 64>}, {pipeline_mode = #tpu.pipeline_mode<synchronous>, transform_indices = @transform_10, window_bounds = array<i64: 2, 1, 64>}, {pipeline_mode = #tpu.pipeline_mode<synchronous>, transform_indices = @transform_11, window_bounds = array<i64: 2, 64, 64>}, {pipeline_mode = #tpu.pipeline_mode<synchronous>, transform_indices = @transform_12, window_bounds = array<i64: 2, 1, 64>}, {transform_indices = @transform_13, window_bounds = array<i64: 1, 16, 64>}]} {
    %c0 = arith.constant 0 : index
    %c0_0 = arith.constant 0 : index
    %c0_1 = arith.constant 0 : index
    %0 = vector.load %arg1[%c0, %c0_0, %c0_1] : memref<1x16x64xf32, #tpu.memory_space<vmem>>, vector<1x16x64xf32>
    %1 = vector.shape_cast %0 : vector<1x16x64xf32> to vector<16x64xf32>
    %c0_2 = arith.constant 0 : index
    %c0_3 = arith.constant 0 : index
    %c0_4 = arith.constant 0 : index
    %2 = vector.load %arg2[%c0_2, %c0_3, %c0_4] : memref<2x1x64xf32, #tpu.memory_space<vmem>>, vector<1x1x64xf32>
    %3 = vector.shape_cast %2 : vector<1x1x64xf32> to vector<1x64xf32>
    %c0_5 = arith.constant 0 : index
    %c0_6 = arith.constant 0 : index
    %c0_7 = arith.constant 0 : index
    %4 = vector.load %arg3[%c0_5, %c0_6, %c0_7] : memref<2x1x64xf32, #tpu.memory_space<vmem>>, vector<1x1x64xf32>
    %5 = vector.shape_cast %4 : vector<1x1x64xf32> to vector<1x64xf32>
    %cst = arith.constant dense<0.000000e+00> : vector<16xf32>
    %6 = vector.multi_reduction <add>, %1, %cst [1] : vector<16x64xf32> to vector<16xf32>
    %7 = vector.shape_cast %6 : vector<16xf32> to vector<16x1xf32>
    %cst_8 = arith.constant 6.400000e+01 : f32
    %8 = vector.broadcast %cst_8 : f32 to vector<16x1xf32>
    %9 = arith.divf %7, %8 : vector<16x1xf32>
    %10 = vector.broadcast %9 : vector<16x1xf32> to vector<16x64xf32>
    %11 = arith.subf %1, %10 : vector<16x64xf32>
    %12 = vector.broadcast %9 : vector<16x1xf32> to vector<16x64xf32>
    %13 = arith.subf %1, %12 : vector<16x64xf32>
    %14 = arith.mulf %11, %13 : vector<16x64xf32>
    %cst_9 = arith.constant dense<0.000000e+00> : vector<16xf32>
    %15 = vector.multi_reduction <add>, %14, %cst_9 [1] : vector<16x64xf32> to vector<16xf32>
    %16 = vector.shape_cast %15 : vector<16xf32> to vector<16x1xf32>
    %cst_10 = arith.constant 6.400000e+01 : f32
    %17 = vector.broadcast %cst_10 : f32 to vector<16x1xf32>
    %18 = arith.divf %16, %17 : vector<16x1xf32>
    %19 = vector.broadcast %9 : vector<16x1xf32> to vector<16x64xf32>
    %20 = arith.subf %1, %19 : vector<16x64xf32>
    %cst_11 = arith.constant 9.99999974E-6 : f32
    %21 = vector.broadcast %cst_11 : f32 to vector<16x1xf32>
    %22 = arith.addf %18, %21 : vector<16x1xf32>
    %23 = math.rsqrt %22 : vector<16x1xf32>
    %24 = vector.broadcast %23 : vector<16x1xf32> to vector<16x64xf32>
    %25 = arith.mulf %20, %24 : vector<16x64xf32>
    %26 = vector.broadcast %3 : vector<1x64xf32> to vector<16x64xf32>
    %27 = arith.mulf %25, %26 : vector<16x64xf32>
    %28 = vector.broadcast %5 : vector<1x64xf32> to vector<16x64xf32>
    %29 = arith.addf %27, %28 : vector<16x64xf32>
    %30 = arith.truncf %29 : vector<16x64xf32> to vector<16x64xbf16>
    %c0_12 = arith.constant 0 : index
    %c0_13 = arith.constant 0 : index
    %c0_14 = arith.constant 0 : index
    %31 = vector.load %arg4[%c0_12, %c0_13, %c0_14] : memref<2x64x128xbf16, #tpu.memory_space<vmem>>, vector<1x64x128xbf16>
    %32 = vector.shape_cast %31 : vector<1x64x128xbf16> to vector<64x128xbf16>
    %cst_15 = arith.constant dense<0.000000e+00> : vector<16x128xf32>
    %33 = tpu.matmul %30, %32, %cst_15 {dimension_numbers = #tpu.dot_dimension_numbers<[1], [0], [0], [1], [0, 0, 1, 1], [], []>} : vector<16x64xbf16>, vector<64x128xbf16>, vector<16x128xf32> -> vector<16x128xf32>
    %c0_16 = arith.constant 0 : index
    %c0_17 = arith.constant 0 : index
    %c0_18 = arith.constant 0 : index
    %34 = vector.load %arg5[%c0_16, %c0_17, %c0_18] : memref<2x1x128xf32, #tpu.memory_space<vmem>>, vector<1x1x128xf32>
    %35 = vector.shape_cast %34 : vector<1x1x128xf32> to vector<1x128xf32>
    %36 = vector.broadcast %35 : vector<1x128xf32> to vector<16x128xf32>
    %37 = arith.addf %33, %36 : vector<16x128xf32>
    %38 = vector.extract_strided_slice %37 {offsets = [0, 0], sizes = [16, 32], strides = [1, 1]} : vector<16x128xf32> to vector<16x32xf32>
    %39 = vector.extract_strided_slice %37 {offsets = [0, 32], sizes = [16, 32], strides = [1, 1]} : vector<16x128xf32> to vector<16x32xf32>
    %40 = vector.extract_strided_slice %37 {offsets = [0, 64], sizes = [16, 64], strides = [1, 1]} : vector<16x128xf32> to vector<16x64xf32>
    %41 = vector.extract_strided_slice %38 {offsets = [0, 0], sizes = [16, 8], strides = [1, 1]} : vector<16x32xf32> to vector<16x8xf32>
    %42 = arith.truncf %41 : vector<16x8xf32> to vector<16x8xbf16>
    %43 = vector.extract_strided_slice %39 {offsets = [0, 0], sizes = [16, 8], strides = [1, 1]} : vector<16x32xf32> to vector<16x8xf32>
    %44 = arith.truncf %43 : vector<16x8xf32> to vector<16x8xbf16>
    %45 = vector.extract_strided_slice %40 {offsets = [0, 0], sizes = [16, 16], strides = [1, 1]} : vector<16x64xf32> to vector<16x16xf32>
    %46 = arith.truncf %45 : vector<16x16xf32> to vector<16x16xbf16>
    %cst_19 = arith.constant dense<0.000000e+00> : vector<16x16xf32>
    %47 = tpu.matmul %42, %44, %cst_19 {dimension_numbers = #tpu.dot_dimension_numbers<[1], [1], [0], [0], [0, 0, 1, 0], [], []>} : vector<16x8xbf16>, vector<16x8xbf16>, vector<16x16xf32> -> vector<16x16xf32>
    %cst_20 = arith.constant 0.353553385 : f32
    %48 = vector.broadcast %cst_20 : f32 to vector<16x16xf32>
    %49 = arith.mulf %47, %48 : vector<16x16xf32>
    %cst_21 = arith.constant dense<0xFF800000> : vector<16xf32>
    %50 = vector.multi_reduction <maximumf>, %49, %cst_21 [1] : vector<16x16xf32> to vector<16xf32>
    %51 = vector.shape_cast %50 : vector<16xf32> to vector<16x1xf32>
    %52 = vector.broadcast %51 : vector<16x1xf32> to vector<16x16xf32>
    %53 = arith.subf %49, %52 : vector<16x16xf32>
    %54 = math.exp %53 : vector<16x16xf32>
    %cst_22 = arith.constant dense<0.000000e+00> : vector<16xf32>
    %55 = vector.multi_reduction <add>, %54, %cst_22 [1] : vector<16x16xf32> to vector<16xf32>
    %56 = vector.shape_cast %55 : vector<16xf32> to vector<16x1xf32>
    %57 = tpu.reciprocal %56 {approx = true} : vector<16x1xf32> -> vector<16x1xf32>
    %58 = vector.broadcast %57 : vector<16x1xf32> to vector<16x16xf32>
    %59 = arith.mulf %54, %58 : vector<16x16xf32>
    %60 = arith.truncf %59 : vector<16x16xf32> to vector<16x16xbf16>
    %cst_23 = arith.constant dense<0.000000e+00> : vector<16x16xf32>
    %61 = tpu.matmul %60, %46, %cst_23 {dimension_numbers = #tpu.dot_dimension_numbers<[1], [0], [0], [1], [0, 0, 1, 1], [], []>} : vector<16x16xbf16>, vector<16x16xbf16>, vector<16x16xf32> -> vector<16x16xf32>
    %c0_24 = arith.constant 0 : index
    %c0_25 = arith.constant 0 : index
    %62 = vector.load %arg15[%c0_24, %c0_25] : memref<16x64xf32, #tpu.memory_space<vmem>>, vector<16x16xf32>
    tpu.vector_store %arg15[%c0_24, %c0_25], %61 {strides = array<i32>} : memref<16x64xf32, #tpu.memory_space<vmem>>, vector<16x16xf32>,
    %63 = vector.extract_strided_slice %38 {offsets = [0, 8], sizes = [16, 8], strides = [1, 1]} : vector<16x32xf32> to vector<16x8xf32>
    %64 = arith.truncf %63 : vector<16x8xf32> to vector<16x8xbf16>
    %65 = vector.extract_strided_slice %39 {offsets = [0, 8], sizes = [16, 8], strides = [1, 1]} : vector<16x32xf32> to vector<16x8xf32>
    %66 = arith.truncf %65 : vector<16x8xf32> to vector<16x8xbf16>
    %67 = vector.extract_strided_slice %40 {offsets = [0, 16], sizes = [16, 16], strides = [1, 1]} : vector<16x64xf32> to vector<16x16xf32>
    %68 = arith.truncf %67 : vector<16x16xf32> to vector<16x16xbf16>
    %cst_26 = arith.constant dense<0.000000e+00> : vector<16x16xf32>
    %69 = tpu.matmul %64, %66, %cst_26 {dimension_numbers = #tpu.dot_dimension_numbers<[1], [1], [0], [0], [0, 0, 1, 0], [], []>} : vector<16x8xbf16>, vector<16x8xbf16>, vector<16x16xf32> -> vector<16x16xf32>
    %cst_27 = arith.constant 0.353553385 : f32
    %70 = vector.broadcast %cst_27 : f32 to vector<16x16xf32>
    %71 = arith.mulf %69, %70 : vector<16x16xf32>
    %cst_28 = arith.constant dense<0xFF800000> : vector<16xf32>
    %72 = vector.multi_reduction <maximumf>, %71, %cst_28 [1] : vector<16x16xf32> to vector<16xf32>
    %73 = vector.shape_cast %72 : vector<16xf32> to vector<16x1xf32>
    %74 = vector.broadcast %73 : vector<16x1xf32> to vector<16x16xf32>
    %75 = arith.subf %71, %74 : vector<16x16xf32>
    %76 = math.exp %75 : vector<16x16xf32>
    %cst_29 = arith.constant dense<0.000000e+00> : vector<16xf32>
    %77 = vector.multi_reduction <add>, %76, %cst_29 [1] : vector<16x16xf32> to vector<16xf32>
    %78 = vector.shape_cast %77 : vector<16xf32> to vector<16x1xf32>
    %79 = tpu.reciprocal %78 {approx = true} : vector<16x1xf32> -> vector<16x1xf32>
    %80 = vector.broadcast %79 : vector<16x1xf32> to vector<16x16xf32>
    %81 = arith.mulf %76, %80 : vector<16x16xf32>
    %82 = arith.truncf %81 : vector<16x16xf32> to vector<16x16xbf16>
    %cst_30 = arith.constant dense<0.000000e+00> : vector<16x16xf32>
    %83 = tpu.matmul %82, %68, %cst_30 {dimension_numbers = #tpu.dot_dimension_numbers<[1], [0], [0], [1], [0, 0, 1, 1], [], []>} : vector<16x16xbf16>, vector<16x16xbf16>, vector<16x16xf32> -> vector<16x16xf32>
    %c0_31 = arith.constant 0 : index
    %c16 = arith.constant 16 : index
    %84 = vector.load %arg15[%c0_31, %c16] : memref<16x64xf32, #tpu.memory_space<vmem>>, vector<16x16xf32>
    tpu.vector_store %arg15[%c0_31, %c16], %83 {strides = array<i32>} : memref<16x64xf32, #tpu.memory_space<vmem>>, vector<16x16xf32>,
    %85 = vector.extract_strided_slice %38 {offsets = [0, 16], sizes = [16, 8], strides = [1, 1]} : vector<16x32xf32> to vector<16x8xf32>
    %86 = arith.truncf %85 : vector<16x8xf32> to vector<16x8xbf16>
    %87 = vector.extract_strided_slice %39 {offsets = [0, 16], sizes = [16, 8], strides = [1, 1]} : vector<16x32xf32> to vector<16x8xf32>
    %88 = arith.truncf %87 : vector<16x8xf32> to vector<16x8xbf16>
    %89 = vector.extract_strided_slice %40 {offsets = [0, 32], sizes = [16, 16], strides = [1, 1]} : vector<16x64xf32> to vector<16x16xf32>
    %90 = arith.truncf %89 : vector<16x16xf32> to vector<16x16xbf16>
    %cst_32 = arith.constant dense<0.000000e+00> : vector<16x16xf32>
    %91 = tpu.matmul %86, %88, %cst_32 {dimension_numbers = #tpu.dot_dimension_numbers<[1], [1], [0], [0], [0, 0, 1, 0], [], []>} : vector<16x8xbf16>, vector<16x8xbf16>, vector<16x16xf32> -> vector<16x16xf32>
    %cst_33 = arith.constant 0.353553385 : f32
    %92 = vector.broadcast %cst_33 : f32 to vector<16x16xf32>
    %93 = arith.mulf %91, %92 : vector<16x16xf32>
    %cst_34 = arith.constant dense<0xFF800000> : vector<16xf32>
    %94 = vector.multi_reduction <maximumf>, %93, %cst_34 [1] : vector<16x16xf32> to vector<16xf32>
    %95 = vector.shape_cast %94 : vector<16xf32> to vector<16x1xf32>
    %96 = vector.broadcast %95 : vector<16x1xf32> to vector<16x16xf32>
    %97 = arith.subf %93, %96 : vector<16x16xf32>
    %98 = math.exp %97 : vector<16x16xf32>
    %cst_35 = arith.constant dense<0.000000e+00> : vector<16xf32>
    %99 = vector.multi_reduction <add>, %98, %cst_35 [1] : vector<16x16xf32> to vector<16xf32>
    %100 = vector.shape_cast %99 : vector<16xf32> to vector<16x1xf32>
    %101 = tpu.reciprocal %100 {approx = true} : vector<16x1xf32> -> vector<16x1xf32>
    %102 = vector.broadcast %101 : vector<16x1xf32> to vector<16x16xf32>
    %103 = arith.mulf %98, %102 : vector<16x16xf32>
    %104 = arith.truncf %103 : vector<16x16xf32> to vector<16x16xbf16>
    %cst_36 = arith.constant dense<0.000000e+00> : vector<16x16xf32>
    %105 = tpu.matmul %104, %90, %cst_36 {dimension_numbers = #tpu.dot_dimension_numbers<[1], [0], [0], [1], [0, 0, 1, 1], [], []>} : vector<16x16xbf16>, vector<16x16xbf16>, vector<16x16xf32> -> vector<16x16xf32>
    %c0_37 = arith.constant 0 : index
    %c32 = arith.constant 32 : index
    %106 = vector.load %arg15[%c0_37, %c32] : memref<16x64xf32, #tpu.memory_space<vmem>>, vector<16x16xf32>
    tpu.vector_store %arg15[%c0_37, %c32], %105 {strides = array<i32>} : memref<16x64xf32, #tpu.memory_space<vmem>>, vector<16x16xf32>,
    %107 = vector.extract_strided_slice %38 {offsets = [0, 24], sizes = [16, 8], strides = [1, 1]} : vector<16x32xf32> to vector<16x8xf32>
    %108 = arith.truncf %107 : vector<16x8xf32> to vector<16x8xbf16>
    %109 = vector.extract_strided_slice %39 {offsets = [0, 24], sizes = [16, 8], strides = [1, 1]} : vector<16x32xf32> to vector<16x8xf32>
    %110 = arith.truncf %109 : vector<16x8xf32> to vector<16x8xbf16>
    %111 = vector.extract_strided_slice %40 {offsets = [0, 48], sizes = [16, 16], strides = [1, 1]} : vector<16x64xf32> to vector<16x16xf32>
    %112 = arith.truncf %111 : vector<16x16xf32> to vector<16x16xbf16>
    %cst_38 = arith.constant dense<0.000000e+00> : vector<16x16xf32>
    %113 = tpu.matmul %108, %110, %cst_38 {dimension_numbers = #tpu.dot_dimension_numbers<[1], [1], [0], [0], [0, 0, 1, 0], [], []>} : vector<16x8xbf16>, vector<16x8xbf16>, vector<16x16xf32> -> vector<16x16xf32>
    %cst_39 = arith.constant 0.353553385 : f32
    %114 = vector.broadcast %cst_39 : f32 to vector<16x16xf32>
    %115 = arith.mulf %113, %114 : vector<16x16xf32>
    %cst_40 = arith.constant dense<0xFF800000> : vector<16xf32>
    %116 = vector.multi_reduction <maximumf>, %115, %cst_40 [1] : vector<16x16xf32> to vector<16xf32>
    %117 = vector.shape_cast %116 : vector<16xf32> to vector<16x1xf32>
    %118 = vector.broadcast %117 : vector<16x1xf32> to vector<16x16xf32>
    %119 = arith.subf %115, %118 : vector<16x16xf32>
    %120 = math.exp %119 : vector<16x16xf32>
    %cst_41 = arith.constant dense<0.000000e+00> : vector<16xf32>
    %121 = vector.multi_reduction <add>, %120, %cst_41 [1] : vector<16x16xf32> to vector<16xf32>
    %122 = vector.shape_cast %121 : vector<16xf32> to vector<16x1xf32>
    %123 = tpu.reciprocal %122 {approx = true} : vector<16x1xf32> -> vector<16x1xf32>
    %124 = vector.broadcast %123 : vector<16x1xf32> to vector<16x16xf32>
    %125 = arith.mulf %120, %124 : vector<16x16xf32>
    %126 = arith.truncf %125 : vector<16x16xf32> to vector<16x16xbf16>
    %cst_42 = arith.constant dense<0.000000e+00> : vector<16x16xf32>
    %127 = tpu.matmul %126, %112, %cst_42 {dimension_numbers = #tpu.dot_dimension_numbers<[1], [0], [0], [1], [0, 0, 1, 1], [], []>} : vector<16x16xbf16>, vector<16x16xbf16>, vector<16x16xf32> -> vector<16x16xf32>
    %c0_43 = arith.constant 0 : index
    %c48 = arith.constant 48 : index
    %128 = vector.load %arg15[%c0_43, %c48] : memref<16x64xf32, #tpu.memory_space<vmem>>, vector<16x16xf32>
    tpu.vector_store %arg15[%c0_43, %c48], %127 {strides = array<i32>} : memref<16x64xf32, #tpu.memory_space<vmem>>, vector<16x16xf32>,
    %c0_44 = arith.constant 0 : index
    %c0_45 = arith.constant 0 : index
    %129 = vector.load %arg15[%c0_44, %c0_45] : memref<16x64xf32, #tpu.memory_space<vmem>>, vector<16x64xf32>
    %130 = arith.truncf %129 : vector<16x64xf32> to vector<16x64xbf16>
    %c0_46 = arith.constant 0 : index
    %c0_47 = arith.constant 0 : index
    %c0_48 = arith.constant 0 : index
    %131 = vector.load %arg6[%c0_46, %c0_47, %c0_48] : memref<2x64x64xbf16, #tpu.memory_space<vmem>>, vector<1x64x64xbf16>
    %132 = vector.shape_cast %131 : vector<1x64x64xbf16> to vector<64x64xbf16>
    %cst_49 = arith.constant dense<0.000000e+00> : vector<16x64xf32>
    %133 = tpu.matmul %130, %132, %cst_49 {dimension_numbers = #tpu.dot_dimension_numbers<[1], [0], [0], [1], [0, 0, 1, 1], [], []>} : vector<16x64xbf16>, vector<64x64xbf16>, vector<16x64xf32> -> vector<16x64xf32>
    %134 = arith.addf %1, %133 : vector<16x64xf32>
    %c0_50 = arith.constant 0 : index
    %c0_51 = arith.constant 0 : index
    %c0_52 = arith.constant 0 : index
    %135 = vector.load %arg7[%c0_50, %c0_51, %c0_52] : memref<2x1x64xf32, #tpu.memory_space<vmem>>, vector<1x1x64xf32>
    %136 = vector.shape_cast %135 : vector<1x1x64xf32> to vector<1x64xf32>
    %137 = vector.broadcast %136 : vector<1x64xf32> to vector<16x64xf32>
    %138 = arith.addf %134, %137 : vector<16x64xf32>
    %c0_53 = arith.constant 0 : index
    %c0_54 = arith.constant 0 : index
    %c0_55 = arith.constant 0 : index
    %139 = vector.load %arg8[%c0_53, %c0_54, %c0_55] : memref<2x1x64xf32, #tpu.memory_space<vmem>>, vector<1x1x64xf32>
    %140 = vector.shape_cast %139 : vector<1x1x64xf32> to vector<1x64xf32>
    %c0_56 = arith.constant 0 : index
    %c0_57 = arith.constant 0 : index
    %c0_58 = arith.constant 0 : index
    %141 = vector.load %arg9[%c0_56, %c0_57, %c0_58] : memref<2x1x64xf32, #tpu.memory_space<vmem>>, vector<1x1x64xf32>
    %142 = vector.shape_cast %141 : vector<1x1x64xf32> to vector<1x64xf32>
    %c0_59 = arith.constant 0 : index
    %c0_60 = arith.constant 0 : index
    %c0_61 = arith.constant 0 : index
    %143 = vector.load %arg10[%c0_59, %c0_60, %c0_61] : memref<2x64x64xbf16, #tpu.memory_space<vmem>>, vector<1x64x64xbf16>
    %144 = vector.shape_cast %143 : vector<1x64x64xbf16> to vector<64x64xbf16>
    %c0_62 = arith.constant 0 : index
    %c0_63 = arith.constant 0 : index
    %c0_64 = arith.constant 0 : index
    %145 = vector.load %arg11[%c0_62, %c0_63, %c0_64] : memref<2x1x64xf32, #tpu.memory_space<vmem>>, vector<1x1x64xf32>
    %146 = vector.shape_cast %145 : vector<1x1x64xf32> to vector<1x64xf32>
    %c0_65 = arith.constant 0 : index
    %c0_66 = arith.constant 0 : index
    %c0_67 = arith.constant 0 : index
    %147 = vector.load %arg12[%c0_65, %c0_66, %c0_67] : memref<2x64x64xbf16, #tpu.memory_space<vmem>>, vector<1x64x64xbf16>
    %148 = vector.shape_cast %147 : vector<1x64x64xbf16> to vector<64x64xbf16>
    %c0_68 = arith.constant 0 : index
    %c0_69 = arith.constant 0 : index
    %c0_70 = arith.constant 0 : index
    %149 = vector.load %arg13[%c0_68, %c0_69, %c0_70] : memref<2x1x64xf32, #tpu.memory_space<vmem>>, vector<1x1x64xf32>
    %150 = vector.shape_cast %149 : vector<1x1x64xf32> to vector<1x64xf32>
    %cst_71 = arith.constant dense<0.000000e+00> : vector<16xf32>
    %151 = vector.multi_reduction <add>, %138, %cst_71 [1] : vector<16x64xf32> to vector<16xf32>
    %152 = vector.shape_cast %151 : vector<16xf32> to vector<16x1xf32>
    %cst_72 = arith.constant 6.400000e+01 : f32
    %153 = vector.broadcast %cst_72 : f32 to vector<16x1xf32>
    %154 = arith.divf %152, %153 : vector<16x1xf32>
    %155 = vector.broadcast %154 : vector<16x1xf32> to vector<16x64xf32>
    %156 = arith.subf %138, %155 : vector<16x64xf32>
    %157 = vector.broadcast %154 : vector<16x1xf32> to vector<16x64xf32>
    %158 = arith.subf %138, %157 : vector<16x64xf32>
    %159 = arith.mulf %156, %158 : vector<16x64xf32>
    %cst_73 = arith.constant dense<0.000000e+00> : vector<16xf32>
    %160 = vector.multi_reduction <add>, %159, %cst_73 [1] : vector<16x64xf32> to vector<16xf32>
    %161 = vector.shape_cast %160 : vector<16xf32> to vector<16x1xf32>
    %cst_74 = arith.constant 6.400000e+01 : f32
    %162 = vector.broadcast %cst_74 : f32 to vector<16x1xf32>
    %163 = arith.divf %161, %162 : vector<16x1xf32>
    %164 = vector.broadcast %154 : vector<16x1xf32> to vector<16x64xf32>
    %165 = arith.subf %138, %164 : vector<16x64xf32>
    %cst_75 = arith.constant 9.99999974E-6 : f32
    %166 = vector.broadcast %cst_75 : f32 to vector<16x1xf32>
    %167 = arith.addf %163, %166 : vector<16x1xf32>
    %168 = math.rsqrt %167 : vector<16x1xf32>
    %169 = vector.broadcast %168 : vector<16x1xf32> to vector<16x64xf32>
    %170 = arith.mulf %165, %169 : vector<16x64xf32>
    %171 = vector.broadcast %140 : vector<1x64xf32> to vector<16x64xf32>
    %172 = arith.mulf %170, %171 : vector<16x64xf32>
    %173 = vector.broadcast %142 : vector<1x64xf32> to vector<16x64xf32>
    %174 = arith.addf %172, %173 : vector<16x64xf32>
    %175 = arith.truncf %174 : vector<16x64xf32> to vector<16x64xbf16>
    %cst_76 = arith.constant dense<0.000000e+00> : vector<16x64xf32>
    %176 = tpu.matmul %175, %144, %cst_76 {dimension_numbers = #tpu.dot_dimension_numbers<[1], [0], [0], [1], [0, 0, 1, 1], [], []>} : vector<16x64xbf16>, vector<64x64xbf16>, vector<16x64xf32> -> vector<16x64xf32>
    %177 = vector.broadcast %146 : vector<1x64xf32> to vector<16x64xf32>
    %178 = arith.addf %176, %177 : vector<16x64xf32>
    %cst_77 = arith.constant 5.000000e-01 : f32
    %179 = vector.broadcast %cst_77 : f32 to vector<16x64xf32>
    %180 = arith.mulf %179, %178 : vector<16x64xf32>
    %cst_78 = arith.constant 4.471500e-02 : f32
    %181 = vector.broadcast %cst_78 : f32 to vector<16x64xf32>
    %182 = arith.mulf %181, %178 : vector<16x64xf32>
    %183 = arith.mulf %182, %178 : vector<16x64xf32>
    %184 = arith.mulf %183, %178 : vector<16x64xf32>
    %185 = arith.addf %178, %184 : vector<16x64xf32>
    %cst_79 = arith.constant 0.797884583 : f32
    %186 = vector.broadcast %cst_79 : f32 to vector<16x64xf32>
    %187 = arith.mulf %186, %185 : vector<16x64xf32>
    %188 = math.tanh %187 : vector<16x64xf32>
    %cst_80 = arith.constant 1.000000e+00 : f32
    %189 = vector.broadcast %cst_80 : f32 to vector<16x64xf32>
    %190 = arith.addf %189, %188 : vector<16x64xf32>
    %191 = arith.mulf %180, %190 : vector<16x64xf32>
    %192 = arith.truncf %191 : vector<16x64xf32> to vector<16x64xbf16>
    %cst_81 = arith.constant dense<0.000000e+00> : vector<16x64xf32>
    %193 = tpu.matmul %192, %148, %cst_81 {dimension_numbers = #tpu.dot_dimension_numbers<[1], [0], [0], [1], [0, 0, 1, 1], [], []>} : vector<16x64xbf16>, vector<64x64xbf16>, vector<16x64xf32> -> vector<16x64xf32>
    %194 = vector.broadcast %150 : vector<1x64xf32> to vector<16x64xf32>
    %195 = arith.addf %193, %194 : vector<16x64xf32>
    %196 = arith.addf %138, %195 : vector<16x64xf32>
    %c1 = arith.constant 1 : index
    %c0_82 = arith.constant 0 : index
    %c0_83 = arith.constant 0 : index
    %197 = vector.load %arg2[%c1, %c0_82, %c0_83] : memref<2x1x64xf32, #tpu.memory_space<vmem>>, vector<1x1x64xf32>
    %198 = vector.shape_cast %197 : vector<1x1x64xf32> to vector<1x64xf32>
    %c1_84 = arith.constant 1 : index
    %c0_85 = arith.constant 0 : index
    %c0_86 = arith.constant 0 : index
    %199 = vector.load %arg3[%c1_84, %c0_85, %c0_86] : memref<2x1x64xf32, #tpu.memory_space<vmem>>, vector<1x1x64xf32>
    %200 = vector.shape_cast %199 : vector<1x1x64xf32> to vector<1x64xf32>
    %cst_87 = arith.constant dense<0.000000e+00> : vector<16xf32>
    %201 = vector.multi_reduction <add>, %196, %cst_87 [1] : vector<16x64xf32> to vector<16xf32>
    %202 = vector.shape_cast %201 : vector<16xf32> to vector<16x1xf32>
    %cst_88 = arith.constant 6.400000e+01 : f32
    %203 = vector.broadcast %cst_88 : f32 to vector<16x1xf32>
    %204 = arith.divf %202, %203 : vector<16x1xf32>
    %205 = vector.broadcast %204 : vector<16x1xf32> to vector<16x64xf32>
    %206 = arith.subf %196, %205 : vector<16x64xf32>
    %207 = vector.broadcast %204 : vector<16x1xf32> to vector<16x64xf32>
    %208 = arith.subf %196, %207 : vector<16x64xf32>
    %209 = arith.mulf %206, %208 : vector<16x64xf32>
    %cst_89 = arith.constant dense<0.000000e+00> : vector<16xf32>
    %210 = vector.multi_reduction <add>, %209, %cst_89 [1] : vector<16x64xf32> to vector<16xf32>
    %211 = vector.shape_cast %210 : vector<16xf32> to vector<16x1xf32>
    %cst_90 = arith.constant 6.400000e+01 : f32
    %212 = vector.broadcast %cst_90 : f32 to vector<16x1xf32>
    %213 = arith.divf %211, %212 : vector<16x1xf32>
    %214 = vector.broadcast %204 : vector<16x1xf32> to vector<16x64xf32>
    %215 = arith.subf %196, %214 : vector<16x64xf32>
    %cst_91 = arith.constant 9.99999974E-6 : f32
    %216 = vector.broadcast %cst_91 : f32 to vector<16x1xf32>
    %217 = arith.addf %213, %216 : vector<16x1xf32>
    %218 = math.rsqrt %217 : vector<16x1xf32>
    %219 = vector.broadcast %218 : vector<16x1xf32> to vector<16x64xf32>
    %220 = arith.mulf %215, %219 : vector<16x64xf32>
    %221 = vector.broadcast %198 : vector<1x64xf32> to vector<16x64xf32>
    %222 = arith.mulf %220, %221 : vector<16x64xf32>
    %223 = vector.broadcast %200 : vector<1x64xf32> to vector<16x64xf32>
    %224 = arith.addf %222, %223 : vector<16x64xf32>
    %225 = arith.truncf %224 : vector<16x64xf32> to vector<16x64xbf16>
    %c1_92 = arith.constant 1 : index
    %c0_93 = arith.constant 0 : index
    %c0_94 = arith.constant 0 : index
    %226 = vector.load %arg4[%c1_92, %c0_93, %c0_94] : memref<2x64x128xbf16, #tpu.memory_space<vmem>>, vector<1x64x128xbf16>
    %227 = vector.shape_cast %226 : vector<1x64x128xbf16> to vector<64x128xbf16>
    %cst_95 = arith.constant dense<0.000000e+00> : vector<16x128xf32>
    %228 = tpu.matmul %225, %227, %cst_95 {dimension_numbers = #tpu.dot_dimension_numbers<[1], [0], [0], [1], [0, 0, 1, 1], [], []>} : vector<16x64xbf16>, vector<64x128xbf16>, vector<16x128xf32> -> vector<16x128xf32>
    %c1_96 = arith.constant 1 : index
    %c0_97 = arith.constant 0 : index
    %c0_98 = arith.constant 0 : index
    %229 = vector.load %arg5[%c1_96, %c0_97, %c0_98] : memref<2x1x128xf32, #tpu.memory_space<vmem>>, vector<1x1x128xf32>
    %230 = vector.shape_cast %229 : vector<1x1x128xf32> to vector<1x128xf32>
    %231 = vector.broadcast %230 : vector<1x128xf32> to vector<16x128xf32>
    %232 = arith.addf %228, %231 : vector<16x128xf32>
    %233 = vector.extract_strided_slice %232 {offsets = [0, 0], sizes = [16, 32], strides = [1, 1]} : vector<16x128xf32> to vector<16x32xf32>
    %234 = vector.extract_strided_slice %232 {offsets = [0, 32], sizes = [16, 32], strides = [1, 1]} : vector<16x128xf32> to vector<16x32xf32>
    %235 = vector.extract_strided_slice %232 {offsets = [0, 64], sizes = [16, 64], strides = [1, 1]} : vector<16x128xf32> to vector<16x64xf32>
    %236 = vector.extract_strided_slice %233 {offsets = [0, 0], sizes = [16, 8], strides = [1, 1]} : vector<16x32xf32> to vector<16x8xf32>
    %237 = arith.truncf %236 : vector<16x8xf32> to vector<16x8xbf16>
    %238 = vector.extract_strided_slice %234 {offsets = [0, 0], sizes = [16, 8], strides = [1, 1]} : vector<16x32xf32> to vector<16x8xf32>
    %239 = arith.truncf %238 : vector<16x8xf32> to vector<16x8xbf16>
    %240 = vector.extract_strided_slice %235 {offsets = [0, 0], sizes = [16, 16], strides = [1, 1]} : vector<16x64xf32> to vector<16x16xf32>
    %241 = arith.truncf %240 : vector<16x16xf32> to vector<16x16xbf16>
    %cst_99 = arith.constant dense<0.000000e+00> : vector<16x16xf32>
    %242 = tpu.matmul %237, %239, %cst_99 {dimension_numbers = #tpu.dot_dimension_numbers<[1], [1], [0], [0], [0, 0, 1, 0], [], []>} : vector<16x8xbf16>, vector<16x8xbf16>, vector<16x16xf32> -> vector<16x16xf32>
    %cst_100 = arith.constant 0.353553385 : f32
    %243 = vector.broadcast %cst_100 : f32 to vector<16x16xf32>
    %244 = arith.mulf %242, %243 : vector<16x16xf32>
    %cst_101 = arith.constant dense<0xFF800000> : vector<16xf32>
    %245 = vector.multi_reduction <maximumf>, %244, %cst_101 [1] : vector<16x16xf32> to vector<16xf32>
    %246 = vector.shape_cast %245 : vector<16xf32> to vector<16x1xf32>
    %247 = vector.broadcast %246 : vector<16x1xf32> to vector<16x16xf32>
    %248 = arith.subf %244, %247 : vector<16x16xf32>
    %249 = math.exp %248 : vector<16x16xf32>
    %cst_102 = arith.constant dense<0.000000e+00> : vector<16xf32>
    %250 = vector.multi_reduction <add>, %249, %cst_102 [1] : vector<16x16xf32> to vector<16xf32>
    %251 = vector.shape_cast %250 : vector<16xf32> to vector<16x1xf32>
    %252 = tpu.reciprocal %251 {approx = true} : vector<16x1xf32> -> vector<16x1xf32>
    %253 = vector.broadcast %252 : vector<16x1xf32> to vector<16x16xf32>
    %254 = arith.mulf %249, %253 : vector<16x16xf32>
    %255 = arith.truncf %254 : vector<16x16xf32> to vector<16x16xbf16>
    %cst_103 = arith.constant dense<0.000000e+00> : vector<16x16xf32>
    %256 = tpu.matmul %255, %241, %cst_103 {dimension_numbers = #tpu.dot_dimension_numbers<[1], [0], [0], [1], [0, 0, 1, 1], [], []>} : vector<16x16xbf16>, vector<16x16xbf16>, vector<16x16xf32> -> vector<16x16xf32>
    %c0_104 = arith.constant 0 : index
    %c0_105 = arith.constant 0 : index
    %257 = vector.load %arg15[%c0_104, %c0_105] : memref<16x64xf32, #tpu.memory_space<vmem>>, vector<16x16xf32>
    tpu.vector_store %arg15[%c0_104, %c0_105], %256 {strides = array<i32>} : memref<16x64xf32, #tpu.memory_space<vmem>>, vector<16x16xf32>,
    %258 = vector.extract_strided_slice %233 {offsets = [0, 8], sizes = [16, 8], strides = [1, 1]} : vector<16x32xf32> to vector<16x8xf32>
    %259 = arith.truncf %258 : vector<16x8xf32> to vector<16x8xbf16>
    %260 = vector.extract_strided_slice %234 {offsets = [0, 8], sizes = [16, 8], strides = [1, 1]} : vector<16x32xf32> to vector<16x8xf32>
    %261 = arith.truncf %260 : vector<16x8xf32> to vector<16x8xbf16>
    %262 = vector.extract_strided_slice %235 {offsets = [0, 16], sizes = [16, 16], strides = [1, 1]} : vector<16x64xf32> to vector<16x16xf32>
    %263 = arith.truncf %262 : vector<16x16xf32> to vector<16x16xbf16>
    %cst_106 = arith.constant dense<0.000000e+00> : vector<16x16xf32>
    %264 = tpu.matmul %259, %261, %cst_106 {dimension_numbers = #tpu.dot_dimension_numbers<[1], [1], [0], [0], [0, 0, 1, 0], [], []>} : vector<16x8xbf16>, vector<16x8xbf16>, vector<16x16xf32> -> vector<16x16xf32>
    %cst_107 = arith.constant 0.353553385 : f32
    %265 = vector.broadcast %cst_107 : f32 to vector<16x16xf32>
    %266 = arith.mulf %264, %265 : vector<16x16xf32>
    %cst_108 = arith.constant dense<0xFF800000> : vector<16xf32>
    %267 = vector.multi_reduction <maximumf>, %266, %cst_108 [1] : vector<16x16xf32> to vector<16xf32>
    %268 = vector.shape_cast %267 : vector<16xf32> to vector<16x1xf32>
    %269 = vector.broadcast %268 : vector<16x1xf32> to vector<16x16xf32>
    %270 = arith.subf %266, %269 : vector<16x16xf32>
    %271 = math.exp %270 : vector<16x16xf32>
    %cst_109 = arith.constant dense<0.000000e+00> : vector<16xf32>
    %272 = vector.multi_reduction <add>, %271, %cst_109 [1] : vector<16x16xf32> to vector<16xf32>
    %273 = vector.shape_cast %272 : vector<16xf32> to vector<16x1xf32>
    %274 = tpu.reciprocal %273 {approx = true} : vector<16x1xf32> -> vector<16x1xf32>
    %275 = vector.broadcast %274 : vector<16x1xf32> to vector<16x16xf32>
    %276 = arith.mulf %271, %275 : vector<16x16xf32>
    %277 = arith.truncf %276 : vector<16x16xf32> to vector<16x16xbf16>
    %cst_110 = arith.constant dense<0.000000e+00> : vector<16x16xf32>
    %278 = tpu.matmul %277, %263, %cst_110 {dimension_numbers = #tpu.dot_dimension_numbers<[1], [0], [0], [1], [0, 0, 1, 1], [], []>} : vector<16x16xbf16>, vector<16x16xbf16>, vector<16x16xf32> -> vector<16x16xf32>
    %c0_111 = arith.constant 0 : index
    %c16_112 = arith.constant 16 : index
    %279 = vector.load %arg15[%c0_111, %c16_112] : memref<16x64xf32, #tpu.memory_space<vmem>>, vector<16x16xf32>
    tpu.vector_store %arg15[%c0_111, %c16_112], %278 {strides = array<i32>} : memref<16x64xf32, #tpu.memory_space<vmem>>, vector<16x16xf32>,
    %280 = vector.extract_strided_slice %233 {offsets = [0, 16], sizes = [16, 8], strides = [1, 1]} : vector<16x32xf32> to vector<16x8xf32>
    %281 = arith.truncf %280 : vector<16x8xf32> to vector<16x8xbf16>
    %282 = vector.extract_strided_slice %234 {offsets = [0, 16], sizes = [16, 8], strides = [1, 1]} : vector<16x32xf32> to vector<16x8xf32>
    %283 = arith.truncf %282 : vector<16x8xf32> to vector<16x8xbf16>
    %284 = vector.extract_strided_slice %235 {offsets = [0, 32], sizes = [16, 16], strides = [1, 1]} : vector<16x64xf32> to vector<16x16xf32>
    %285 = arith.truncf %284 : vector<16x16xf32> to vector<16x16xbf16>
    %cst_113 = arith.constant dense<0.000000e+00> : vector<16x16xf32>
    %286 = tpu.matmul %281, %283, %cst_113 {dimension_numbers = #tpu.dot_dimension_numbers<[1], [1], [0], [0], [0, 0, 1, 0], [], []>} : vector<16x8xbf16>, vector<16x8xbf16>, vector<16x16xf32> -> vector<16x16xf32>
    %cst_114 = arith.constant 0.353553385 : f32
    %287 = vector.broadcast %cst_114 : f32 to vector<16x16xf32>
    %288 = arith.mulf %286, %287 : vector<16x16xf32>
    %cst_115 = arith.constant dense<0xFF800000> : vector<16xf32>
    %289 = vector.multi_reduction <maximumf>, %288, %cst_115 [1] : vector<16x16xf32> to vector<16xf32>
    %290 = vector.shape_cast %289 : vector<16xf32> to vector<16x1xf32>
    %291 = vector.broadcast %290 : vector<16x1xf32> to vector<16x16xf32>
    %292 = arith.subf %288, %291 : vector<16x16xf32>
    %293 = math.exp %292 : vector<16x16xf32>
    %cst_116 = arith.constant dense<0.000000e+00> : vector<16xf32>
    %294 = vector.multi_reduction <add>, %293, %cst_116 [1] : vector<16x16xf32> to vector<16xf32>
    %295 = vector.shape_cast %294 : vector<16xf32> to vector<16x1xf32>
    %296 = tpu.reciprocal %295 {approx = true} : vector<16x1xf32> -> vector<16x1xf32>
    %297 = vector.broadcast %296 : vector<16x1xf32> to vector<16x16xf32>
    %298 = arith.mulf %293, %297 : vector<16x16xf32>
    %299 = arith.truncf %298 : vector<16x16xf32> to vector<16x16xbf16>
    %cst_117 = arith.constant dense<0.000000e+00> : vector<16x16xf32>
    %300 = tpu.matmul %299, %285, %cst_117 {dimension_numbers = #tpu.dot_dimension_numbers<[1], [0], [0], [1], [0, 0, 1, 1], [], []>} : vector<16x16xbf16>, vector<16x16xbf16>, vector<16x16xf32> -> vector<16x16xf32>
    %c0_118 = arith.constant 0 : index
    %c32_119 = arith.constant 32 : index
    %301 = vector.load %arg15[%c0_118, %c32_119] : memref<16x64xf32, #tpu.memory_space<vmem>>, vector<16x16xf32>
    tpu.vector_store %arg15[%c0_118, %c32_119], %300 {strides = array<i32>} : memref<16x64xf32, #tpu.memory_space<vmem>>, vector<16x16xf32>,
    %302 = vector.extract_strided_slice %233 {offsets = [0, 24], sizes = [16, 8], strides = [1, 1]} : vector<16x32xf32> to vector<16x8xf32>
    %303 = arith.truncf %302 : vector<16x8xf32> to vector<16x8xbf16>
    %304 = vector.extract_strided_slice %234 {offsets = [0, 24], sizes = [16, 8], strides = [1, 1]} : vector<16x32xf32> to vector<16x8xf32>
    %305 = arith.truncf %304 : vector<16x8xf32> to vector<16x8xbf16>
    %306 = vector.extract_strided_slice %235 {offsets = [0, 48], sizes = [16, 16], strides = [1, 1]} : vector<16x64xf32> to vector<16x16xf32>
    %307 = arith.truncf %306 : vector<16x16xf32> to vector<16x16xbf16>
    %cst_120 = arith.constant dense<0.000000e+00> : vector<16x16xf32>
    %308 = tpu.matmul %303, %305, %cst_120 {dimension_numbers = #tpu.dot_dimension_numbers<[1], [1], [0], [0], [0, 0, 1, 0], [], []>} : vector<16x8xbf16>, vector<16x8xbf16>, vector<16x16xf32> -> vector<16x16xf32>
    %cst_121 = arith.constant 0.353553385 : f32
    %309 = vector.broadcast %cst_121 : f32 to vector<16x16xf32>
    %310 = arith.mulf %308, %309 : vector<16x16xf32>
    %cst_122 = arith.constant dense<0xFF800000> : vector<16xf32>
    %311 = vector.multi_reduction <maximumf>, %310, %cst_122 [1] : vector<16x16xf32> to vector<16xf32>
    %312 = vector.shape_cast %311 : vector<16xf32> to vector<16x1xf32>
    %313 = vector.broadcast %312 : vector<16x1xf32> to vector<16x16xf32>
    %314 = arith.subf %310, %313 : vector<16x16xf32>
    %315 = math.exp %314 : vector<16x16xf32>
    %cst_123 = arith.constant dense<0.000000e+00> : vector<16xf32>
    %316 = vector.multi_reduction <add>, %315, %cst_123 [1] : vector<16x16xf32> to vector<16xf32>
    %317 = vector.shape_cast %316 : vector<16xf32> to vector<16x1xf32>
    %318 = tpu.reciprocal %317 {approx = true} : vector<16x1xf32> -> vector<16x1xf32>
    %319 = vector.broadcast %318 : vector<16x1xf32> to vector<16x16xf32>
    %320 = arith.mulf %315, %319 : vector<16x16xf32>
    %321 = arith.truncf %320 : vector<16x16xf32> to vector<16x16xbf16>
    %cst_124 = arith.constant dense<0.000000e+00> : vector<16x16xf32>
    %322 = tpu.matmul %321, %307, %cst_124 {dimension_numbers = #tpu.dot_dimension_numbers<[1], [0], [0], [1], [0, 0, 1, 1], [], []>} : vector<16x16xbf16>, vector<16x16xbf16>, vector<16x16xf32> -> vector<16x16xf32>
    %c0_125 = arith.constant 0 : index
    %c48_126 = arith.constant 48 : index
    %323 = vector.load %arg15[%c0_125, %c48_126] : memref<16x64xf32, #tpu.memory_space<vmem>>, vector<16x16xf32>
    tpu.vector_store %arg15[%c0_125, %c48_126], %322 {strides = array<i32>} : memref<16x64xf32, #tpu.memory_space<vmem>>, vector<16x16xf32>,
    %c0_127 = arith.constant 0 : index
    %c0_128 = arith.constant 0 : index
    %324 = vector.load %arg15[%c0_127, %c0_128] : memref<16x64xf32, #tpu.memory_space<vmem>>, vector<16x64xf32>
    %325 = arith.truncf %324 : vector<16x64xf32> to vector<16x64xbf16>
    %c1_129 = arith.constant 1 : index
    %c0_130 = arith.constant 0 : index
    %c0_131 = arith.constant 0 : index
    %326 = vector.load %arg6[%c1_129, %c0_130, %c0_131] : memref<2x64x64xbf16, #tpu.memory_space<vmem>>, vector<1x64x64xbf16>
    %327 = vector.shape_cast %326 : vector<1x64x64xbf16> to vector<64x64xbf16>
    %cst_132 = arith.constant dense<0.000000e+00> : vector<16x64xf32>
    %328 = tpu.matmul %325, %327, %cst_132 {dimension_numbers = #tpu.dot_dimension_numbers<[1], [0], [0], [1], [0, 0, 1, 1], [], []>} : vector<16x64xbf16>, vector<64x64xbf16>, vector<16x64xf32> -> vector<16x64xf32>
    %329 = arith.addf %196, %328 : vector<16x64xf32>
    %c1_133 = arith.constant 1 : index
    %c0_134 = arith.constant 0 : index
    %c0_135 = arith.constant 0 : index
    %330 = vector.load %arg7[%c1_133, %c0_134, %c0_135] : memref<2x1x64xf32, #tpu.memory_space<vmem>>, vector<1x1x64xf32>
    %331 = vector.shape_cast %330 : vector<1x1x64xf32> to vector<1x64xf32>
    %332 = vector.broadcast %331 : vector<1x64xf32> to vector<16x64xf32>
    %333 = arith.addf %329, %332 : vector<16x64xf32>
    %c1_136 = arith.constant 1 : index
    %c0_137 = arith.constant 0 : index
    %c0_138 = arith.constant 0 : index
    %334 = vector.load %arg8[%c1_136, %c0_137, %c0_138] : memref<2x1x64xf32, #tpu.memory_space<vmem>>, vector<1x1x64xf32>
    %335 = vector.shape_cast %334 : vector<1x1x64xf32> to vector<1x64xf32>
    %c1_139 = arith.constant 1 : index
    %c0_140 = arith.constant 0 : index
    %c0_141 = arith.constant 0 : index
    %336 = vector.load %arg9[%c1_139, %c0_140, %c0_141] : memref<2x1x64xf32, #tpu.memory_space<vmem>>, vector<1x1x64xf32>
    %337 = vector.shape_cast %336 : vector<1x1x64xf32> to vector<1x64xf32>
    %c1_142 = arith.constant 1 : index
    %c0_143 = arith.constant 0 : index
    %c0_144 = arith.constant 0 : index
    %338 = vector.load %arg10[%c1_142, %c0_143, %c0_144] : memref<2x64x64xbf16, #tpu.memory_space<vmem>>, vector<1x64x64xbf16>
    %339 = vector.shape_cast %338 : vector<1x64x64xbf16> to vector<64x64xbf16>
    %c1_145 = arith.constant 1 : index
    %c0_146 = arith.constant 0 : index
    %c0_147 = arith.constant 0 : index
    %340 = vector.load %arg11[%c1_145, %c0_146, %c0_147] : memref<2x1x64xf32, #tpu.memory_space<vmem>>, vector<1x1x64xf32>
    %341 = vector.shape_cast %340 : vector<1x1x64xf32> to vector<1x64xf32>
    %c1_148 = arith.constant 1 : index
    %c0_149 = arith.constant 0 : index
    %c0_150 = arith.constant 0 : index
    %342 = vector.load %arg12[%c1_148, %c0_149, %c0_150] : memref<2x64x64xbf16, #tpu.memory_space<vmem>>, vector<1x64x64xbf16>
    %343 = vector.shape_cast %342 : vector<1x64x64xbf16> to vector<64x64xbf16>
    %c1_151 = arith.constant 1 : index
    %c0_152 = arith.constant 0 : index
    %c0_153 = arith.constant 0 : index
    %344 = vector.load %arg13[%c1_151, %c0_152, %c0_153] : memref<2x1x64xf32, #tpu.memory_space<vmem>>, vector<1x1x64xf32>
    %345 = vector.shape_cast %344 : vector<1x1x64xf32> to vector<1x64xf32>
    %cst_154 = arith.constant dense<0.000000e+00> : vector<16xf32>
    %346 = vector.multi_reduction <add>, %333, %cst_154 [1] : vector<16x64xf32> to vector<16xf32>
    %347 = vector.shape_cast %346 : vector<16xf32> to vector<16x1xf32>
    %cst_155 = arith.constant 6.400000e+01 : f32
    %348 = vector.broadcast %cst_155 : f32 to vector<16x1xf32>
    %349 = arith.divf %347, %348 : vector<16x1xf32>
    %350 = vector.broadcast %349 : vector<16x1xf32> to vector<16x64xf32>
    %351 = arith.subf %333, %350 : vector<16x64xf32>
    %352 = vector.broadcast %349 : vector<16x1xf32> to vector<16x64xf32>
    %353 = arith.subf %333, %352 : vector<16x64xf32>
    %354 = arith.mulf %351, %353 : vector<16x64xf32>
    %cst_156 = arith.constant dense<0.000000e+00> : vector<16xf32>
    %355 = vector.multi_reduction <add>, %354, %cst_156 [1] : vector<16x64xf32> to vector<16xf32>
    %356 = vector.shape_cast %355 : vector<16xf32> to vector<16x1xf32>
    %cst_157 = arith.constant 6.400000e+01 : f32
    %357 = vector.broadcast %cst_157 : f32 to vector<16x1xf32>
    %358 = arith.divf %356, %357 : vector<16x1xf32>
    %359 = vector.broadcast %349 : vector<16x1xf32> to vector<16x64xf32>
    %360 = arith.subf %333, %359 : vector<16x64xf32>
    %cst_158 = arith.constant 9.99999974E-6 : f32
    %361 = vector.broadcast %cst_158 : f32 to vector<16x1xf32>
    %362 = arith.addf %358, %361 : vector<16x1xf32>
    %363 = math.rsqrt %362 : vector<16x1xf32>
    %364 = vector.broadcast %363 : vector<16x1xf32> to vector<16x64xf32>
    %365 = arith.mulf %360, %364 : vector<16x64xf32>
    %366 = vector.broadcast %335 : vector<1x64xf32> to vector<16x64xf32>
    %367 = arith.mulf %365, %366 : vector<16x64xf32>
    %368 = vector.broadcast %337 : vector<1x64xf32> to vector<16x64xf32>
    %369 = arith.addf %367, %368 : vector<16x64xf32>
    %370 = arith.truncf %369 : vector<16x64xf32> to vector<16x64xbf16>
    %cst_159 = arith.constant dense<0.000000e+00> : vector<16x64xf32>
    %371 = tpu.matmul %370, %339, %cst_159 {dimension_numbers = #tpu.dot_dimension_numbers<[1], [0], [0], [1], [0, 0, 1, 1], [], []>} : vector<16x64xbf16>, vector<64x64xbf16>, vector<16x64xf32> -> vector<16x64xf32>
    %372 = vector.broadcast %341 : vector<1x64xf32> to vector<16x64xf32>
    %373 = arith.addf %371, %372 : vector<16x64xf32>
    %cst_160 = arith.constant 5.000000e-01 : f32
    %374 = vector.broadcast %cst_160 : f32 to vector<16x64xf32>
    %375 = arith.mulf %374, %373 : vector<16x64xf32>
    %cst_161 = arith.constant 4.471500e-02 : f32
    %376 = vector.broadcast %cst_161 : f32 to vector<16x64xf32>
    %377 = arith.mulf %376, %373 : vector<16x64xf32>
    %378 = arith.mulf %377, %373 : vector<16x64xf32>
    %379 = arith.mulf %378, %373 : vector<16x64xf32>
    %380 = arith.addf %373, %379 : vector<16x64xf32>
    %cst_162 = arith.constant 0.797884583 : f32
    %381 = vector.broadcast %cst_162 : f32 to vector<16x64xf32>
    %382 = arith.mulf %381, %380 : vector<16x64xf32>
    %383 = math.tanh %382 : vector<16x64xf32>
    %cst_163 = arith.constant 1.000000e+00 : f32
    %384 = vector.broadcast %cst_163 : f32 to vector<16x64xf32>
    %385 = arith.addf %384, %383 : vector<16x64xf32>
    %386 = arith.mulf %375, %385 : vector<16x64xf32>
    %387 = arith.truncf %386 : vector<16x64xf32> to vector<16x64xbf16>
    %cst_164 = arith.constant dense<0.000000e+00> : vector<16x64xf32>
    %388 = tpu.matmul %387, %343, %cst_164 {dimension_numbers = #tpu.dot_dimension_numbers<[1], [0], [0], [1], [0, 0, 1, 1], [], []>} : vector<16x64xbf16>, vector<64x64xbf16>, vector<16x64xf32> -> vector<16x64xf32>
    %389 = vector.broadcast %345 : vector<1x64xf32> to vector<16x64xf32>
    %390 = arith.addf %388, %389 : vector<16x64xf32>
    %391 = arith.addf %333, %390 : vector<16x64xf32>
    %c0_165 = arith.constant 0 : index
    %c0_166 = arith.constant 0 : index
    %c0_167 = arith.constant 0 : index
    %392 = vector.load %arg14[%c0_165, %c0_166, %c0_167] : memref<1x16x64xf32, #tpu.memory_space<vmem>>, vector<1x16x64xf32>
    %393 = vector.shape_cast %392 : vector<1x16x64xf32> to vector<16x64xf32>
    %394 = vector.shape_cast %391 : vector<16x64xf32> to vector<1x16x64xf32>
    tpu.vector_store %arg14[%c0_165, %c0_166, %c0_167], %394 {strides = array<i32>} : memref<1x16x64xf32, #tpu.memory_space<vmem>>, vector<1x16x64xf32>,
    return
  }
  func.func @transform_0(%arg0: i32) -> (i32, i32, i32) {
    %c0_i32 = arith.constant 0 : i32
    %c0_i32_0 = arith.constant 0 : i32
    %c0_i32_1 = arith.constant 0 : i32
    return %arg0, %c0_i32, %c0_i32_0 : i32, i32, i32
  }
  func.func @transform_1(%arg0: i32) -> (i32, i32, i32) {
    %c0_i32 = arith.constant 0 : i32
    %c0_i32_0 = arith.constant 0 : i32
    %c0_i32_1 = arith.constant 0 : i32
    %c0_i32_2 = arith.constant 0 : i32
    return %c0_i32, %c0_i32_0, %c0_i32_1 : i32, i32, i32
  }
  func.func @transform_2(%arg0: i32) -> (i32, i32, i32) {
    %c0_i32 = arith.constant 0 : i32
    %c0_i32_0 = arith.constant 0 : i32
    %c0_i32_1 = arith.constant 0 : i32
    %c0_i32_2 = arith.constant 0 : i32
    return %c0_i32, %c0_i32_0, %c0_i32_1 : i32, i32, i32
  }
  func.func @transform_3(%arg0: i32) -> (i32, i32, i32) {
    %c0_i32 = arith.constant 0 : i32
    %c0_i32_0 = arith.constant 0 : i32
    %c0_i32_1 = arith.constant 0 : i32
    %c0_i32_2 = arith.constant 0 : i32
    return %c0_i32, %c0_i32_0, %c0_i32_1 : i32, i32, i32
  }
  func.func @transform_4(%arg0: i32) -> (i32, i32, i32) {
    %c0_i32 = arith.constant 0 : i32
    %c0_i32_0 = arith.constant 0 : i32
    %c0_i32_1 = arith.constant 0 : i32
    %c0_i32_2 = arith.constant 0 : i32
    return %c0_i32, %c0_i32_0, %c0_i32_1 : i32, i32, i32
  }
  func.func @transform_5(%arg0: i32) -> (i32, i32, i32) {
    %c0_i32 = arith.constant 0 : i32
    %c0_i32_0 = arith.constant 0 : i32
    %c0_i32_1 = arith.constant 0 : i32
    %c0_i32_2 = arith.constant 0 : i32
    return %c0_i32, %c0_i32_0, %c0_i32_1 : i32, i32, i32
  }
  func.func @transform_6(%arg0: i32) -> (i32, i32, i32) {
    %c0_i32 = arith.constant 0 : i32
    %c0_i32_0 = arith.constant 0 : i32
    %c0_i32_1 = arith.constant 0 : i32
    %c0_i32_2 = arith.constant 0 : i32
    return %c0_i32, %c0_i32_0, %c0_i32_1 : i32, i32, i32
  }
  func.func @transform_7(%arg0: i32) -> (i32, i32, i32) {
    %c0_i32 = arith.constant 0 : i32
    %c0_i32_0 = arith.constant 0 : i32
    %c0_i32_1 = arith.constant 0 : i32
    %c0_i32_2 = arith.constant 0 : i32
    return %c0_i32, %c0_i32_0, %c0_i32_1 : i32, i32, i32
  }
  func.func @transform_8(%arg0: i32) -> (i32, i32, i32) {
    %c0_i32 = arith.constant 0 : i32
    %c0_i32_0 = arith.constant 0 : i32
    %c0_i32_1 = arith.constant 0 : i32
    %c0_i32_2 = arith.constant 0 : i32
    return %c0_i32, %c0_i32_0, %c0_i32_1 : i32, i32, i32
  }
  func.func @transform_9(%arg0: i32) -> (i32, i32, i32) {
    %c0_i32 = arith.constant 0 : i32
    %c0_i32_0 = arith.constant 0 : i32
    %c0_i32_1 = arith.constant 0 : i32
    %c0_i32_2 = arith.constant 0 : i32
    return %c0_i32, %c0_i32_0, %c0_i32_1 : i32, i32, i32
  }
  func.func @transform_10(%arg0: i32) -> (i32, i32, i32) {
    %c0_i32 = arith.constant 0 : i32
    %c0_i32_0 = arith.constant 0 : i32
    %c0_i32_1 = arith.constant 0 : i32
    %c0_i32_2 = arith.constant 0 : i32
    return %c0_i32, %c0_i32_0, %c0_i32_1 : i32, i32, i32
  }
  func.func @transform_11(%arg0: i32) -> (i32, i32, i32) {
    %c0_i32 = arith.constant 0 : i32
    %c0_i32_0 = arith.constant 0 : i32
    %c0_i32_1 = arith.constant 0 : i32
    %c0_i32_2 = arith.constant 0 : i32
    return %c0_i32, %c0_i32_0, %c0_i32_1 : i32, i32, i32
  }
  func.func @transform_12(%arg0: i32) -> (i32, i32, i32) {
    %c0_i32 = arith.constant 0 : i32
    %c0_i32_0 = arith.constant 0 : i32
    %c0_i32_1 = arith.constant 0 : i32
    %c0_i32_2 = arith.constant 0 : i32
    return %c0_i32, %c0_i32_0, %c0_i32_1 : i32, i32, i32
  }
  func.func @transform_13(%arg0: i32) -> (i32, i32, i32) {
    %c0_i32 = arith.constant 0 : i32
    %c0_i32_0 = arith.constant 0 : i32
    %c0_i32_1 = arith.constant 0 : i32
    return %arg0, %c0_i32, %c0_i32_0 : i32, i32, i32
  }
}

</mosaic_0001>

<bundles_post_ra>
// kernel: _lambda_.7
= control target key start
LH: loop header
LB: loop body
LE: loop exit
PB: predicated region body
PF: predicated region fallthrough
CT: control target
= control target key end

     0   :  { %vm46_vm0 = vcmask 261120   ;;  %s140_s1 = inlined_call_operand.vmem [shape: bf16[32,128], index: 1, kind: input, shape index: {}]   ;;  %s141_s2 = inlined_call_operand.vmem [shape: f32[1,128], index: 2, kind: input, shape index: {}]   ;;  %s142_s0 = inlined_call_operand.vmem [shape: bf16[16,32], index: 0, kind: input, shape index: {}]   ;;  %s143_s3 = inlined_call_operand.vmem [shape: f32[16,128], index: 3, kind: output, shape index: {}]  }
   0x1   :  { %v100_v0 = vld [vmem:[%s140_s1 + $0x8] sm:$0xff]  ;;  %v99_v1 = vld [vmem:[%s140_s1] sm:$0xff] }
   0x2   :  { %56 = vmatpush.bf16.msra.mxu0 %v100_v0  ;;  %v98_v2 = vld [vmem:[%s142_s0] sm:$0xff] }
   0x3   :  { %v101_v3 = vld [vmem:[%s141_s2] ss:$0 sm:$0xff] }
   0x6   :  { %57 = vmatpush.bf16.msra.mxu0 %v99_v1 }
   0x9   :  { %97 = vmatmul.msk.bf16.vlgmr.msra.gmra.mxu0 %vm46_vm0, %v98_v2 }
  0x86   :  { %v59_v4 = vpop.f32.mrf.mxu0 }
  0x87   :  { %v77_v5 = vadd.f32 %v101_v3, %v59_v4 }
  0x89   :  { %79 = vst [vmem:[%s143_s3] sm:$0xff] %v77_v5 }
  0x8e   :  { %v61_v6 = vpop.f32.mrf.mxu0 }
  0x8f   :  { %v78_v7 = vadd.f32 %v101_v3, %v61_v6 }
  0x91   :  { %80 = vst [vmem:[%s143_s3 + $0x8] sm:$0xff] %v78_v7 }

// kernel: _lambda_.6
= control target key start
LH: loop header
LB: loop body
LE: loop exit
PB: predicated region body
PF: predicated region fallthrough
CT: control target
= control target key end

     0   :  { %s2731_s0 = inlined_call_operand.vmem [shape: f32[2,16,64], index: 0, kind: input, shape index: {}]   ;;  %s2732_s1 = inlined_call_operand.vmem [shape: f32[2,8,32], index: 1, kind: input, shape index: {}]   ;;  %s2733_s2 = inlined_call_operand.vmem [shape: f32[1,64], index: 2, kind: input, shape index: {}]   ;;  %s2734_s3 = inlined_call_operand.hbm [shape: f32[1,64], index: 3, kind: input, shape index: {}]   ;;  %s2735_s4 = inlined_call_operand.hbm [shape: f32[1,32], index: 4, kind: input, shape index: {}]   ;;  %s2736_s5 = inlined_call_operand.hbm [shape: f32[1,32], index: 5, kind: input, shape index: {}]   ;;  %s2737_s6 = inlined_call_operand.hbm [shape: bf16[32,32], index: 6, kind: input, shape index: {}]   ;;  %s2738_s7 = inlined_call_operand.hbm [shape: f32[1,32], index: 7, kind: input, shape index: {}]   ;;  %s2739_s8 = inlined_call_operand.vmem [shape: bf16[64,64], index: 8, kind: input, shape index: {}]   ;;  %s2740_s9 = inlined_call_operand.hbm [shape: f32[1,64], index: 9, kind: input, shape index: {}]   ;;  %s2741_s10 = inlined_call_operand.hbm [shape: bf16[32,32], index: 10, kind: input, shape index: {}]   ;;  %s2742_s11 = inlined_call_operand.hbm [shape: f32[1,32], index: 11, kind: input, shape index: {}]   ;;  %s2743_s12 = inlined_call_operand.hbm [shape: f32[1,32], index: 12, kind: input, shape index: {}]   ;;  %s2744_s13 = inlined_call_operand.hbm [shape: f32[1,32], index: 13, kind: input, shape index: {}]   ;;  %s2745_s14 = inlined_call_operand.hbm [shape: bf16[32,32], index: 14, kind: input, shape index: {}]   ;;  %s2746_s15 = inlined_call_operand.hbm [shape: f32[1,32], index: 15, kind: input, shape index: {}]   ;;  %s2747_s16 = inlined_call_operand.hbm [shape: bf16[32,32], index: 16, kind: input, shape index: {}]   ;;  %s2748_s17 = inlined_call_operand.hbm [shape: f32[1,32], index: 17, kind: input, shape index: {}]   ;;  %s2749_s18 = inlined_call_operand.vmem [shape: f32[2,8,32], index: 18, kind: output, shape index: {}]  }
   0x1   :  { %2751 = sst [smem:[#allocation34_spill]] %s2731_s0 }
   0x2   :  { %2752 = sst [smem:[#allocation35_spill]] %s2732_s1 }
   0x3   :  { %2753 = sst [smem:[#allocation36_spill]] %s2733_s2 }
   0x4   :  { %2754 = sst [smem:[#allocation37_spill]] %s2735_s4 }
   0x5   :  { %2755 = sst [smem:[#allocation38_spill]] %s2737_s6 }
   0x6   :  { %2756 = sst [smem:[#allocation39_spill]] %s2740_s9 }
   0x7   :  { %23 = vsyncpa [#allocation4], 0 }
   0x8   :  { %24 = vsyncpa [#allocation6], 0 }
   0x9   :  { %25 = vsyncpa [#allocation9], 0 }
   0xa   :  { %26 = vsyncpa [#allocation12], 0 }
   0xb   :  { %27 = vsyncpa [#allocation15], 0 }
   0xc   :  { %28 = vsyncpa [#allocation18], 0 }
   0xd   :  { %29 = vsyncpa [#allocation21], 0 }
   0xe   :  { %30 = vsyncpa [#allocation24], 0  ;;  %s2499_s27 = smov 0  }
   0xf LB: > { %2757 = sst [smem:[#allocation33_spill]] %s2374_s27  ;;  %s2508_s0 = sadd.s32 4294967295, %s2374_s27   ;;  %s2374_s27 = sphi %s2499_s27, %s36_s27  }
  0x10   : > { %s2758_s4 = sld [smem:[#allocation37_spill]]  ;;  %p1601_p0 = scmp.ge.s32.totalorder %s2374_s27, 1 }
  0x11   : > { %p455_p1 = scmp.lt.s32.totalorder %s2374_s27, 3  ;;  %p1811_p2 = scmp.eq.s32.totalorder %s2508_s0, 0 }
  0x12   : > { %s2376_s1 = smov [#allocation5]   ;;  %s2760_s6 = sld [smem:[#allocation38_spill]] }
  0x13   : > { %p2513_p3 = pnand %p1601_p0, %p455_p1  ;;  %s484_s20 = sshll.u32 %s2376_s1, 4  ;;  %s485_s20 = int_to_ptr.vmem [resolvable:$true] %s484_s20 }
  0x14   : > { %s2377_s24 = smov [#allocation8]   ;;  %s2762_s9 = sld [smem:[#allocation39_spill]] }
  0x15   : > { %p1768_p4 = pneg %p2513_p3  ;;  %s507_s25 = sshll.u32 %s2377_s24, 4  ;;  %s508_s25 = int_to_ptr.vmem [resolvable:$true] %s507_s25 }
  0x16   : > { %s482_s30 = sshll.u32 %s2758_s4, 4  ;;  %s2378_s1 = smov 64   ;;  %s483_s30 = int_to_ptr.hbm [resolvable:$true] %s482_s30 }
  0x17   : > { %p2524_p5 = pnand %p1811_p2, %p1768_p4  ;;  %s2379_s21 = smov 4  }
  0x18   : > { %s505_s2 = sshll.u32 %s2760_s6, 4  ;;  %s2380_s22 = smov [#allocation11]   ;;  %s506_s2 = int_to_ptr.hbm [resolvable:$true] %s505_s2 }
  0x19   : > { %1774 = dma.hbm_to_vmem [thread:$0]  (!%p2524_p5), %s483_s30, 16, %s485_s20, [#allocation6]  }
  0x1a   : > { %s535_s29 = sshll.u32 %s2762_s9, 4  ;;  %s537_s4 = sshll.u32 %s2380_s22, 4  ;;  %s536_s29 = int_to_ptr.hbm [resolvable:$true] %s535_s29  ;;  %s538_s4 = int_to_ptr.vmem [resolvable:$true] %s537_s4 }
  0x1b   : > { %1780 = dma.hbm_to_vmem [thread:$0]  (!%p2524_p5), %s506_s2, 256, %s508_s25, [#allocation9], %s2378_s1, %s2378_s1, %s2379_s21  }
  0x1c   : > { %s561_s27 = sshll.u32 %s2742_s11, 4  ;;  %s585_s26 = sshll.u32 %s2744_s13, 4  ;;  %s562_s27 = int_to_ptr.hbm [resolvable:$true] %s561_s27  ;;  %s586_s26 = int_to_ptr.hbm [resolvable:$true] %s585_s26 }
  0x1d   : > { %1786 = dma.hbm_to_vmem [thread:$0]  (!%p2524_p5), %s536_s29, 16, %s538_s4, [#allocation12]  }
  0x1e   : > { %s2381_s28 = smov [#allocation14]   ;;  %s2382_s2 = smov [#allocation17]  }
  0x1f   : > { %s563_s9 = sshll.u32 %s2381_s28, 4  ;;  %s587_s25 = sshll.u32 %s2382_s2, 4  ;;  %s564_s9 = int_to_ptr.vmem [resolvable:$true] %s563_s9  ;;  %s588_s25 = int_to_ptr.vmem [resolvable:$true] %s587_s25 }
  0x20   : > { %1792 = dma.hbm_to_vmem [thread:$0]  (!%p2524_p5), %s562_s27, 16, %s564_s9, [#allocation15]  }
  0x21   : > { %s611_s24 = sshll.u32 %s2746_s15, 4  ;;  %s470_s30 = sshll.u32 %s2734_s3, 4  ;;  %s612_s24 = int_to_ptr.hbm [resolvable:$true] %s611_s24  ;;  %s471_s30 = int_to_ptr.hbm [resolvable:$true] %s470_s30 }
  0x22   : > { %1798 = dma.hbm_to_vmem [thread:$0]  (!%p2524_p5), %s586_s26, 16, %s588_s25, [#allocation18]  }
  0x23   : > { %s2383_s20 = smov [#allocation20]   ;;  %s2384_s9 = smov [#allocation3]  }
  0x24   : > { %s613_s28 = sshll.u32 %s2383_s20, 4  ;;  %s472_s27 = sshll.u32 %s2384_s9, 4  ;;  %s614_s28 = int_to_ptr.vmem [resolvable:$true] %s613_s28  ;;  %s473_s27 = int_to_ptr.vmem [resolvable:$true] %s472_s27 }
  0x25   : > { %1804 = dma.hbm_to_vmem [thread:$0]  (!%p2524_p5), %s612_s24, 16, %s614_s28, [#allocation21]  }
  0x26   : > { %s494_s22 = sshll.u32 %s2736_s5, 4  ;;  %s520_s4 = sshll.u32 %s2738_s7, 4  ;;  %s495_s22 = int_to_ptr.hbm [resolvable:$true] %s494_s22  ;;  %s521_s4 = int_to_ptr.hbm [resolvable:$true] %s520_s4 }
  0x27   : > { %1771 = dma.hbm_to_vmem [thread:$0]  (!%p2524_p5), %s471_s30, 16, %s473_s27, [#allocation4]  }
  0x28   : > { %s2385_s29 = smov [#allocation7]   ;;  %s2386_s24 = smov [#allocation10]  }
  0x29   : > { %s496_s20 = sshll.u32 %s2385_s29, 4  ;;  %s522_s28 = sshll.u32 %s2386_s24, 4  ;;  %s497_s20 = int_to_ptr.vmem [resolvable:$true] %s496_s20  ;;  %s523_s28 = int_to_ptr.vmem [resolvable:$true] %s522_s28 }
  0x2a   : > { %1777 = dma.hbm_to_vmem [thread:$0]  (!%p2524_p5), %s495_s22, 16, %s497_s20, [#allocation6]  }
  0x2b   : > { %s546_s6 = sshll.u32 %s2741_s10, 4  ;;  %s573_s26 = sshll.u32 %s2743_s12, 4  ;;  %s547_s6 = int_to_ptr.hbm [resolvable:$true] %s546_s6  ;;  %s574_s26 = int_to_ptr.hbm [resolvable:$true] %s573_s26 }
  0x2c   : > { %1783 = dma.hbm_to_vmem [thread:$0]  (!%p2524_p5), %s521_s4, 16, %s523_s28, [#allocation9]  }
  0x2d   : > { %s2387_s25 = smov [#allocation13]   ;;  %s2388_s22 = smov [#allocation16]  }
  0x2e   : > { %s548_s29 = sshll.u32 %s2387_s25, 4  ;;  %s575_s20 = sshll.u32 %s2388_s22, 4  ;;  %s549_s29 = int_to_ptr.vmem [resolvable:$true] %s548_s29  ;;  %s576_s20 = int_to_ptr.vmem [resolvable:$true] %s575_s20 }
  0x2f   : > { %1789 = dma.hbm_to_vmem [thread:$0]  (!%p2524_p5), %s547_s6, 256, %s549_s29, [#allocation12], %s2378_s1, %s2378_s1, %s2379_s21  }
  0x30   : > { %s596_s4 = sshll.u32 %s2745_s14, 4  ;;  %s622_s30 = sshll.u32 %s2747_s16, 4  ;;  %s597_s4 = int_to_ptr.hbm [resolvable:$true] %s596_s4  ;;  %s623_s30 = int_to_ptr.hbm [resolvable:$true] %s622_s30 }
  0x31   : > { %1795 = dma.hbm_to_vmem [thread:$0]  (!%p2524_p5), %s574_s26, 16, %s576_s20, [#allocation15]  }
  0x32   : > { %s2389_s27 = smov [#allocation19]   ;;  %s2390_s6 = smov [#allocation22]  }
  0x33   : > { %s598_s25 = sshll.u32 %s2389_s27, 4  ;;  %s624_s29 = sshll.u32 %s2390_s6, 4  ;;  %s599_s25 = int_to_ptr.vmem [resolvable:$true] %s598_s25  ;;  %s625_s29 = int_to_ptr.vmem [resolvable:$true] %s624_s29 }
  0x34   : > { %1801 = dma.hbm_to_vmem [thread:$0]  (!%p2524_p5), %s597_s4, 256, %s599_s25, [#allocation18], %s2378_s1, %s2378_s1, %s2379_s21  }
  0x35   : > { %s637_s26 = sshll.u32 %s2748_s17, 4  ;;  %s2391_s20 = smov [#allocation23]   ;;  %s638_s26 = int_to_ptr.hbm [resolvable:$true] %s637_s26 }
  0x36   : > { %1807 = dma.hbm_to_vmem [thread:$0]  (!%p2524_p5), %s623_s30, 256, %s625_s29, [#allocation21], %s2378_s1, %s2378_s1, %s2379_s21  }
  0x37   : > { %s639_s9 = sshll.u32 %s2391_s20, 4  ;;  %667 = sbr.rel (%p2513_p3) target bundleno = 2276 (0x8e4), region = 92  ;;  %s640_s9 = int_to_ptr.vmem [resolvable:$true] %s639_s9 }
  0x38   : > { %1810 = dma.hbm_to_vmem [thread:$0]  (!%p2524_p5), %s638_s26, 16, %s640_s9, [#allocation24]  }
  0x3c   : > { %2341 = dma.done.wait (%p1811_p2), [#allocation4], 16  }
  0x3d   : > { %2343 = vsyncadd (%p1811_p2), [#allocation4], 4294967280 }
  0x3e   : > { %2345 = dma.done.wait (%p1811_p2), [#allocation6], 32  }
  0x3f   : > { %2347 = vsyncadd (%p1811_p2), [#allocation6], 4294967264 }
  0x40   : > { %2349 = dma.done.wait (%p1811_p2), [#allocation9], 272  }
  0x41   : > { %2351 = vsyncadd (%p1811_p2), [#allocation9], 4294967024 }
  0x42   : > { %2353 = dma.done.wait (%p1811_p2), [#allocation12], 272  }
  0x43   : > { %2355 = vsyncadd (%p1811_p2), [#allocation12], 4294967024 }
  0x44   : > { %2357 = dma.done.wait (%p1811_p2), [#allocation15], 32  }
  0x45   : > { %2359 = vsyncadd (%p1811_p2), [#allocation15], 4294967264 }
  0x46   : > { %2361 = dma.done.wait (%p1811_p2), [#allocation18], 272  }
  0x47   : > { %2363 = vsyncadd (%p1811_p2), [#allocation18], 4294967024 }
  0x48   : > { %2365 = dma.done.wait (%p1811_p2), [#allocation21], 272  }
  0x49   : > { %2367 = vsyncadd (%p1811_p2), [#allocation21], 4294967024 }
  0x4a   : > { %2369 = dma.done.wait (%p1811_p2), [#allocation24], 16  }
  0x4b   : > { %2371 = vsyncadd (%p1811_p2), [#allocation24], 4294967280  ;;  %p790_p6 = scmp.lt.s32.totalorder %s2508_s0, 1  ;;  %s2763_s4 = sld [smem:[#allocation34_spill]]  ;;  %vm809_vm0 = vcmask 523264   ;;  %vm873_vm1 = vcmask 261120  }
  0x4c   : > { %s2764_s27 = sld [smem:[#allocation35_spill]]  ;;  %v2392_v6 = vmov 64.0   ;;  %v2393_v8 = vmov 32.0   ;;  %v1705_v35 = vld [vmem:[%s2739_s8 + $0x18] sm:$0xff]  ;;  %v1704_v36 = vld [vmem:[%s2739_s8 + $0x10] sm:$0xff]  ;;  %v1703_v37 = vld [vmem:[%s2739_s8 + $0x8] sm:$0xff] }
  0x4d   : > { %s2768_s0 = smov (!%p790_p6, %s2508_s0), 1  ;;  %1886 = vrcp.f32 %v2392_v6  ;;  %992 = vmatpush.bf16.msra.mxu1 %v1705_v35  ;;  %v1702_v40 = vld [vmem:[%s2739_s8] sm:$0xff]  ;;  %v1701_v42 = vld [vmem:[#allocation8 + $0x8] sm:$0xff]  ;;  %v1700_v44 = vld [vmem:[#allocation8] sm:$0xff]  ;;  %vm1004_vm13 = vcmask 64512   ;;  %s2395_s2 = smov 112  }
  0x4e   : > { %s1699_s19 = sshll.u32 %s2768_s0, 4  ;;  %s1634_s23 = sshll.u32 %s2768_s0, 3  ;;  %1888 = vrcp.f32 %v2393_v8  ;;  %941 = vmatpush.bf16.msra.mxu0 %v1701_v42  ;;  %vm1025_vm14 = vcmask 130048   ;;  %vm1119_vm15 = vcmask 130112  }
  0x4f   : > { %s2396_s30 = smov 120   ;;  %s2399_s6 = smov 80  }
  0x50   : > { %s2400_s29 = smov 72   ;;  %s2401_s22 = smov 8  }
  0x51   : > { %s794_s28 = scalar_lea.vmem %s2763_s4, %s1699_s19  ;;  %993 = vmatpush.bf16.msra.mxu1 %v1704_v36  ;;  %s2765_s4 = sld [smem:[#allocation36_spill]] }
  0x52   : > { %s798_s25 = scalar_lea.vmem %s2764_s27, %s1634_s23  ;;  %v804_v0 = vld [vmem:[%s794_s28] sm:$0xff]  ;;  %v805_v4 = vld [vmem:[%s794_s28 + $0x8] sm:$0xff]  ;;  %942 = vmatpush.bf16.msra.mxu0 %v1700_v44  ;;  %s2394_s28 = smov 96  }
  0x53   : > { %v806_v1 = vld [vmem:[%s798_s25] sm:$0xff]  ;;  %v810_v2 = vsel %vm809_vm0, %v804_v0, 0.0  ;;  %v813_v5 = vsel %vm809_vm0, %v805_v4, 0.0  ;;  %v1887_v7 = vpop.eup %1886  ;;  %s2397_s27 = smov 104   ;;  %s2398_s25 = smov 88  }
  0x54   : > { %v874_v3 = vsel %vm873_vm1, %v806_v1, 0.0  ;;  %811 = vadd.xlane.f32.xlu0 %v810_v2  ;;  %v817_v9 = vmul.f32 64.0, %v1887_v7  ;;  %v1889_v11 = vpop.eup %1888  ;;  %vm821_vm2 = vweird.f32 %v1887_v7  ;;  %s2402_s24 = smov 16   ;;  %s2403_s26 = smov 24  }
  0x55   : > { %875 = vadd.xlane.f32.xlu1 %v874_v3  ;;  %v878_v13 = vmul.f32 32.0, %v1889_v11  ;;  %vm882_vm3 = vweird.f32 %v1889_v11  ;;  %994 = vmatpush.bf16.msra.mxu1 %v1703_v37  ;;  %s802_s19 = scalar_lea.vmem %s2749_s18, %s1634_s23 }
  0x56   : > { %v818_v10 = vsub.f32 1.0, %v817_v9 }
  0x57   : > { %v879_v15 = vsub.f32 1.0, %v878_v13 }
  0x58   : > { %v819_v12 = vmul.f32 %v1887_v7, %v818_v10 }
  0x59   : > { %v880_v17 = vmul.f32 %v1889_v11, %v879_v15  ;;  %995 = vmatpush.bf16.msra.mxu1 %v1702_v40  ;;  %v1877_v15 = vld [vmem:[#allocation5] ss:$0 sm:$0xff] }
  0x5a   : > { %v820_v14 = vadd.f32 %v1887_v7, %v819_v12 }
  0x5b   : > { %v881_v20 = vadd.f32 %v1889_v11, %v880_v17 }
  0x5c   : > { %814 = vadd.xlane.f32.xlu0 %v813_v5  ;;  %v822_v16 = vsel %vm821_vm2, %v1887_v7, %v820_v14  ;;  %v1876_v7 = vld [vmem:[#allocation3] ss:$0 sm:$0xff]  ;;  %vm1241_vm2 = vcmask 261312  }
  0x5d   : > { %v2655_v23 = vsel %vm882_vm3, %v1889_v11, %v881_v20 }
  0xc7   : > { %v812_v18 = vpop.xlane.xlu0 %811 }
  0xc8   : > { %v823_v19 = vmul.f32 %v822_v16, %v812_v18  ;;  %v876_v24 = vpop.xlane.xlu1 %875  ;;  %v1878_v18 = vld [vmem:[#allocation7] ss:$0 sm:$0xff] }
  0xc9   : > { %v884_v28 = vmul.f32 %v2655_v23, %v876_v24  ;;  %v1879_v24 = vld [vmem:[#allocation11] ss:$0 sm:$0xff] }
  0xca   : > { %v825_v21 = vsub.f32 %v804_v0, %v823_v19  ;;  %v1875_v0 = vld [vmem:[%s2765_s4] ss:$0 sm:$0xff] }
  0xcb   : > { %v2659_v30 = vsub.f32 %v806_v1, %v884_v28 }
  0xcc   : > { %v827_v22 = vmul.f32 %v825_v21, %v825_v21 }
  0xcd   : > { %v886_v33 = vmul.f32 %v2659_v30, %v2659_v30 }
  0xce   : > { %v829_v25 = vsel %vm809_vm0, %v827_v22, 0.0 }
  0xcf   : > { %830 = vadd.xlane.f32.xlu1 %v829_v25  ;;  %v815_v26 = vpop.xlane.xlu0 %814  ;;  %v887_v34 = vsel %vm873_vm1, %v886_v33, 0.0 }
  0xd0   : > { %v824_v27 = vmul.f32 %v822_v16, %v815_v26 }
  0xd2   : > { %v826_v29 = vsub.f32 %v805_v4, %v824_v27 }
  0xd4   : > { %v828_v31 = vmul.f32 %v826_v29, %v826_v29 }
  0xd6   : > { %v832_v32 = vsel %vm809_vm0, %v828_v31, 0.0 }
  0xd7   : > { %833 = vadd.xlane.f32.xlu2 %v832_v32 }
  0xdf   : > { %888 = vadd.xlane.f32.xlu2 %v887_v34 }
 0x142   : > { %v831_v38 = vpop.xlane.xlu1 %830 }
 0x143   : > { %v835_v39 = vmul.f32 %v831_v38, %v822_v16 }
 0x145   : > { %v837_v41 = vadd.f32 1e-05, %v835_v39 }
 0x147   : > { %1890 = vrsqrt.f32 %v837_v41  ;;  %vm845_vm5 = vweird.f32 %v837_v41 }
 0x14a   : > { %v834_v43 = vpop.xlane.xlu2 %833 }
 0x14b   : > { %v836_v45 = vmul.f32 %v834_v43, %v822_v16 }
 0x14d   : > { %v1891_v46 = vpop.eup %1890  ;;  %v838_v47 = vadd.f32 1e-05, %v836_v45 }
 0x14e   : > { %v840_v48 = vmul.f32 %v1891_v46, %v837_v41  ;;  %vm846_vm4 = vweird.f32 %v1891_v46 }
 0x14f   : > { %1892 = vrsqrt.f32 %v838_v47  ;;  %vm847_vm6 = vmor %vm845_vm5, %vm846_vm4  ;;  %vm855_vm8 = vweird.f32 %v838_v47 }
 0x150   : > { %v841_v49 = vmul.f32 %v1891_v46, %v840_v48 }
 0x152   : > { %v842_v50 = vmul.f32 0.5, %v841_v49  ;;  %v889_v51 = vpop.xlane.xlu2 %888 }
 0x153   : > { %v890_v52 = vmul.f32 %v889_v51, %v2655_v23 }
 0x154   : > { %v843_v53 = vsub.f32 1.5, %v842_v50 }
 0x155   : > { %v1893_v54 = vpop.eup %1892  ;;  %v891_v55 = vadd.f32 1e-05, %v890_v52 }
 0x156   : > { %v844_v56 = vmul.f32 %v1891_v46, %v843_v53  ;;  %v850_v57 = vmul.f32 %v1893_v54, %v838_v47  ;;  %vm856_vm7 = vweird.f32 %v1893_v54 }
 0x157   : > { %1894 = vrsqrt.f32 %v891_v55  ;;  %vm857_vm9 = vmor %vm855_vm8, %vm856_vm7  ;;  %vm898_vm10 = vweird.f32 %v891_v55 }
 0x158   : > { %v851_v58 = vmul.f32 %v1893_v54, %v850_v57  ;;  %v848_v59 = vsel %vm847_vm6, %v1891_v46, %v844_v56 }
 0x159   : > { %v859_v63 = vmul.f32 %v848_v59, %v825_v21 }
 0x15a   : > { %v852_v60 = vmul.f32 0.5, %v851_v58 }
 0x15b   : > { %v864_v6 = vmul.f32 %v1875_v0, %v859_v63 }
 0x15c   : > { %v853_v61 = vsub.f32 1.5, %v852_v60 }
 0x15d   : > { %v1895_v62 = vpop.eup %1894  ;;  %v869_v11 = vadd.f32 %v1876_v7, %v864_v6 }
 0x15e   : > { %v854_v1 = vmul.f32 %v1893_v54, %v853_v61  ;;  %v893_v2 = vmul.f32 %v1895_v62, %v891_v55  ;;  %vm899_vm11 = vweird.f32 %v1895_v62 }
 0x15f   : > { %vm900_vm12 = vmor %vm898_vm10, %vm899_vm11 }
 0x160   : > { %v858_v3 = vsel %vm857_vm9, %v1893_v54, %v854_v1  ;;  %v894_v4 = vmul.f32 %v1895_v62, %v893_v2 }
 0x161   : > { %v860_v5 = vmul.f32 %v858_v3, %v826_v29  ;;  %v1880_v29 = vld [vmem:[#allocation10] ss:$0 sm:$0xff] }
 0x162   : > { %v895_v8 = vmul.f32 0.5, %v894_v4 }
 0x163   : > { %v865_v9 = vmul.f32 %v1875_v0, %v860_v5 }
 0x164   : > { %v896_v10 = vsub.f32 1.5, %v895_v8 }
 0x165   : > { %v870_v12 = vadd.f32 %v1876_v7, %v865_v9 }
 0x166   : > { %v897_v13 = vmul.f32 %v1895_v62, %v896_v10 }
 0x167   : > { %v948_v14 = vpack.c.bf16 %v870_v12, %v869_v11 }
 0x168   : > { %v901_v16 = vsel %vm900_vm12, %v1895_v62, %v897_v13 }
 0x169   : > { %1661 = vmatmul.msk.bf16.vlgmr.msra.gmra.mxu1 %vm809_vm0, %v948_v14  ;;  %v902_v17 = vmul.f32 %v901_v16, %v2659_v30  ;;  %vm1180_vm0 = vcmask 195712  }
 0x16b   : > { %v906_v19 = vmul.f32 %v1877_v15, %v902_v17 }
 0x16d   : > { %v910_v20 = vadd.f32 %v1878_v18, %v906_v19 }
 0x16f   : > { %v911_v21 = vpack.c.bf16 %v910_v20, %v910_v20 }
 0x171   : > { %1644 = vmatmul.msk.bf16.vlgmr.msra.gmra.mxu0 %vm873_vm1, %v911_v21 }
 0x1e6   : > { %v997_v22 = vpop.f32.mrf.mxu1 }
 0x1e7   : > { %v998_v27 = vadd.f32 %v1879_v24, %v997_v22 }
 0x1ee   : > { %v944_v25 = vpop.f32.mrf.mxu0  ;;  %v999_v26 = vpop.f32.mrf.mxu1 }
 0x1ef   : > { %v1000_v28 = vadd.f32 %v1879_v24, %v999_v26  ;;  %v945_v32 = vadd.f32 %v1880_v29, %v944_v25 }
 0x1f1   : > { %v2684_v31 = vpack.c.bf16 %v1000_v28, %v998_v27  ;;  %v1002_v34 = vpack.c.bf16 %v945_v32, %v945_v32 }
 0x1f3   : > { %1039 = vrot.lane.b32.xlu2 %v2684_v31, %s2394_s28  ;;  %v1009_v30 = vsel %vm1004_vm13, %v2684_v31, 0 }
 0x1f4   : > { %1018 = vmatpush.bf16.xpose.msra.mxu2 %v1009_v30 }
 0x1f6   : > { %v946_v33 = vpop.f32.mrf.mxu0 }
 0x1fb   : > { %1123 = vrot.lane.b32.xlu2 %v2684_v31, %s2395_s2  ;;  %1662 = vmatmul.msk.bf16.vlgmr.msra.gmra.mxu2 %vm1004_vm13, %v1002_v34 }
 0x203   : > { %1121 = vrot.lane.b32.xlu2 %v1002_v34, %s2395_s2 }
 0x24d   : > { %v1040_v35 = vpop.permute.xlu2 %1039 }
 0x24e   : > { %1052 = vmatpush.bf16.msra.mxu3 %v1040_v35 }
 0x255   : > { %v1124_v36 = vpop.permute.xlu2 %1123 }
 0x256   : > { %v1129_v37 = vsel %vm1004_vm13, %v1124_v36, 0 }
 0x257   : > { %1138 = vmatpush.bf16.xpose.msrb.mxu2 %v1129_v37 }
 0x25d   : > { %v1122_v38 = vpop.permute.xlu2 %1121 }
 0x25e   : > { %1666 = vmatmul.msk.bf16.vlgmr.msrb.gmra.mxu2 %vm1004_vm13, %v1122_v38 }
 0x27e   : > { %v1020_v39 = vpop.f32.mrf.mxu2 }
 0x27f   : > { %v1024_v40 = vmul.f32 0.35355338, %v1020_v39 }
 0x281   : > { %v1026_v41 = vsel %vm1025_vm14, %v1024_v40, -inf }
 0x282   : > { %1027 = vmax.xlane.f32.xlu0 %v1026_v41 }
 0x286   : > { %v1022_v42 = vpop.f32.mrf.mxu2 }
 0x296   : > { %1062 = vrot.lane.b32.xlu0 %v2684_v31, %s2396_s30 }
 0x29e   : > { %1184 = vrot.lane.b32.xlu0 %v2684_v31, %s2397_s27 }
 0x2e1   : > { %v1140_v43 = vpop.f32.mrf.mxu2 }
 0x2e2   : > { %v1144_v44 = vmul.f32 0.35355338, %v1140_v43 }
 0x2e4   : > { %v1145_v45 = vsel %vm1025_vm14, %v1144_v44, -inf }
 0x2e5   : > { %1146 = vmax.xlane.f32.xlu2 %v1145_v45 }
 0x2e9   : > { %v1142_v46 = vpop.f32.mrf.mxu2 }
 0x2f5   : > { %v1028_v47 = vpop.xlane.xlu0 %1027 }
 0x2f6   : > { %v1029_v48 = vsub.f32 %v1024_v40, %v1028_v47  ;;  %v1707_v47 = vld [vmem:[#allocation13 + $0x8] sm:$0xff] }
 0x2f7   : > { %1274 = vmatpush.bf16.msra.mxu2 %v1707_v47 }
 0x2f8   : > { %v1030_v49 = vmul.f32 1.442695, %v1029_v48  ;;  %v1706_v48 = vld [vmem:[#allocation13] sm:$0xff] }
 0x2fa   : > { %1896 = vpow2.f32 %v1030_v49 }
 0x2fb   : > { %1275 = vmatpush.bf16.msra.mxu2 %v1706_v48 }
 0x2fd   : > { %1096 = vrot.lane.b32.xlu2 %v2684_v31, %s2398_s25 }
 0x300   : > { %v1897_v50 = vpop.eup %1896 }
 0x301   : > { %v1032_v51 = vsel %vm1025_vm14, %v1897_v50, 0.0 }
 0x302   : > { %1033 = vadd.xlane.f32.xlu1 %v1032_v51 }
 0x308   : > { %v1063_v52 = vpop.permute.xlu0 %1062 }
 0x309   : > { %v1068_v53 = vsel %vm1004_vm13, %v1063_v52, 0  ;;  %v1881_v52 = vld [vmem:[#allocation14] ss:$0 sm:$0xff] }
 0x30a   : > { %1077 = vmatpush.bf16.xpose.msrb.mxu3 %v1068_v53 }
 0x310   : > { %v1185_v59 = vpop.permute.xlu0 %1184 }
 0x311   : > { %v1190_v61 = vsel %vm1004_vm13, %v1185_v59, 0 }
 0x31b   : > { %1060 = vrot.lane.b32.xlu1 %v1002_v34, %s2396_s30 }
 0x323   : > { %1182 = vrot.lane.b32.xlu1 %v1002_v34, %s2397_s27 }
 0x358   : > { %v1147_v54 = vpop.xlane.xlu2 %1146 }
 0x359   : > { %v1148_v6 = vsub.f32 %v1144_v44, %v1147_v54 }
 0x35b   : > { %v1149_v7 = vmul.f32 1.442695, %v1148_v6 }
 0x360   : > { %v1097_v55 = vpop.permute.xlu2 %1096 }
 0x361   : > { %1109 = vmatpush.bf16.msrb.mxu0 %v1097_v55 }
 0x375   : > { %v1034_v56 = vpop.xlane.xlu1 %1033 }
 0x376   : > { %1898 = vrcp.f32 %v1034_v56 }
 0x377   : > { %1900 = vpow2.f32 %v1149_v7 }
 0x37c   : > { %v1899_v57 = vpop.eup %1898 }
 0x37d   : > { %v1036_v58 = vmul.f32 %v1899_v57, %v1897_v50  ;;  %v1901_v11 = vpop.eup %1900 }
 0x37e   : > { %v1151_v13 = vsel %vm1025_vm14, %v1901_v11, 0.0 }
 0x37f   : > { %v1037_v60 = vpack.c.bf16 %v1036_v58, %v1036_v58 }
 0x381   : > { %1663 = vmatmul.msk.bf16.vlgmr.msra.gmra.mxu3 %vm1025_vm14, %v1037_v60 }
 0x382   : > { %1199 = vmatpush.bf16.xpose.msra.mxu3 %v1190_v61 }
 0x38d   : > { %v1061_v62 = vpop.permute.xlu1 %1060 }
 0x391   : > { %1664 = vmatmul.msk.bf16.vlgmr.msrb.gmra.mxu3 %vm1004_vm13, %v1061_v62  ;;  %v1709_v62 = vld [vmem:[#allocation19 + $0x8] sm:$0xff] }
 0x395   : > { %v1183_v63 = vpop.permute.xlu1 %1182 }
 0x3a1   : > { %1668 = vmatmul.msk.bf16.vlgmr.msra.gmra.mxu3 %vm1004_vm13, %v1183_v63  ;;  %v1708_v63 = vld [vmem:[#allocation19] sm:$0xff] }
 0x404   : > { %v1054_v0 = vpop.f32.mrf.mxu3 }
 0x405   : > { %1058 = vst.msk [vmem:[#allocation2] sm:$0xff] %vm1004_vm13, %v1054_v0 }
 0x40c   : > { %v1056_v1 = vpop.f32.mrf.mxu3 }
 0x414   : > { %v1079_v2 = vpop.f32.mrf.mxu3 }
 0x415   : > { %v1083_v3 = vmul.f32 0.35355338, %v1079_v2 }
 0x417   : > { %v1084_v4 = vsel %vm1025_vm14, %v1083_v3, -inf }
 0x418   : > { %1085 = vmax.xlane.f32.xlu0 %v1084_v4 }
 0x41c   : > { %v1081_v5 = vpop.f32.mrf.mxu3 }
 0x424   : > { %v1201_v8 = vpop.f32.mrf.mxu3 }
 0x425   : > { %v1205_v9 = vmul.f32 0.35355338, %v1201_v8 }
 0x427   : > { %v1206_v10 = vsel %vm1025_vm14, %v1205_v9, -inf }
 0x428   : > { %1207 = vmax.xlane.f32.xlu1 %v1206_v10 }
 0x42c   : > { %v1203_v12 = vpop.f32.mrf.mxu3 }
 0x42d   : > { %v1883_v12 = vld [vmem:[#allocation17] ss:$0 sm:$0xff] }
 0x430   : > { %1152 = vadd.xlane.f32.xlu1 %v1151_v13 }
 0x449   : > { %1157 = vrot.lane.b32.xlu1 %v2684_v31, %s2399_s6 }
 0x48b   : > { %v1086_v14 = vpop.xlane.xlu0 %1085 }
 0x48c   : > { %v1087_v15 = vsub.f32 %v1083_v3, %v1086_v14 }
 0x48e   : > { %v1088_v16 = vmul.f32 1.442695, %v1087_v15 }
 0x490   : > { %1902 = vpow2.f32 %v1088_v16  ;;  %v1710_v16 = vld [vmem:[#allocation22] sm:$0xff] }
 0x496   : > { %v1903_v17 = vpop.eup %1902 }
 0x497   : > { %v1090_v18 = vsel %vm1025_vm14, %v1903_v17, 0.0 }
 0x498   : > { %1091 = vadd.xlane.f32.xlu0 %v1090_v18 }
 0x49b   : > { %v1208_v19 = vpop.xlane.xlu1 %1207 }
 0x49c   : > { %v1209_v20 = vsub.f32 %v1205_v9, %v1208_v19  ;;  %v1882_v9 = vld [vmem:[#allocation16] ss:$0 sm:$0xff] }
 0x49e   : > { %v1210_v21 = vmul.f32 1.442695, %v1209_v20 }
 0x4a0   : > { %1904 = vpow2.f32 %v1210_v21 }
 0x4a3   : > { %v1153_v25 = vpop.xlane.xlu1 %1152 }
 0x4a4   : > { %1906 = vrcp.f32 %v1153_v25 }
 0x4a6   : > { %v1905_v22 = vpop.eup %1904 }
 0x4a7   : > { %v1212_v24 = vsel %vm1025_vm14, %v1905_v22, 0.0 }
 0x4a8   : > { %1213 = vadd.xlane.f32.xlu0 %v1212_v24 }
 0x4aa   : > { %v1907_v26 = vpop.eup %1906 }
 0x4ab   : > { %v1155_v27 = vmul.f32 %v1907_v26, %v1901_v11 }
 0x4ad   : > { %v1156_v29 = vpack.c.bf16 %v1155_v27, %v1155_v27 }
 0x4bb   : > { %v1158_v28 = vpop.permute.xlu1 %1157 }
 0x4bc   : > { %1218 = vrot.lane.b32.xlu0 %v2684_v31, %s2400_s29  ;;  %1170 = vmatpush.bf16.msrb.mxu1 %v1158_v28 }
 0x4bf   : > { %1667 = vmatmul.msk.bf16.vlgmr.msrb.gmra.mxu1 %vm1025_vm14, %v1156_v29 }
 0x4c0   : > { %1348 = vmatpush.bf16.msra.mxu1 %v1709_v62 }
 0x4c4   : > { %1349 = vmatpush.bf16.msra.mxu1 %v1708_v63 }
 0x50b   : > { %v1092_v30 = vpop.xlane.xlu0 %1091 }
 0x50c   : > { %1908 = vrcp.f32 %v1092_v30 }
 0x512   : > { %v1909_v32 = vpop.eup %1908 }
 0x513   : > { %v1094_v33 = vmul.f32 %v1909_v32, %v1903_v17  ;;  %v1884_v17 = vld [vmem:[#allocation20] ss:$0 sm:$0xff] }
 0x515   : > { %v1095_v34 = vpack.c.bf16 %v1094_v33, %v1094_v33  ;;  %v1885_v33 = vld [vmem:[#allocation23] ss:$0 sm:$0xff] }
 0x517   : > { %1665 = vmatmul.msk.bf16.vlgmr.msrb.gmra.mxu0 %vm1025_vm14, %v1095_v34 }
 0x51b   : > { %v1214_v35 = vpop.xlane.xlu0 %1213 }
 0x51c   : > { %1910 = vrcp.f32 %v1214_v35 }
 0x522   : > { %v1911_v36 = vpop.eup %1910 }
 0x523   : > { %v1216_v37 = vmul.f32 %v1911_v36, %v1905_v22 }
 0x525   : > { %v1217_v39 = vpack.c.bf16 %v1216_v37, %v1216_v37 }
 0x52e   : > { %v1219_v38 = vpop.permute.xlu0 %1218 }
 0x52f   : > { %1231 = vmatpush.bf16.msra.mxu0 %v1219_v38 }
 0x532   : > { %1669 = vmatmul.msk.bf16.vlgmr.msra.gmra.mxu0 %vm1025_vm14, %v1217_v39 }
 0x53c   : > { %v1172_v31 = vpop.f32.mrf.mxu1 }
 0x544   : > { %v1174_v40 = vpop.f32.mrf.mxu1 }
 0x594   : > { %v1111_v41 = vpop.f32.mrf.mxu0 }
 0x595   : > { %1116 = vrot.lane.b32.xlu2 %v1111_v41, %s2401_s22 }
 0x59c   : > { %v1113_v42 = vpop.f32.mrf.mxu0 }
 0x59d   : > { %1177 = vrot.lane.b32.xlu2 %v1172_v31, %s2402_s24 }
 0x5af   : > { %v1233_v43 = vpop.f32.mrf.mxu0 }
 0x5b0   : > { %1238 = vrot.lane.b32.xlu0 %v1233_v43, %s2403_s26 }
 0x5b7   : > { %v1235_v44 = vpop.f32.mrf.mxu0 }
 0x5ef   : > { %v1117_v45 = vpop.permute.xlu2 %1116 }
 0x5f0   : > { %1120 = vst.msk [vmem:[#allocation2] sm:$0xff] %vm1119_vm15, %v1117_v45 }
 0x5f7   : > { %v1178_v46 = vpop.permute.xlu2 %1177 }
 0x5f8   : > { %1181 = vst.msk [vmem:[#allocation2] sm:$0xff] %vm1180_vm0, %v1178_v46 }
 0x622   : > { %v1239_v49 = vpop.permute.xlu0 %1238 }
 0x623   : > { %1242 = vst.msk [vmem:[#allocation2] sm:$0xff] %vm1241_vm2, %v1239_v49 }
 0x62a   : > { %v1243_v50 = vld [vmem:[#allocation2] sm:$0xff] }
 0x62b   : > { %v1244_v51 = vpack.c.bf16 %v1243_v50, %v1243_v50 }
 0x62d   : > { %1678 = vmatmul.msk.bf16.vlgmr.msra.gmra.mxu2 %vm873_vm1, %v1244_v51 }
 0x6b0   : > { %v1277_v53 = vpop.f32.mrf.mxu2 }
 0x6b1   : > { %v1278_v54 = vadd.f32 %v1881_v52, %v1277_v53 }
 0x6b3   : > { %v1293_v55 = vsel %vm873_vm1, %v1278_v54, 0.0 }
 0x6b4   : > { %1294 = vadd.xlane.f32.xlu1 %v1293_v55 }
 0x6b8   : > { %v1279_v56 = vpop.f32.mrf.mxu2 }
 0x727   : > { %v1295_v57 = vpop.xlane.xlu1 %1294 }
 0x728   : > { %v1296_v58 = vmul.f32 %v1295_v57, %v2655_v23 }
 0x72a   : > { %v1297_v59 = vsub.f32 %v1278_v54, %v1296_v58 }
 0x72c   : > { %v1298_v60 = vmul.f32 %v1297_v59, %v1297_v59 }
 0x72e   : > { %v1299_v61 = vsel %vm873_vm1, %v1298_v60, 0.0 }
 0x72f   : > { %1300 = vadd.xlane.f32.xlu2 %v1299_v61 }
 0x7a2   : > { %v1301_v0 = vpop.xlane.xlu2 %1300 }
 0x7a3   : > { %v1302_v1 = vmul.f32 %v1301_v0, %v2655_v23  ;;  %v1711_v23 = vld [vmem:[#allocation22 + $0x8] sm:$0xff] }
 0x7a4   : > { %1389 = vmatpush.bf16.msrb.mxu3 %v1711_v23 }
 0x7a5   : > { %v1303_v2 = vadd.f32 1e-05, %v1302_v1 }
 0x7a7   : > { %1912 = vrsqrt.f32 %v1303_v2  ;;  %vm1310_vm4 = vweird.f32 %v1303_v2 }
 0x7a8   : > { %1390 = vmatpush.bf16.msrb.mxu3 %v1710_v16 }
 0x7ad   : > { %v1913_v3 = vpop.eup %1912 }
 0x7ae   : > { %v1305_v4 = vmul.f32 %v1913_v3, %v1303_v2  ;;  %vm1311_vm3 = vweird.f32 %v1913_v3 }
 0x7af   : > { %vm1312_vm5 = vmor %vm1310_vm4, %vm1311_vm3 }
 0x7b0   : > { %v1306_v5 = vmul.f32 %v1913_v3, %v1305_v4 }
 0x7b2   : > { %v1307_v6 = vmul.f32 0.5, %v1306_v5 }
 0x7b4   : > { %v1308_v7 = vsub.f32 1.5, %v1307_v6 }
 0x7b6   : > { %v1309_v8 = vmul.f32 %v1913_v3, %v1308_v7 }
 0x7b8   : > { %v1313_v10 = vsel %vm1312_vm5, %v1913_v3, %v1309_v8 }
 0x7b9   : > { %v1314_v11 = vmul.f32 %v1313_v10, %v1297_v59 }
 0x7bb   : > { %v1318_v13 = vmul.f32 %v1882_v9, %v1314_v11 }
 0x7bd   : > { %v1322_v14 = vadd.f32 %v1883_v12, %v1318_v13 }
 0x7bf   : > { %v1323_v15 = vpack.c.bf16 %v1322_v14, %v1322_v14 }
 0x7c1   : > { %1687 = vmatmul.msk.bf16.vlgmr.msra.gmra.mxu1 %vm873_vm1, %v1323_v15 }
 0x83e   : > { %v1351_v18 = vpop.f32.mrf.mxu1 }
 0x83f   : > { %v1352_v19 = vadd.f32 %v1884_v17, %v1351_v18 }
 0x841   : > { %v1356_v20 = vmul.f32 0.044715, %v1352_v19  ;;  %v1355_v28 = vmul.f32 0.5, %v1352_v19 }
 0x843   : > { %v1357_v21 = vmul.f32 %v1356_v20, %v1352_v19 }
 0x845   : > { %v1358_v22 = vmul.f32 %v1357_v21, %v1352_v19 }
 0x846   : > { %v1353_v24 = vpop.f32.mrf.mxu1 }
 0x847   : > { %v1359_v25 = vadd.f32 %v1358_v22, %v1352_v19 }
 0x849   : > { %v1360_v26 = vmul.f32 0.7978846, %v1359_v25 }
 0x84b   : > { %1914 = vtanh.f32 %v1360_v26 }
 0x851   : > { %v1915_v27 = vpop.eup %1914 }
 0x852   : > { %v1362_v29 = vadd.f32 1.0, %v1915_v27 }
 0x854   : > { %v1363_v30 = vmul.f32 %v1362_v29, %v1355_v28 }
 0x856   : > { %v1364_v32 = vpack.c.bf16 %v1363_v30, %v1363_v30 }
 0x858   : > { %1696 = vmatmul.msk.bf16.vlgmr.msrb.gmra.mxu3 %vm873_vm1, %v1364_v32 }
 0x8db   : > { %v1392_v34 = vpop.f32.mrf.mxu3 }
 0x8dc   : > { %v1393_v35 = vadd.f32 %v1885_v33, %v1392_v34 }
 0x8de   : > { %v1396_v36 = vadd.f32 %v1393_v35, %v1278_v54 }
 0x8e0   : > { %1397 = vst.msk [vmem:[%s802_s19] sm:$0xff] %vm873_vm1, %v1396_v36 }
 0x8e3   : > { %v1394_v37 = vpop.f32.mrf.mxu3 }
 0x8e4 PF: > { %s2766_s1 = sld [smem:[#allocation33_spill]] }
 0x8ea   : > { %s36_s27 = sadd.s32 1, %s2766_s1  }
 0x8eb   : > { %p33_p7 = scmp.ge.s32.totalorder %s36_s27, 4  }
 0x8ed   :  { %35 = sbr.rel (!%p33_p7) target bundleno = 15 (0xf), region = 182 }
 0x8f2   :  { %1417 = vsyncpa [#allocation4], 1 }
 0x8f3   :  { %1419 = vsyncpa [#allocation4 + $0x1], 1 }
 0x8f4   :  { %1420 = vsyncpa [#allocation6], 1 }
 0x8f5   :  { %1421 = vsyncpa [#allocation9], 1 }
 0x8f6   :  { %1422 = vsyncpa [#allocation12], 1 }
 0x8f7   :  { %1423 = vsyncpa [#allocation15], 1 }
 0x8f8   :  { %1424 = vsyncpa [#allocation18], 1 }
 0x8f9   :  { %1425 = vsyncpa [#allocation21], 1 }
 0x8fa   :  { %1426 = vsyncpa [#allocation24], 1 }

// kernel: _lambda_.4
= control target key start
LH: loop header
LB: loop body
LE: loop exit
PB: predicated region body
PF: predicated region fallthrough
CT: control target
= control target key end

     0   :  { %s2785_s0 = inlined_call_operand.vmem [shape: f32[2,8,32], index: 0, kind: input, shape index: {}]   ;;  %s2786_s1 = inlined_call_operand.vmem [shape: f32[2,16,64], index: 1, kind: input, shape index: {}]   ;;  %s2787_s2 = inlined_call_operand.hbm [shape: f32[1,32], index: 2, kind: input, shape index: {}]   ;;  %s2788_s3 = inlined_call_operand.hbm [shape: f32[1,32], index: 3, kind: input, shape index: {}]   ;;  %s2789_s4 = inlined_call_operand.hbm [shape: f32[1,64], index: 4, kind: input, shape index: {}]   ;;  %s2790_s5 = inlined_call_operand.hbm [shape: f32[1,64], index: 5, kind: input, shape index: {}]   ;;  %s2791_s6 = inlined_call_operand.vmem [shape: bf16[64,32], index: 6, kind: input, shape index: {}]   ;;  %s2792_s7 = inlined_call_operand.hbm [shape: f32[1,32], index: 7, kind: input, shape index: {}]   ;;  %s2793_s8 = inlined_call_operand.vmem [shape: bf16[32,96], index: 8, kind: input, shape index: {}]   ;;  %s2794_s9 = inlined_call_operand.hbm [shape: f32[1,96], index: 9, kind: input, shape index: {}]   ;;  %s2795_s10 = inlined_call_operand.vmem [shape: bf16[64,64], index: 10, kind: input, shape index: {}]   ;;  %s2796_s11 = inlined_call_operand.hbm [shape: f32[1,64], index: 11, kind: input, shape index: {}]   ;;  %s2797_s12 = inlined_call_operand.hbm [shape: f32[1,64], index: 12, kind: input, shape index: {}]   ;;  %s2798_s13 = inlined_call_operand.hbm [shape: f32[1,64], index: 13, kind: input, shape index: {}]   ;;  %s2799_s14 = inlined_call_operand.vmem [shape: bf16[64,64], index: 14, kind: input, shape index: {}]   ;;  %s2800_s15 = inlined_call_operand.hbm [shape: f32[1,64], index: 15, kind: input, shape index: {}]   ;;  %s2801_s16 = inlined_call_operand.vmem [shape: bf16[64,64], index: 16, kind: input, shape index: {}]   ;;  %s2802_s17 = inlined_call_operand.hbm [shape: f32[1,64], index: 17, kind: input, shape index: {}]   ;;  %s2803_s18 = inlined_call_operand.vmem [shape: f32[2,16,64], index: 18, kind: output, shape index: {}]  }
   0x1   :  { %2804 = sst [smem:[#allocation26_spill]] %s2785_s0 }
   0x2   :  { %2805 = sst [smem:[#allocation27_spill]] %s2786_s1 }
   0x3   :  { %2806 = sst [smem:[#allocation28_spill]] %s2787_s2 }
   0x4   :  { %2807 = sst [smem:[#allocation29_spill]] %s2788_s3 }
   0x5   :  { %2808 = sst [smem:[#allocation30_spill]] %s2790_s5 }
   0x6   :  { %2809 = sst [smem:[#allocation31_spill]] %s2794_s9 }
   0x7   :  { %23 = vsyncpa [#allocation4], 0 }
   0x8   :  { %24 = vsyncpa [#allocation6], 0 }
   0x9   :  { %25 = vsyncpa [#allocation9], 0 }
   0xa   :  { %26 = vsyncpa [#allocation12], 0 }
   0xb   :  { %27 = vsyncpa [#allocation15], 0 }
   0xc   :  { %28 = vsyncpa [#allocation18], 0  ;;  %s2501_s27 = smov 0  }
   0xd LB: > { %s2810_s3 = sld [smem:[#allocation29_spill]]  ;;  %s2510_s0 = sadd.s32 4294967295, %s2382_s27   ;;  %s2382_s27 = sphi %s2501_s27, %s34_s27  }
   0xe   : > { %p1694_p0 = scmp.ge.s32.totalorder %s2382_s27, 1  ;;  %p453_p1 = scmp.lt.s32.totalorder %s2382_s27, 3 }
   0xf   : > { %p1909_p2 = scmp.eq.s32.totalorder %s2510_s0, 0  ;;  %s2384_s1 = smov [#allocation5]  }
  0x10   : > { %p2515_p3 = pnand %p1694_p0, %p453_p1  ;;  %s479_s20 = sshll.u32 %s2384_s1, 4  ;;  %s480_s20 = int_to_ptr.vmem [resolvable:$true] %s479_s20 }
  0x11   : > { %s2812_s5 = sld [smem:[#allocation30_spill]]  ;;  %s2385_s28 = smov [#allocation8]  }
  0x12   : > { %p1875_p4 = pneg %p2515_p3  ;;  %s2813_s9 = sld [smem:[#allocation31_spill]] }
  0x13   : > { %s477_s30 = sshll.u32 %s2810_s3, 4  ;;  %s503_s29 = sshll.u32 %s2385_s28, 4  ;;  %s478_s30 = int_to_ptr.hbm [resolvable:$true] %s477_s30  ;;  %s504_s29 = int_to_ptr.vmem [resolvable:$true] %s503_s29 }
  0x14   : > { %p2529_p5 = pnand %p1909_p2, %p1875_p4  ;;  %s2386_s1 = smov [#allocation11]  }
  0x15   : > { %s533_s21 = sshll.u32 %s2386_s1, 4  ;;  %s558_s24 = sshll.u32 %s2797_s12, 4  ;;  %s534_s21 = int_to_ptr.vmem [resolvable:$true] %s533_s21  ;;  %s559_s24 = int_to_ptr.hbm [resolvable:$true] %s558_s24 }
  0x16   : > { %1881 = dma.hbm_to_vmem [thread:$0]  (!%p2529_p5), %s478_s30, 16, %s480_s20, [#allocation6]  }
  0x17   : > { %s501_s2 = sshll.u32 %s2812_s5, 4  ;;  %s585_s5 = sshll.u32 %s2800_s15, 4  ;;  %s502_s2 = int_to_ptr.hbm [resolvable:$true] %s501_s2  ;;  %s586_s5 = int_to_ptr.hbm [resolvable:$true] %s585_s5 }
  0x18   : > { %s531_s25 = sshll.u32 %s2813_s9, 4  ;;  %s2387_s9 = smov [#allocation14]   ;;  %s532_s25 = int_to_ptr.hbm [resolvable:$true] %s531_s25 }
  0x19   : > { %1887 = dma.hbm_to_vmem [thread:$0]  (!%p2529_p5), %s502_s2, 16, %s504_s29, [#allocation9]  }
  0x1a   : > { %1893 = dma.hbm_to_vmem [thread:$0]  (!%p2529_p5), %s532_s25, 16, %s534_s21, [#allocation12]  }
  0x1b   : > { %s560_s30 = sshll.u32 %s2387_s9, 4  ;;  %s2388_s20 = smov [#allocation17]   ;;  %s561_s30 = int_to_ptr.vmem [resolvable:$true] %s560_s30 }
  0x1c   : > { %1899 = dma.hbm_to_vmem [thread:$0]  (!%p2529_p5), %s559_s24, 16, %s561_s30, [#allocation15]  }
  0x1d   : > { %s587_s2 = sshll.u32 %s2388_s20, 4  ;;  %s2815_s22 = sld [smem:[#allocation28_spill]]  ;;  %s588_s2 = int_to_ptr.vmem [resolvable:$true] %s587_s2 }
  0x1e   : > { %1905 = dma.hbm_to_vmem [thread:$0]  (!%p2529_p5), %s586_s5, 16, %s588_s2, [#allocation18]  }
  0x1f   : > { %s489_s21 = sshll.u32 %s2789_s4, 4  ;;  %s2389_s9 = smov [#allocation3]   ;;  %s490_s21 = int_to_ptr.hbm [resolvable:$true] %s489_s21 }
  0x20   : > { %s467_s28 = sshll.u32 %s2389_s9, 4  ;;  %s2390_s24 = smov [#allocation7]   ;;  %s468_s28 = int_to_ptr.vmem [resolvable:$true] %s467_s28 }
  0x21   : > { %s491_s30 = sshll.u32 %s2390_s24, 4  ;;  %s516_s1 = sshll.u32 %s2792_s7, 4  ;;  %s492_s30 = int_to_ptr.vmem [resolvable:$true] %s491_s30  ;;  %s517_s1 = int_to_ptr.hbm [resolvable:$true] %s516_s1 }
  0x22   : > { %1884 = dma.hbm_to_vmem [thread:$0]  (!%p2529_p5), %s490_s21, 16, %s492_s30, [#allocation6]  }
  0x23   : > { %s465_s23 = sshll.u32 %s2815_s22, 4  ;;  %s546_s22 = sshll.u32 %s2796_s11, 4  ;;  %s466_s23 = int_to_ptr.hbm [resolvable:$true] %s465_s23  ;;  %s547_s22 = int_to_ptr.hbm [resolvable:$true] %s546_s22 }
  0x24   : > { %1878 = dma.hbm_to_vmem [thread:$0]  (!%p2529_p5), %s466_s23, 16, %s468_s28, [#allocation4]  }
  0x25   : > { %s2391_s3 = smov [#allocation10]   ;;  %s2392_s23 = smov [#allocation13]  }
  0x26   : > { %s518_s25 = sshll.u32 %s2391_s3, 4  ;;  %s548_s9 = sshll.u32 %s2392_s23, 4  ;;  %s519_s25 = int_to_ptr.vmem [resolvable:$true] %s518_s25  ;;  %s549_s9 = int_to_ptr.vmem [resolvable:$true] %s548_s9 }
  0x27   : > { %1890 = dma.hbm_to_vmem [thread:$0]  (!%p2529_p5), %s517_s1, 16, %s519_s25, [#allocation9]  }
  0x28   : > { %s570_s20 = sshll.u32 %s2798_s13, 4  ;;  %s600_s29 = sshll.u32 %s2802_s17, 4  ;;  %s571_s20 = int_to_ptr.hbm [resolvable:$true] %s570_s20  ;;  %s601_s29 = int_to_ptr.hbm [resolvable:$true] %s600_s29 }
  0x29   : > { %1896 = dma.hbm_to_vmem [thread:$0]  (!%p2529_p5), %s547_s22, 16, %s549_s9, [#allocation12]  }
  0x2a   : > { %s2393_s5 = smov [#allocation16]   ;;  %s2394_s1 = smov [#allocation19]  }
  0x2b   : > { %s572_s2 = sshll.u32 %s2393_s5, 4  ;;  %s602_s3 = sshll.u32 %s2394_s1, 4  ;;  %s573_s2 = int_to_ptr.vmem [resolvable:$true] %s572_s2  ;;  %s603_s3 = int_to_ptr.vmem [resolvable:$true] %s602_s3 }
  0x2c   : > { %1902 = dma.hbm_to_vmem [thread:$0]  (!%p2529_p5), %s571_s20, 16, %s573_s2, [#allocation15]  }
  0x2d   : > { %1908 = dma.hbm_to_vmem [thread:$0]  (!%p2529_p5), %s601_s29, 16, %s603_s3, [#allocation18]  }
  0x2e   : > { %630 = sbr.rel (%p2515_p3) target bundleno = 2309 (0x905), region = 92 }
  0x33   : > { %2357 = dma.done.wait (%p1909_p2), [#allocation4], 16  }
  0x34   : > { %2359 = vsyncadd (%p1909_p2), [#allocation4], 4294967280 }
  0x35   : > { %2361 = dma.done.wait (%p1909_p2), [#allocation6], 32  }
  0x36   : > { %2363 = vsyncadd (%p1909_p2), [#allocation6], 4294967264 }
  0x37   : > { %2365 = dma.done.wait (%p1909_p2), [#allocation9], 32  }
  0x38   : > { %2367 = vsyncadd (%p1909_p2), [#allocation9], 4294967264 }
  0x39   : > { %2369 = dma.done.wait (%p1909_p2), [#allocation12], 32  }
  0x3a   : > { %2371 = vsyncadd (%p1909_p2), [#allocation12], 4294967264 }
  0x3b   : > { %2373 = dma.done.wait (%p1909_p2), [#allocation15], 32  }
  0x3c   : > { %2375 = vsyncadd (%p1909_p2), [#allocation15], 4294967264 }
  0x3d   : > { %2377 = dma.done.wait (%p1909_p2), [#allocation18], 32  }
  0x3e   : > { %2379 = vsyncadd (%p1909_p2), [#allocation18], 4294967264  ;;  %p739_p6 = scmp.lt.s32.totalorder %s2510_s0, 1  ;;  %s2816_s23 = sld [smem:[#allocation26_spill]]  ;;  %vm759_vm0 = vcmask 261120   ;;  %vm799_vm1 = vcmask 523264  }
  0x3f   : > { %s2817_s20 = sld [smem:[#allocation27_spill]]  ;;  %v2395_v6 = vmov 32.0   ;;  %v2396_v8 = vmov 64.0   ;;  %v1818_v35 = vld [vmem:[%s2793_s8 + $0x8] sm:$0xff]  ;;  %v1817_v36 = vld [vmem:[%s2793_s8] sm:$0xff]  ;;  %v1816_v37 = vld [vmem:[%s2791_s6 + $0x18] sm:$0xff] }
  0x40   : > { %s2819_s0 = smov (!%p739_p6, %s2510_s0), 1  ;;  %1972 = vrcp.f32 %v2395_v6  ;;  %945 = vmatpush.bf16.msra.mxu1 %v1818_v35  ;;  %905 = vmatpush.bf16.msra.mxu0 %v1816_v37  ;;  %v1815_v40 = vld [vmem:[%s2791_s6 + $0x10] sm:$0xff]  ;;  %v1814_v42 = vld [vmem:[%s2791_s6 + $0x8] sm:$0xff]  ;;  %v1813_v44 = vld [vmem:[%s2791_s6] sm:$0xff]  ;;  %vm954_vm13 = vcmask 64512   ;;  %s2397_s24 = smov 120  }
  0x41   : > { %s1719_s19 = sshll.u32 %s2819_s0, 3  ;;  %s1811_s26 = sshll.u32 %s2819_s0, 4  ;;  %1974 = vrcp.f32 %v2396_v8  ;;  %v1961_v58 = vld [vmem:[#allocation3] ss:$0 sm:$0xff]  ;;  %v1962_v62 = vld [vmem:[#allocation5] ss:$0 sm:$0xff] }
  0x42   : > { %vm1006_vm14 = vcmask 1043456   ;;  %s2400_s30 = smov 112   ;;  %vm1024_vm15 = vcmask 130048   ;;  %s2401_s29 = smov 80  }
  0x43   : > { %s2402_s5 = smov 64   ;;  %s2403_s2 = smov 48  }
  0x44   : > { %s742_s9 = scalar_lea.vmem %s2816_s23, %s1719_s19  ;;  %946 = vmatpush.bf16.msra.mxu1 %v1817_v36  ;;  %906 = vmatpush.bf16.msra.mxu0 %v1815_v40  ;;  %s2404_s1 = smov 32  }
  0x45   : > { %s747_s21 = scalar_lea.vmem %s2817_s20, %s1811_s26  ;;  %v754_v0 = vld [vmem:[%s742_s9] sm:$0xff]  ;;  %s2398_s20 = smov 96  }
  0x46   : > { %v2619_v1 = vld [vmem:[%s747_s21 + $0x8] sm:$0xff]  ;;  %v760_v2 = vsel %vm759_vm0, %v754_v0, 0.0  ;;  %v2624_v4 = vld [vmem:[%s747_s21] sm:$0xff]  ;;  %v1973_v7 = vpop.eup %1972  ;;  %s2399_s21 = smov 104   ;;  %s2405_s3 = smov 16  }
  0x47   : > { %v803_v3 = vsel %vm799_vm1, %v2619_v1, 0.0  ;;  %761 = vadd.xlane.f32.xlu0 %v760_v2  ;;  %v800_v5 = vsel %vm799_vm1, %v2624_v4, 0.0  ;;  %v764_v9 = vmul.f32 32.0, %v1973_v7  ;;  %v1975_v11 = vpop.eup %1974  ;;  %vm768_vm2 = vweird.f32 %v1973_v7 }
  0x48   : > { %804 = vadd.xlane.f32.xlu1 %v803_v3  ;;  %v807_v13 = vmul.f32 64.0, %v1975_v11  ;;  %vm811_vm3 = vweird.f32 %v1975_v11  ;;  %907 = vmatpush.bf16.msra.mxu0 %v1814_v42 }
  0x49   : > { %v765_v10 = vsub.f32 1.0, %v764_v9 }
  0x4a   : > { %v808_v15 = vsub.f32 1.0, %v807_v13 }
  0x4b   : > { %v766_v12 = vmul.f32 %v1973_v7, %v765_v10 }
  0x4c   : > { %v809_v17 = vmul.f32 %v1975_v11, %v808_v15  ;;  %908 = vmatpush.bf16.msra.mxu0 %v1813_v44 }
  0x4d   : > { %v767_v14 = vadd.f32 %v1973_v7, %v766_v12 }
  0x4e   : > { %v810_v20 = vadd.f32 %v1975_v11, %v809_v17 }
  0x4f   : > { %801 = vadd.xlane.f32.xlu0 %v800_v5  ;;  %v769_v16 = vsel %vm768_vm2, %v1973_v7, %v767_v14  ;;  %v1963_v14 = vld [vmem:[#allocation7] ss:$0 sm:$0xff]  ;;  %vm1189_vm2 = vcmask 392448  }
  0x50   : > { %v2628_v23 = vsel %vm811_vm3, %v1975_v11, %v810_v20  ;;  %vm1271_vm3 = vcmask 523648  }
  0xba   : > { %v762_v18 = vpop.xlane.xlu0 %761 }
  0xbb   : > { %v770_v19 = vmul.f32 %v769_v16, %v762_v18  ;;  %v805_v24 = vpop.xlane.xlu1 %804 }
  0xbc   : > { %v814_v28 = vmul.f32 %v2628_v23, %v805_v24 }
  0xbd   : > { %v771_v21 = vsub.f32 %v754_v0, %v770_v19  ;;  %v1964_v19 = vld [vmem:[#allocation8] ss:$0 sm:$0xff] }
  0xbe   : > { %v2637_v30 = vsub.f32 %v2619_v1, %v814_v28 }
  0xbf   : > { %v772_v22 = vmul.f32 %v771_v21, %v771_v21 }
  0xc0   : > { %v818_v33 = vmul.f32 %v2637_v30, %v2637_v30 }
  0xc1   : > { %v773_v25 = vsel %vm759_vm0, %v772_v22, 0.0 }
  0xc2   : > { %774 = vadd.xlane.f32.xlu1 %v773_v25  ;;  %v802_v26 = vpop.xlane.xlu0 %801  ;;  %v822_v34 = vsel %vm799_vm1, %v818_v33, 0.0  ;;  %v1965_v25 = vld [vmem:[#allocation11] ss:$0 sm:$0xff] }
  0xc3   : > { %v813_v27 = vmul.f32 %v2628_v23, %v802_v26 }
  0xc5   : > { %v2634_v29 = vsub.f32 %v2624_v4, %v813_v27 }
  0xc7   : > { %v817_v31 = vmul.f32 %v2634_v29, %v2634_v29 }
  0xc9   : > { %v819_v32 = vsel %vm799_vm1, %v817_v31, 0.0 }
  0xca   : > { %820 = vadd.xlane.f32.xlu2 %v819_v32  ;;  %v1966_v32 = vld [vmem:[#allocation10] ss:$0 sm:$0xff] }
  0xd2   : > { %823 = vadd.xlane.f32.xlu2 %v822_v34 }
 0x135   : > { %v775_v38 = vpop.xlane.xlu1 %774 }
 0x136   : > { %v776_v39 = vmul.f32 %v775_v38, %v769_v16 }
 0x138   : > { %v777_v41 = vadd.f32 1e-05, %v776_v39 }
 0x13a   : > { %1976 = vrsqrt.f32 %v777_v41  ;;  %vm784_vm5 = vweird.f32 %v777_v41 }
 0x13d   : > { %v821_v43 = vpop.xlane.xlu2 %820 }
 0x13e   : > { %v825_v45 = vmul.f32 %v821_v43, %v2628_v23 }
 0x140   : > { %v1977_v46 = vpop.eup %1976  ;;  %v827_v47 = vadd.f32 1e-05, %v825_v45 }
 0x141   : > { %v779_v48 = vmul.f32 %v1977_v46, %v777_v41  ;;  %vm785_vm4 = vweird.f32 %v1977_v46 }
 0x142   : > { %1978 = vrsqrt.f32 %v827_v47  ;;  %vm786_vm6 = vmor %vm784_vm5, %vm785_vm4  ;;  %vm835_vm8 = vweird.f32 %v827_v47 }
 0x143   : > { %v780_v49 = vmul.f32 %v1977_v46, %v779_v48 }
 0x145   : > { %v781_v50 = vmul.f32 0.5, %v780_v49  ;;  %v824_v51 = vpop.xlane.xlu2 %823 }
 0x146   : > { %v826_v52 = vmul.f32 %v824_v51, %v2628_v23 }
 0x147   : > { %v782_v53 = vsub.f32 1.5, %v781_v50 }
 0x148   : > { %v1979_v54 = vpop.eup %1978  ;;  %v828_v55 = vadd.f32 1e-05, %v826_v52 }
 0x149   : > { %v783_v56 = vmul.f32 %v1977_v46, %v782_v53  ;;  %v830_v57 = vmul.f32 %v1979_v54, %v827_v47  ;;  %vm836_vm7 = vweird.f32 %v1979_v54 }
 0x14a   : > { %1980 = vrsqrt.f32 %v828_v55  ;;  %vm837_vm9 = vmor %vm835_vm8, %vm836_vm7  ;;  %vm845_vm11 = vweird.f32 %v828_v55 }
 0x14b   : > { %v787_v59 = vsel %vm786_vm6, %v1977_v46, %v783_v56  ;;  %v831_v60 = vmul.f32 %v1979_v54, %v830_v57 }
 0x14c   : > { %v788_v61 = vmul.f32 %v787_v59, %v771_v21 }
 0x14d   : > { %v832_v63 = vmul.f32 0.5, %v831_v60 }
 0x14e   : > { %v792_v0 = vmul.f32 %v1961_v58, %v788_v61 }
 0x14f   : > { %v833_v2 = vsub.f32 1.5, %v832_v63 }
 0x150   : > { %v1981_v3 = vpop.eup %1980  ;;  %v796_v5 = vadd.f32 %v1962_v62, %v792_v0 }
 0x151   : > { %v834_v6 = vmul.f32 %v1979_v54, %v833_v2  ;;  %v840_v7 = vmul.f32 %v1981_v3, %v828_v55  ;;  %vm846_vm10 = vweird.f32 %v1981_v3 }
 0x152   : > { %v915_v8 = vpack.c.bf16 %v796_v5, %v796_v5  ;;  %vm847_vm12 = vmor %vm845_vm11, %vm846_vm10 }
 0x153   : > { %v841_v9 = vmul.f32 %v1981_v3, %v840_v7  ;;  %v838_v10 = vsel %vm837_vm9, %v1979_v54, %v834_v6 }
 0x154   : > { %1749 = vmatmul.msk.bf16.vlgmr.msra.gmra.mxu1 %vm759_vm0, %v915_v8  ;;  %v849_v13 = vmul.f32 %v838_v10, %v2634_v29  ;;  %vm1107_vm0 = vcmask 261248  }
 0x155   : > { %v842_v11 = vmul.f32 0.5, %v841_v9 }
 0x156   : > { %v854_v18 = vmul.f32 %v1963_v14, %v849_v13 }
 0x157   : > { %v843_v12 = vsub.f32 1.5, %v842_v11 }
 0x158   : > { %v859_v21 = vadd.f32 %v1964_v19, %v854_v18 }
 0x159   : > { %v844_v15 = vmul.f32 %v1981_v3, %v843_v12 }
 0x15b   : > { %v848_v16 = vsel %vm847_vm12, %v1981_v3, %v844_v15 }
 0x15c   : > { %v850_v17 = vmul.f32 %v848_v16, %v2637_v30 }
 0x15e   : > { %v855_v20 = vmul.f32 %v1963_v14, %v850_v17 }
 0x160   : > { %v860_v22 = vadd.f32 %v1964_v19, %v855_v20 }
 0x162   : > { %v861_v24 = vpack.c.bf16 %v860_v22, %v859_v21 }
 0x164   : > { %1740 = vmatmul.msk.bf16.vlgmr.msra.gmra.mxu0 %vm799_vm1, %v861_v24 }
 0x1d1   : > { %v948_v26 = vpop.f32.mrf.mxu1 }
 0x1d2   : > { %v949_v27 = vadd.f32 %v1965_v25, %v948_v26 }
 0x1d4   : > { %v2669_v28 = vpack.c.bf16 %v949_v27, %v949_v27 }
 0x1d6   : > { %1030 = vrot.lane.b32.xlu2 %v2669_v28, %s2397_s24  ;;  %v959_v29 = vsel %vm954_vm13, %v2669_v28, 0 }
 0x1d7   : > { %968 = vmatpush.bf16.xpose.msra.mxu2 %v959_v29 }
 0x1d9   : > { %v950_v30 = vpop.f32.mrf.mxu1 }
 0x1e1   : > { %v910_v31 = vpop.f32.mrf.mxu0 }
 0x1e2   : > { %v911_v34 = vadd.f32 %v1966_v32, %v910_v31 }
 0x1e9   : > { %v912_v33 = vpop.f32.mrf.mxu0 }
 0x1ea   : > { %v913_v35 = vadd.f32 %v1966_v32, %v912_v33 }
 0x1ec   : > { %v952_v36 = vpack.c.bf16 %v913_v35, %v911_v34 }
 0x1ee   : > { %1750 = vmatmul.msk.bf16.vlgmr.msra.gmra.mxu2 %vm954_vm13, %v952_v36 }
 0x230   : > { %v1031_v53 = vpop.permute.xlu2 %1030 }
 0x231   : > { %v1036_v56 = vsel %vm954_vm13, %v1031_v53, 0 }
 0x271   : > { %v970_v37 = vpop.f32.mrf.mxu2 }
 0x272   : > { %v975_v38 = vmul.f32 0.35355338, %v970_v37 }
 0x274   : > { %v977_v39 = vsel %vm954_vm13, %v975_v38, -inf }
 0x275   : > { %978 = vmax.xlane.f32.xlu0 %v977_v39 }
 0x279   : > { %v972_v40 = vpop.f32.mrf.mxu2 }
 0x27a   : > { %v976_v41 = vmul.f32 0.35355338, %v972_v40 }
 0x27c   : > { %v980_v42 = vsel %vm954_vm13, %v976_v41, -inf }
 0x27d   : > { %981 = vmax.xlane.f32.xlu1 %v980_v42 }
 0x296   : > { %1001 = vrot.lane.b32.xlu1 %v2669_v28, %s2398_s20 }
 0x29e   : > { %1194 = vrot.lane.b32.xlu1 %v2669_v28, %s2399_s21 }
 0x2e8   : > { %v979_v43 = vpop.xlane.xlu0 %978 }
 0x2e9   : > { %v983_v44 = vsub.f32 %v975_v38, %v979_v43 }
 0x2eb   : > { %v985_v45 = vmul.f32 1.442695, %v983_v44 }
 0x2ed   : > { %1982 = vpow2.f32 %v985_v45 }
 0x2f0   : > { %v982_v46 = vpop.xlane.xlu1 %981 }
 0x2f1   : > { %v984_v47 = vsub.f32 %v976_v41, %v982_v46 }
 0x2f3   : > { %v1983_v48 = vpop.eup %1982  ;;  %v987_v49 = vmul.f32 1.442695, %v984_v47 }
 0x2f4   : > { %v989_v50 = vsel %vm954_vm13, %v1983_v48, 0.0 }
 0x2f5   : > { %1984 = vpow2.f32 %v987_v49  ;;  %990 = vadd.xlane.f32.xlu2 %v989_v50 }
 0x2fb   : > { %v1985_v51 = vpop.eup %1984 }
 0x2fc   : > { %v992_v52 = vsel %vm954_vm13, %v1985_v51, 0.0 }
 0x2fd   : > { %993 = vadd.xlane.f32.xlu0 %v992_v52 }
 0x308   : > { %v1002_v54 = vpop.permute.xlu1 %1001 }
 0x309   : > { %v1008_v55 = vsel %vm1006_vm14, %v1002_v54, 0 }
 0x30a   : > { %1017 = vmatpush.bf16.msra.mxu3 %v1008_v55 }
 0x30d   : > { %1112 = vrot.lane.b32.xlu2 %v2669_v28, %s2400_s30 }
 0x30e   : > { %1045 = vmatpush.bf16.xpose.msrb.mxu3 %v1036_v56 }
 0x310   : > { %v1195_v2 = vpop.permute.xlu1 %1194 }
 0x311   : > { %1028 = vrot.lane.b32.xlu0 %v952_v36, %s2397_s24  ;;  %v1200_v5 = vsel %vm954_vm13, %v1195_v2, 0 }
 0x315   : > { %1192 = vrot.lane.b32.xlu2 %v952_v36, %s2399_s21 }
 0x319   : > { %1110 = vrot.lane.b32.xlu0 %v952_v36, %s2400_s30 }
 0x368   : > { %v991_v57 = vpop.xlane.xlu2 %990 }
 0x369   : > { %1986 = vrcp.f32 %v991_v57 }
 0x36f   : > { %v1987_v61 = vpop.eup %1986 }
 0x370   : > { %v994_v58 = vpop.xlane.xlu0 %993  ;;  %v1113_v59 = vpop.permute.xlu2 %1112  ;;  %v997_v63 = vmul.f32 %v1987_v61, %v1983_v48 }
 0x371   : > { %1988 = vrcp.f32 %v994_v58  ;;  %v1118_v60 = vsel %vm954_vm13, %v1113_v59, 0 }
 0x372   : > { %1127 = vmatpush.bf16.xpose.msrb.mxu2 %v1118_v60 }
 0x377   : > { %v1989_v62 = vpop.eup %1988 }
 0x378   : > { %v998_v0 = vmul.f32 %v1989_v62, %v1985_v51  ;;  %v1193_v8 = vpop.permute.xlu2 %1192 }
 0x37a   : > { %v999_v3 = vpack.c.bf16 %v998_v0, %v997_v63 }
 0x37c   : > { %1751 = vmatmul.msk.bf16.vlgmr.msra.gmra.mxu3 %vm954_vm13, %v999_v3 }
 0x37d   : > { %1209 = vmatpush.bf16.xpose.msra.mxu3 %v1200_v5 }
 0x383   : > { %v1029_v6 = vpop.permute.xlu0 %1028 }
 0x38b   : > { %v1111_v7 = vpop.permute.xlu0 %1110 }
 0x38c   : > { %1752 = vmatmul.msk.bf16.vlgmr.msrb.gmra.mxu3 %vm954_vm13, %v1029_v6  ;;  %1754 = vmatmul.msk.bf16.vlgmr.msrb.gmra.mxu2 %vm954_vm13, %v1111_v7 }
 0x39c   : > { %1756 = vmatmul.msk.bf16.vlgmr.msra.gmra.mxu3 %vm954_vm13, %v1193_v8 }
 0x3ff   : > { %v1019_v9 = vpop.f32.mrf.mxu3 }
 0x400   : > { %1025 = vst.msk [vmem:[#allocation2] sm:$0xff] %vm1024_vm15, %v1019_v9 }
 0x407   : > { %v1021_v10 = vpop.f32.mrf.mxu3 }
 0x408   : > { %1026 = vst.msk [vmem:[#allocation2 + $0x8] sm:$0xff] %vm1024_vm15, %v1021_v10 }
 0x40f   : > { %v1047_v11 = vpop.f32.mrf.mxu3  ;;  %v1129_v12 = vpop.f32.mrf.mxu2 }
 0x410   : > { %v1052_v13 = vmul.f32 0.35355338, %v1047_v11  ;;  %v1134_v14 = vmul.f32 0.35355338, %v1129_v12 }
 0x412   : > { %v1054_v15 = vsel %vm954_vm13, %v1052_v13, -inf  ;;  %v1136_v16 = vsel %vm954_vm13, %v1134_v14, -inf }
 0x413   : > { %1055 = vmax.xlane.f32.xlu1 %v1054_v15  ;;  %1137 = vmax.xlane.f32.xlu2 %v1136_v16 }
 0x417   : > { %v1049_v17 = vpop.f32.mrf.mxu3  ;;  %v1131_v18 = vpop.f32.mrf.mxu2 }
 0x418   : > { %v1053_v19 = vmul.f32 0.35355338, %v1049_v17  ;;  %v1135_v20 = vmul.f32 0.35355338, %v1131_v18 }
 0x41a   : > { %v1057_v21 = vsel %vm954_vm13, %v1053_v19, -inf  ;;  %v1139_v22 = vsel %vm954_vm13, %v1135_v20, -inf }
 0x41b   : > { %1058 = vmax.xlane.f32.xlu0 %v1057_v21  ;;  %1140 = vmax.xlane.f32.xlu1 %v1139_v22 }
 0x41f   : > { %v1211_v24 = vpop.f32.mrf.mxu3 }
 0x420   : > { %v1216_v25 = vmul.f32 0.35355338, %v1211_v24 }
 0x422   : > { %v1218_v26 = vsel %vm954_vm13, %v1216_v25, -inf }
 0x423   : > { %1219 = vmax.xlane.f32.xlu0 %v1218_v26 }
 0x427   : > { %v1213_v27 = vpop.f32.mrf.mxu3 }
 0x428   : > { %v1217_v29 = vmul.f32 0.35355338, %v1213_v27 }
 0x42a   : > { %v1221_v30 = vsel %vm954_vm13, %v1217_v29, -inf }
 0x42b   : > { %1222 = vmax.xlane.f32.xlu2 %v1221_v30 }
 0x443   : > { %1077 = vrot.lane.b32.xlu2 %v2669_v28, %s2401_s29 }
 0x486   : > { %v1056_v31 = vpop.xlane.xlu1 %1055  ;;  %v1138_v32 = vpop.xlane.xlu2 %1137 }
 0x487   : > { %v1142_v33 = vsub.f32 %v1134_v14, %v1138_v32  ;;  %v1060_v35 = vsub.f32 %v1052_v13, %v1056_v31 }
 0x489   : > { %v1144_v34 = vmul.f32 1.442695, %v1142_v33  ;;  %v1062_v36 = vmul.f32 1.442695, %v1060_v35  ;;  %v1822_v33 = vld [vmem:[%s2795_s10 + $0x18] sm:$0xff]  ;;  %v1821_v35 = vld [vmem:[%s2795_s10 + $0x10] sm:$0xff] }
 0x48a   : > { %1320 = vmatpush.bf16.msra.mxu2 %v1822_v33 }
 0x48b   : > { %1990 = vpow2.f32 %v1144_v34 }
 0x48c   : > { %1992 = vpow2.f32 %v1062_v36  ;;  %v1820_v36 = vld [vmem:[%s2795_s10 + $0x8] sm:$0xff] }
 0x48e   : > { %v1059_v37 = vpop.xlane.xlu0 %1058  ;;  %v1141_v38 = vpop.xlane.xlu1 %1140  ;;  %1321 = vmatpush.bf16.msra.mxu2 %v1821_v35  ;;  %v1829_v35 = vld [vmem:[%s2801_s16 + $0x10] sm:$0xff] }
 0x48f   : > { %v1143_v39 = vsub.f32 %v1135_v20, %v1141_v38  ;;  %v1061_v42 = vsub.f32 %v1053_v19, %v1059_v37  ;;  %v1819_v37 = vld [vmem:[%s2795_s10] sm:$0xff] }
 0x491   : > { %v1146_v40 = vmul.f32 1.442695, %v1143_v39  ;;  %v1991_v41 = vpop.eup %1990  ;;  %v1064_v44 = vmul.f32 1.442695, %v1061_v42 }
 0x492   : > { %v1148_v43 = vsel %vm954_vm13, %v1991_v41, 0.0  ;;  %v1993_v47 = vpop.eup %1992  ;;  %1322 = vmatpush.bf16.msra.mxu2 %v1820_v36  ;;  %v1828_v36 = vld [vmem:[%s2801_s16 + $0x8] sm:$0xff] }
 0x493   : > { %1994 = vpow2.f32 %v1146_v40  ;;  %1149 = vadd.xlane.f32.xlu1 %v1148_v43  ;;  %v1066_v51 = vsel %vm954_vm13, %v1993_v47, 0.0 }
 0x494   : > { %1996 = vpow2.f32 %v1064_v44 }
 0x496   : > { %v1220_v45 = vpop.xlane.xlu0 %1219  ;;  %1323 = vmatpush.bf16.msra.mxu2 %v1819_v37  ;;  %v1827_v37 = vld [vmem:[%s2801_s16] sm:$0xff] }
 0x497   : > { %v1224_v46 = vsub.f32 %v1216_v25, %v1220_v45 }
 0x499   : > { %v1226_v48 = vmul.f32 1.442695, %v1224_v46  ;;  %v1995_v49 = vpop.eup %1994  ;;  %v1967_v46 = vld [vmem:[#allocation13] ss:$0 sm:$0xff] }
 0x49a   : > { %v1151_v50 = vsel %vm954_vm13, %v1995_v49, 0.0  ;;  %v1997_v54 = vpop.eup %1996 }
 0x49b   : > { %1998 = vpow2.f32 %v1226_v48  ;;  %1152 = vadd.xlane.f32.xlu0 %v1151_v50  ;;  %1067 = vadd.xlane.f32.xlu1 %v1066_v51  ;;  %v1069_v58 = vsel %vm954_vm13, %v1997_v54, 0.0 }
 0x49e   : > { %v1223_v52 = vpop.xlane.xlu2 %1222 }
 0x49f   : > { %v1225_v53 = vsub.f32 %v1217_v29, %v1223_v52 }
 0x4a1   : > { %v1999_v55 = vpop.eup %1998  ;;  %v1228_v56 = vmul.f32 1.442695, %v1225_v53 }
 0x4a2   : > { %v1230_v57 = vsel %vm954_vm13, %v1999_v55, 0.0 }
 0x4a3   : > { %2000 = vpow2.f32 %v1228_v56  ;;  %1070 = vadd.xlane.f32.xlu0 %v1069_v58  ;;  %1231 = vadd.xlane.f32.xlu1 %v1230_v57 }
 0x4a6   : > { %v1078_v59 = vpop.permute.xlu2 %1077 }
 0x4a7   : > { %v1083_v60 = vsel %vm1006_vm14, %v1078_v59, 0 }
 0x4a8   : > { %1092 = vmatpush.bf16.msrb.mxu1 %v1083_v60 }
 0x4a9   : > { %v2001_v61 = vpop.eup %2000 }
 0x4aa   : > { %v1233_v62 = vsel %vm954_vm13, %v2001_v61, 0.0 }
 0x4ab   : > { %1234 = vadd.xlane.f32.xlu0 %v1233_v62 }
 0x4bc   : > { %1159 = vrot.lane.b32.xlu1 %v2669_v28, %s2402_s5  ;;  %s752_s5 = scalar_lea.vmem %s2803_s18, %s1811_s26 }
 0x4bf   : > { %1241 = vrot.lane.b32.xlu0 %v2669_v28, %s2403_s2 }
 0x506   : > { %v1150_v63 = vpop.xlane.xlu1 %1149 }
 0x50e   : > { %v1153_v0 = vpop.xlane.xlu0 %1152  ;;  %v1068_v2 = vpop.xlane.xlu1 %1067 }
 0x50f   : > { %2002 = vrcp.f32 %v1068_v2  ;;  %v1824_v2 = vld [vmem:[%s2799_s14 + $0x8] sm:$0xff] }
 0x515   : > { %v2003_v5 = vpop.eup %2002 }
 0x516   : > { %v1071_v3 = vpop.xlane.xlu0 %1070  ;;  %v1074_v7 = vmul.f32 %v2003_v5, %v1993_v47  ;;  %v1232_v11 = vpop.xlane.xlu1 %1231 }
 0x517   : > { %2004 = vrcp.f32 %v1071_v3 }
 0x518   : > { %2006 = vrcp.f32 %v1153_v0  ;;  %v1825_v0 = vld [vmem:[%s2799_s14 + $0x10] sm:$0xff] }
 0x519   : > { %2008 = vrcp.f32 %v1150_v63  ;;  %v1826_v63 = vld [vmem:[%s2799_s14 + $0x18] sm:$0xff] }
 0x51d   : > { %v2005_v6 = vpop.eup %2004 }
 0x51e   : > { %v1075_v8 = vmul.f32 %v2005_v6, %v1997_v54  ;;  %v1235_v10 = vpop.xlane.xlu0 %1234  ;;  %v2007_v28 = vpop.eup %2006 }
 0x51f   : > { %2010 = vrcp.f32 %v1235_v10  ;;  %v2009_v12 = vpop.eup %2008  ;;  %v1157_v14 = vmul.f32 %v2007_v28, %v1995_v49 }
 0x520   : > { %v1076_v9 = vpack.c.bf16 %v1075_v8, %v1074_v7  ;;  %2012 = vrcp.f32 %v1232_v11  ;;  %v1156_v17 = vmul.f32 %v2009_v12, %v1991_v41  ;;  %v1823_v7 = vld [vmem:[%s2799_s14] sm:$0xff] }
 0x522   : > { %1753 = vmatmul.msk.bf16.vlgmr.msrb.gmra.mxu1 %vm954_vm13, %v1076_v9  ;;  %v1158_v21 = vpack.c.bf16 %v1157_v14, %v1156_v17 }
 0x525   : > { %v2011_v13 = vpop.eup %2010 }
 0x526   : > { %v2013_v16 = vpop.eup %2012  ;;  %v1239_v19 = vmul.f32 %v2011_v13, %v2001_v61 }
 0x527   : > { %v1238_v22 = vmul.f32 %v2013_v16, %v1999_v55 }
 0x529   : > { %v1240_v25 = vpack.c.bf16 %v1239_v19, %v1238_v22  ;;  %v1968_v22 = vld [vmem:[#allocation14] ss:$0 sm:$0xff] }
 0x52e   : > { %v1160_v15 = vpop.permute.xlu1 %1159 }
 0x52f   : > { %v1165_v18 = vsel %vm1006_vm14, %v1160_v15, 0 }
 0x530   : > { %1174 = vmatpush.bf16.msrb.mxu0 %v1165_v18 }
 0x531   : > { %v1242_v20 = vpop.permute.xlu0 %1241 }
 0x532   : > { %v1247_v24 = vsel %vm1006_vm14, %v1242_v20, 0 }
 0x533   : > { %1755 = vmatmul.msk.bf16.vlgmr.msrb.gmra.mxu0 %vm954_vm13, %v1158_v21  ;;  %1256 = vmatpush.bf16.msra.mxu1 %v1247_v24 }
 0x534   : > { %1441 = vmatpush.bf16.msra.mxu0 %v1826_v63 }
 0x536   : > { %1757 = vmatmul.msk.bf16.vlgmr.msra.gmra.mxu1 %vm954_vm13, %v1240_v25 }
 0x538   : > { %1442 = vmatpush.bf16.msra.mxu0 %v1825_v0 }
 0x53c   : > { %1443 = vmatpush.bf16.msra.mxu0 %v1824_v2 }
 0x540   : > { %1444 = vmatpush.bf16.msra.mxu0 %v1823_v7 }
 0x59f   : > { %v1094_v26 = vpop.f32.mrf.mxu1 }
 0x5a7   : > { %v1096_v27 = vpop.f32.mrf.mxu1 }
 0x5b0   : > { %v1176_v29 = vpop.f32.mrf.mxu0 }
 0x5b1   : > { %1183 = vrot.lane.b32.xlu2 %v1176_v29, %s2404_s1 }
 0x5b3   : > { %v1258_v30 = vpop.f32.mrf.mxu1 }
 0x5b4   : > { %1265 = vrot.lane.b32.xlu1 %v1258_v30, %s2403_s2 }
 0x5b8   : > { %v1178_v31 = vpop.f32.mrf.mxu0 }
 0x5b9   : > { %1185 = vrot.lane.b32.xlu0 %v1178_v31, %s2404_s1  ;;  %1101 = vrot.lane.b32.xlu2 %v1094_v26, %s2405_s3  ;;  %v1969_v26 = vld [vmem:[#allocation16] ss:$0 sm:$0xff] }
 0x5bb   : > { %v1260_v32 = vpop.f32.mrf.mxu1 }
 0x5c1   : > { %1103 = vrot.lane.b32.xlu2 %v1096_v27, %s2405_s3 }
 0x5c9   : > { %1267 = vrot.lane.b32.xlu2 %v1260_v32, %s2403_s2 }
 0x60b   : > { %v1184_v34 = vpop.permute.xlu2 %1183 }
 0x613   : > { %v1102_v38 = vpop.permute.xlu2 %1101 }
 0x614   : > { %1108 = vst.msk [vmem:[#allocation2] sm:$0xff] %vm1107_vm0, %v1102_v38  ;;  %v1970_v38 = vld [vmem:[#allocation17] ss:$0 sm:$0xff] }
 0x615   : > { %1190 = vst.msk [vmem:[#allocation2] sm:$0xff] %vm1189_vm2, %v1184_v34  ;;  %v1830_v34 = vld [vmem:[%s2801_s16 + $0x18] sm:$0xff] }
 0x616   : > { %1504 = vmatpush.bf16.msrb.mxu3 %v1830_v34 }
 0x61a   : > { %1505 = vmatpush.bf16.msrb.mxu3 %v1829_v35 }
 0x61b   : > { %v1104_v39 = vpop.permute.xlu2 %1103 }
 0x61c   : > { %1109 = vst.msk [vmem:[#allocation2 + $0x8] sm:$0xff] %vm1107_vm0, %v1104_v39 }
 0x61e   : > { %1506 = vmatpush.bf16.msrb.mxu3 %v1828_v36 }
 0x622   : > { %1507 = vmatpush.bf16.msrb.mxu3 %v1827_v37 }
 0x623   : > { %v1268_v42 = vpop.permute.xlu2 %1267 }
 0x626   : > { %v1266_v40 = vpop.permute.xlu1 %1265 }
 0x627   : > { %1272 = vst.msk [vmem:[#allocation2] sm:$0xff] %vm1271_vm3, %v1266_v40 }
 0x62b   : > { %v1186_v41 = vpop.permute.xlu0 %1185 }
 0x62c   : > { %1191 = vst.msk [vmem:[#allocation2 + $0x8] sm:$0xff] %vm1189_vm2, %v1186_v41 }
 0x62d   : > { %1273 = vst.msk [vmem:[#allocation2 + $0x8] sm:$0xff] %vm1271_vm3, %v1268_v42 }
 0x62e   : > { %v1274_v43 = vld [vmem:[#allocation2] sm:$0xff] }
 0x634   : > { %v1275_v44 = vld [vmem:[#allocation2 + $0x8] sm:$0xff] }
 0x635   : > { %v1276_v45 = vpack.c.bf16 %v1275_v44, %v1274_v43 }
 0x637   : > { %1774 = vmatmul.msk.bf16.vlgmr.msra.gmra.mxu2 %vm799_vm1, %v1276_v45 }
 0x6ba   : > { %v1325_v47 = vpop.f32.mrf.mxu2 }
 0x6bb   : > { %v1326_v48 = vadd.f32 %v1967_v46, %v1325_v47 }
 0x6bd   : > { %v2730_v49 = vadd.f32 %v1326_v48, %v2624_v4 }
 0x6bf   : > { %v1352_v50 = vsel %vm799_vm1, %v2730_v49, 0.0 }
 0x6c0   : > { %1353 = vadd.xlane.f32.xlu0 %v1352_v50 }
 0x6c2   : > { %v1327_v51 = vpop.f32.mrf.mxu2 }
 0x6c3   : > { %v1328_v52 = vadd.f32 %v1967_v46, %v1327_v51 }
 0x6c5   : > { %v2735_v53 = vadd.f32 %v1328_v52, %v2619_v1 }
 0x6c7   : > { %v1355_v54 = vsel %vm799_vm1, %v2735_v53, 0.0 }
 0x6c8   : > { %1356 = vadd.xlane.f32.xlu1 %v1355_v54 }
 0x733   : > { %v1354_v55 = vpop.xlane.xlu0 %1353 }
 0x734   : > { %v1358_v56 = vmul.f32 %v1354_v55, %v2628_v23 }
 0x736   : > { %v1360_v57 = vsub.f32 %v2730_v49, %v1358_v56 }
 0x738   : > { %v1362_v4 = vmul.f32 %v1360_v57, %v1360_v57 }
 0x73a   : > { %v1364_v58 = vsel %vm799_vm1, %v1362_v4, 0.0 }
 0x73b   : > { %v1357_v59 = vpop.xlane.xlu1 %1356  ;;  %1365 = vadd.xlane.f32.xlu2 %v1364_v58 }
 0x73c   : > { %v1359_v60 = vmul.f32 %v1357_v59, %v2628_v23 }
 0x73e   : > { %v1361_v61 = vsub.f32 %v2735_v53, %v1359_v60 }
 0x740   : > { %v1363_v1 = vmul.f32 %v1361_v61, %v1361_v61 }
 0x742   : > { %v1367_v62 = vsel %vm799_vm1, %v1363_v1, 0.0 }
 0x743   : > { %1368 = vadd.xlane.f32.xlu0 %v1367_v62  ;;  %v1971_v62 = vld [vmem:[#allocation19] ss:$0 sm:$0xff] }
 0x7ae   : > { %v1366_v3 = vpop.xlane.xlu2 %1365 }
 0x7af   : > { %v1370_v5 = vmul.f32 %v1366_v3, %v2628_v23 }
 0x7b1   : > { %v1372_v6 = vadd.f32 1e-05, %v1370_v5 }
 0x7b3   : > { %2014 = vrsqrt.f32 %v1372_v6  ;;  %vm1380_vm5 = vweird.f32 %v1372_v6 }
 0x7b6   : > { %v1369_v8 = vpop.xlane.xlu0 %1368 }
 0x7b7   : > { %v1371_v9 = vmul.f32 %v1369_v8, %v2628_v23 }
 0x7b9   : > { %v2015_v10 = vpop.eup %2014  ;;  %v1373_v11 = vadd.f32 1e-05, %v1371_v9 }
 0x7ba   : > { %v1375_v28 = vmul.f32 %v2015_v10, %v1372_v6  ;;  %vm1381_vm4 = vweird.f32 %v2015_v10 }
 0x7bb   : > { %2016 = vrsqrt.f32 %v1373_v11  ;;  %vm1382_vm6 = vmor %vm1380_vm5, %vm1381_vm4  ;;  %vm1390_vm8 = vweird.f32 %v1373_v11 }
 0x7bc   : > { %v1376_v12 = vmul.f32 %v2015_v10, %v1375_v28 }
 0x7be   : > { %v1377_v13 = vmul.f32 0.5, %v1376_v12 }
 0x7c0   : > { %v1378_v14 = vsub.f32 1.5, %v1377_v13 }
 0x7c1   : > { %v2017_v15 = vpop.eup %2016 }
 0x7c2   : > { %v1379_v16 = vmul.f32 %v2015_v10, %v1378_v14  ;;  %v1385_v17 = vmul.f32 %v2017_v15, %v1373_v11  ;;  %vm1391_vm7 = vweird.f32 %v2017_v15 }
 0x7c3   : > { %vm1392_vm9 = vmor %vm1390_vm8, %vm1391_vm7 }
 0x7c4   : > { %v1386_v18 = vmul.f32 %v2017_v15, %v1385_v17  ;;  %v1383_v19 = vsel %vm1382_vm6, %v2015_v10, %v1379_v16 }
 0x7c5   : > { %v1394_v23 = vmul.f32 %v1383_v19, %v1360_v57 }
 0x7c6   : > { %v1387_v20 = vmul.f32 0.5, %v1386_v18 }
 0x7c7   : > { %v1399_v27 = vmul.f32 %v1968_v22, %v1394_v23 }
 0x7c8   : > { %v1388_v21 = vsub.f32 1.5, %v1387_v20 }
 0x7c9   : > { %v1404_v31 = vadd.f32 %v1969_v26, %v1399_v27 }
 0x7ca   : > { %v1389_v24 = vmul.f32 %v2017_v15, %v1388_v21 }
 0x7cc   : > { %v1393_v25 = vsel %vm1392_vm9, %v2017_v15, %v1389_v24 }
 0x7cd   : > { %v1395_v29 = vmul.f32 %v1393_v25, %v1361_v61 }
 0x7cf   : > { %v1400_v30 = vmul.f32 %v1968_v22, %v1395_v29 }
 0x7d1   : > { %v1405_v32 = vadd.f32 %v1969_v26, %v1400_v30 }
 0x7d3   : > { %v1406_v33 = vpack.c.bf16 %v1405_v32, %v1404_v31 }
 0x7d5   : > { %1791 = vmatmul.msk.bf16.vlgmr.msra.gmra.mxu0 %vm799_vm1, %v1406_v33 }
 0x852   : > { %v1446_v39 = vpop.f32.mrf.mxu0 }
 0x853   : > { %v1447_v40 = vadd.f32 %v1970_v38, %v1446_v39 }
 0x855   : > { %v1453_v41 = vmul.f32 0.044715, %v1447_v40  ;;  %v1451_v4 = vmul.f32 0.5, %v1447_v40 }
 0x857   : > { %v1455_v42 = vmul.f32 %v1453_v41, %v1447_v40 }
 0x859   : > { %v1457_v43 = vmul.f32 %v1455_v42, %v1447_v40 }
 0x85a   : > { %v1448_v44 = vpop.f32.mrf.mxu0 }
 0x85b   : > { %v1459_v45 = vadd.f32 %v1457_v43, %v1447_v40  ;;  %v1449_v46 = vadd.f32 %v1970_v38, %v1448_v44 }
 0x85d   : > { %v1454_v47 = vmul.f32 0.044715, %v1449_v46  ;;  %v1461_v48 = vmul.f32 0.7978846, %v1459_v45  ;;  %v1452_v58 = vmul.f32 0.5, %v1449_v46 }
 0x85f   : > { %v1456_v50 = vmul.f32 %v1454_v47, %v1449_v46  ;;  %2018 = vtanh.f32 %v1461_v48 }
 0x861   : > { %v1458_v51 = vmul.f32 %v1456_v50, %v1449_v46 }
 0x863   : > { %v1460_v52 = vadd.f32 %v1458_v51, %v1449_v46 }
 0x865   : > { %v1462_v54 = vmul.f32 0.7978846, %v1460_v52  ;;  %v2019_v55 = vpop.eup %2018 }
 0x866   : > { %v1465_v56 = vadd.f32 1.0, %v2019_v55 }
 0x867   : > { %2020 = vtanh.f32 %v1462_v54 }
 0x868   : > { %v1467_v60 = vmul.f32 %v1465_v56, %v1451_v4 }
 0x86d   : > { %v2021_v57 = vpop.eup %2020 }
 0x86e   : > { %v1466_v59 = vadd.f32 1.0, %v2021_v57 }
 0x870   : > { %v1468_v61 = vmul.f32 %v1466_v59, %v1452_v58 }
 0x872   : > { %v1469_v1 = vpack.c.bf16 %v1468_v61, %v1467_v60 }
 0x874   : > { %1808 = vmatmul.msk.bf16.vlgmr.msrb.gmra.mxu3 %vm799_vm1, %v1469_v1 }
 0x8f7   : > { %v1509_v63 = vpop.f32.mrf.mxu3 }
 0x8f8   : > { %v1510_v0 = vadd.f32 %v1971_v62, %v1509_v63 }
 0x8fa   : > { %v1514_v2 = vadd.f32 %v1510_v0, %v2730_v49 }
 0x8fc   : > { %1516 = vst.msk [vmem:[%s752_s5] sm:$0xff] %vm799_vm1, %v1514_v2 }
 0x8ff   : > { %v1511_v3 = vpop.f32.mrf.mxu3 }
 0x900   : > { %v1512_v5 = vadd.f32 %v1971_v62, %v1511_v3 }
 0x902   : > { %v1515_v6 = vadd.f32 %v1512_v5, %v2735_v53 }
 0x904   : > { %1517 = vst.msk [vmem:[%s752_s5 + $0x8] sm:$0xff] %vm799_vm1, %v1515_v6 }
 0x905 PF: > { %s34_s27 = sadd.s32 1, %s2382_s27  }
 0x906   : > { %p31_p7 = scmp.ge.s32.totalorder %s34_s27, 4  }
 0x908   :  { %33 = sbr.rel (!%p31_p7) target bundleno = 13 (0xd), region = 170 }
 0x90d   :  { %1539 = vsyncpa [#allocation4], 1 }
 0x90e   :  { %1541 = vsyncpa [#allocation4 + $0x1], 1 }
 0x90f   :  { %1542 = vsyncpa [#allocation6], 1 }
 0x910   :  { %1543 = vsyncpa [#allocation9], 1 }
 0x911   :  { %1544 = vsyncpa [#allocation12], 1 }
 0x912   :  { %1545 = vsyncpa [#allocation15], 1 }
 0x913   :  { %1546 = vsyncpa [#allocation18], 1 }

// kernel: _lambda_.5
= control target key start
LH: loop header
LB: loop body
LE: loop exit
PB: predicated region body
PF: predicated region fallthrough
CT: control target
= control target key end

     0   :  { %18 = vsyncpa [#allocation4], 0  ;;  %s2865_s0 = inlined_call_operand.vmem [shape: f32[2,16,64], index: 0, kind: input, shape index: {}]   ;;  %s2866_s1 = inlined_call_operand.vmem [shape: f32[2,1,64], index: 1, kind: input, shape index: {}]   ;;  %s2867_s2 = inlined_call_operand.vmem [shape: f32[2,1,64], index: 2, kind: input, shape index: {}]   ;;  %s2868_s3 = inlined_call_operand.vmem [shape: bf16[2,64,128], index: 3, kind: input, shape index: {}]   ;;  %s2869_s4 = inlined_call_operand.vmem [shape: f32[2,1,128], index: 4, kind: input, shape index: {}]   ;;  %s2870_s5 = inlined_call_operand.vmem [shape: bf16[2,64,64], index: 5, kind: input, shape index: {}]   ;;  %s2871_s6 = inlined_call_operand.vmem [shape: f32[2,1,64], index: 6, kind: input, shape index: {}]   ;;  %s2872_s7 = inlined_call_operand.vmem [shape: f32[2,1,64], index: 7, kind: input, shape index: {}]   ;;  %s2873_s8 = inlined_call_operand.vmem [shape: f32[2,1,64], index: 8, kind: input, shape index: {}]   ;;  %s2874_s9 = inlined_call_operand.vmem [shape: bf16[2,64,64], index: 9, kind: input, shape index: {}]   ;;  %s2875_s10 = inlined_call_operand.hbm [shape: f32[2,1,64], index: 10, kind: input, shape index: {}]   ;;  %s2876_s11 = inlined_call_operand.vmem [shape: bf16[2,64,64], index: 11, kind: input, shape index: {}]   ;;  %s2877_s12 = inlined_call_operand.hbm [shape: f32[2,1,64], index: 12, kind: input, shape index: {}]   ;;  %s2878_s13 = inlined_call_operand.vmem [shape: f32[2,16,64], index: 13, kind: output, shape index: {}]  }
   0x1   :  { %19 = vsyncpa [#allocation6], 0  ;;  %s2456_s25 = smov 0  }
   0x2 LB: > { %s372_s28 = sshll.u32 %s2875_s10, 4  ;;  %s1906_s29 = sadd.s32 4294967295, %s2368_s25   ;;  %s2368_s25 = sphi %s2456_s25, %s25_s25   ;;  %s373_s28 = int_to_ptr.hbm [resolvable:$true] %s372_s28 }
   0x3   : > { %p1908_p0 = scmp.ge.s32.totalorder %s2368_s25, 1  ;;  %p334_p1 = scmp.lt.s32.totalorder %s2368_s25, 3 }
   0x4   : > { %p2160_p2 = scmp.eq.s32.totalorder %s1906_s29, 0  ;;  %s2370_s14 = smov [#allocation3]  }
   0x5   : > { %p2467_p3 = pnand %p1908_p0, %p334_p1  ;;  %s374_s15 = sshll.u32 %s2370_s14, 4  ;;  %s375_s15 = int_to_ptr.vmem [resolvable:$true] %s374_s15 }
   0x6   : > { %s389_s18 = sshll.u32 %s2877_s12, 4  ;;  %s2371_s19 = smov [#allocation5]   ;;  %s390_s18 = int_to_ptr.hbm [resolvable:$true] %s389_s18 }
   0x7   : > { %p2153_p4 = pneg %p2467_p3  ;;  %s391_s20 = sshll.u32 %s2371_s19, 4  ;;  %s392_s20 = int_to_ptr.vmem [resolvable:$true] %s391_s20 }
   0x8   : > { %s2372_s21 = smov 16   ;;  %s2373_s22 = smov 1  }
   0x9   : > { %p2154_p5 = pnand %p2160_p2, %p2153_p4  ;;  %415 = sbr.rel (%p2467_p3) target bundleno = 3907 (0xf43), region = 72 }
   0xb   : > { %2156 = dma.hbm_to_vmem [thread:$0]  (!%p2154_p5), %s373_s28, 32, %s375_s15, [#allocation4], %s2372_s21, %s2372_s21, %s2373_s22  }
   0xc   : > { %2159 = dma.hbm_to_vmem [thread:$0]  (!%p2154_p5), %s390_s18, 32, %s392_s20, [#allocation6], %s2372_s21, %s2372_s21, %s2373_s22  }
   0xe   : > { %2359 = dma.done.wait (%p2160_p2), [#allocation4], 32  }
   0xf   : > { %2361 = vsyncadd (%p2160_p2), [#allocation4], 4294967264 }
  0x10   : > { %2363 = dma.done.wait (%p2160_p2), [#allocation6], 32  }
  0x11   : > { %2365 = vsyncadd (%p2160_p2), [#allocation6], 4294967264  ;;  %p465_p6 = scmp.lt.s32.totalorder %s1906_s29, 1  ;;  %vm480_vm0 = vcmask 523264   ;;  %v2374_v4 = vmov 64.0   ;;  %v2116_v21 = vld [vmem:[%s2868_s3 + $0x18] sm:$0xff] }
  0x12   : > { %2204 = vrcp.f32 %v2374_v4  ;;  %586 = vmatpush.bf16.msra.mxu0 %v2116_v21  ;;  %v2115_v22 = vld [vmem:[%s2868_s3 + $0x10] sm:$0xff]  ;;  %v2114_v23 = vld [vmem:[%s2868_s3 + $0x8] sm:$0xff]  ;;  %v2113_v25 = vld [vmem:[%s2868_s3] sm:$0xff]  ;;  %s2375_s28 = smov 80   ;;  %s2376_s30 = smov 120   ;;  %vm600_vm8 = vcmask 64512  }
  0x13   : > { %s2893_s29 = smov (!%p465_p6, %s1906_s29), 1  ;;  %v2188_v44 = vld [vmem:[%s2866_s1] ss:$0 sm:$0xff]  ;;  %s2377_s14 = smov 96   ;;  %vm623_vm9 = vcmask 130048   ;;  %vm746_vm10 = vcmask 261248  }
  0x14   : > { %s2879_s23 = sshll.u32 %s2893_s29, 4  ;;  %v2189_v49 = vld [vmem:[%s2867_s2] ss:$0 sm:$0xff]  ;;  %s2378_s15 = smov 88   ;;  %vm826_vm11 = vcmask 392448   ;;  %vm906_vm12 = vcmask 523648  }
  0x15   : > { %s469_s27 = scalar_lea.vmem %s2865_s0, %s2879_s23  ;;  %v2190_v55 = vld [vmem:[%s2869_s4] ss:$0 sm:$0xff]  ;;  %s2379_s16 = smov 72  }
  0x16   : > { %v2491_v0 = vld [vmem:[%s469_s27] sm:$0xff]  ;;  %v2495_v2 = vld [vmem:[%s469_s27 + $0x8] sm:$0xff]  ;;  %587 = vmatpush.bf16.msra.mxu0 %v2115_v22  ;;  %s2380_s17 = smov 112   ;;  %s2885_s18 = smov 104  }
  0x17   : > { %v481_v1 = vsel %vm480_vm0, %v2491_v0, 0.0  ;;  %v484_v3 = vsel %vm480_vm0, %v2495_v2, 0.0  ;;  %s2382_s19 = smov 48   ;;  %s2882_s20 = smov 64  }
  0x18   : > { %482 = vadd.xlane.f32.xlu0 %v481_v1  ;;  %v2205_v5 = vpop.eup %2204  ;;  %s2883_s21 = smov 32   ;;  %s2880_s22 = smov 16  }
  0x19   : > { %v488_v6 = vmul.f32 64.0, %v2205_v5  ;;  %vm492_vm1 = vweird.f32 %v2205_v5 }
  0x1a   : > { %588 = vmatpush.bf16.msra.mxu0 %v2114_v23 }
  0x1b   : > { %v489_v7 = vsub.f32 1.0, %v488_v6 }
  0x1d   : > { %v490_v8 = vmul.f32 %v2205_v5, %v489_v7 }
  0x1e   : > { %589 = vmatpush.bf16.msra.mxu0 %v2113_v25 }
  0x1f   : > { %v491_v9 = vadd.f32 %v2205_v5, %v490_v8 }
  0x20   : > { %485 = vadd.xlane.f32.xlu0 %v484_v3 }
  0x21   : > { %v2499_v10 = vsel %vm492_vm1, %v2205_v5, %v491_v9 }
  0x8b   : > { %v483_v11 = vpop.xlane.xlu0 %482 }
  0x8c   : > { %v494_v12 = vmul.f32 %v2499_v10, %v483_v11 }
  0x8e   : > { %v496_v13 = vsub.f32 %v2491_v0, %v494_v12 }
  0x90   : > { %v498_v14 = vmul.f32 %v496_v13, %v496_v13 }
  0x92   : > { %v500_v15 = vsel %vm480_vm0, %v498_v14, 0.0 }
  0x93   : > { %501 = vadd.xlane.f32.xlu1 %v500_v15  ;;  %v486_v16 = vpop.xlane.xlu0 %485 }
  0x94   : > { %v495_v17 = vmul.f32 %v2499_v10, %v486_v16 }
  0x96   : > { %v497_v18 = vsub.f32 %v2495_v2, %v495_v17 }
  0x98   : > { %v499_v19 = vmul.f32 %v497_v18, %v497_v18 }
  0x9a   : > { %v503_v20 = vsel %vm480_vm0, %v499_v19, 0.0 }
  0x9b   : > { %504 = vadd.xlane.f32.xlu1 %v503_v20 }
 0x106   : > { %v502_v24 = vpop.xlane.xlu1 %501 }
 0x107   : > { %v506_v26 = vmul.f32 %v502_v24, %v2499_v10 }
 0x109   : > { %v508_v27 = vadd.f32 1e-05, %v506_v26 }
 0x10b   : > { %2206 = vrsqrt.f32 %v508_v27  ;;  %vm516_vm3 = vweird.f32 %v508_v27 }
 0x10e   : > { %v505_v28 = vpop.xlane.xlu1 %504 }
 0x10f   : > { %v507_v29 = vmul.f32 %v505_v28, %v2499_v10 }
 0x111   : > { %v2207_v30 = vpop.eup %2206  ;;  %v509_v31 = vadd.f32 1e-05, %v507_v29 }
 0x112   : > { %v511_v32 = vmul.f32 %v2207_v30, %v508_v27  ;;  %vm517_vm2 = vweird.f32 %v2207_v30 }
 0x113   : > { %2208 = vrsqrt.f32 %v509_v31  ;;  %vm518_vm4 = vmor %vm516_vm3, %vm517_vm2  ;;  %vm526_vm6 = vweird.f32 %v509_v31 }
 0x114   : > { %v512_v33 = vmul.f32 %v2207_v30, %v511_v32 }
 0x116   : > { %v513_v34 = vmul.f32 0.5, %v512_v33 }
 0x118   : > { %v514_v35 = vsub.f32 1.5, %v513_v34 }
 0x119   : > { %v2209_v36 = vpop.eup %2208 }
 0x11a   : > { %v515_v37 = vmul.f32 %v2207_v30, %v514_v35  ;;  %v521_v38 = vmul.f32 %v2209_v36, %v509_v31  ;;  %vm527_vm5 = vweird.f32 %v2209_v36 }
 0x11b   : > { %vm528_vm7 = vmor %vm526_vm6, %vm527_vm5 }
 0x11c   : > { %v522_v39 = vmul.f32 %v2209_v36, %v521_v38  ;;  %v519_v40 = vsel %vm518_vm4, %v2207_v30, %v515_v37 }
 0x11d   : > { %v530_v43 = vmul.f32 %v519_v40, %v496_v13 }
 0x11e   : > { %v523_v41 = vmul.f32 0.5, %v522_v39 }
 0x11f   : > { %v535_v48 = vmul.f32 %v2188_v44, %v530_v43 }
 0x120   : > { %v524_v42 = vsub.f32 1.5, %v523_v41 }
 0x121   : > { %v540_v51 = vadd.f32 %v2189_v49, %v535_v48 }
 0x122   : > { %v525_v45 = vmul.f32 %v2209_v36, %v524_v42 }
 0x124   : > { %v529_v46 = vsel %vm528_vm7, %v2209_v36, %v525_v45 }
 0x125   : > { %v531_v47 = vmul.f32 %v529_v46, %v497_v18 }
 0x127   : > { %v536_v50 = vmul.f32 %v2188_v44, %v531_v47 }
 0x129   : > { %v541_v52 = vadd.f32 %v2189_v49, %v536_v50 }
 0x12b   : > { %v542_v53 = vpack.c.bf16 %v541_v52, %v540_v51 }
 0x12d   : > { %1935 = vmatmul.msk.bf16.vlgmr.msra.gmra.mxu0 %vm480_vm0, %v542_v53 }
 0x1aa   : > { %v591_v54 = vpop.f32.mrf.mxu0 }
 0x1ab   : > { %v592_v57 = vadd.f32 %v2190_v55, %v591_v54 }
 0x1b2   : > { %v593_v56 = vpop.f32.mrf.mxu0 }
 0x1b3   : > { %v594_v58 = vadd.f32 %v2190_v55, %v593_v56 }
 0x1b5   : > { %v2531_v59 = vpack.c.bf16 %v594_v58, %v592_v57 }
 0x1b7   : > { %751 = vrot.lane.b32.xlu1 %v2531_v59, %s2375_s28  ;;  %669 = vrot.lane.b32.xlu0 %v2531_v59, %s2376_s30 }
 0x1b8   : > { %598 = vrot.lane.b32.xlu2 %v2531_v59, %s2377_s14 }
 0x1c0   : > { %671 = vrot.lane.b32.xlu2 %v2531_v59, %s2378_s15 }
 0x1c8   : > { %831 = vrot.lane.b32.xlu2 %v2531_v59, %s2379_s16 }
 0x1d0   : > { %749 = vrot.lane.b32.xlu2 %v2531_v59, %s2380_s17 }
 0x1d8   : > { %829 = vrot.lane.b32.xlu2 %v2531_v59, %s2885_s18 }
 0x212   : > { %v599_v60 = vpop.permute.xlu2 %598 }
 0x213   : > { %v605_v61 = vsel %vm600_vm8, %v599_v60, 0 }
 0x214   : > { %614 = vmatpush.bf16.xpose.msra.mxu1 %v605_v61 }
 0x21a   : > { %v672_v62 = vpop.permute.xlu2 %671 }
 0x21b   : > { %1936 = vmatmul.msk.bf16.vlgmr.msra.gmra.mxu1 %vm600_vm8, %v2531_v59  ;;  %v677_v63 = vsel %vm600_vm8, %v672_v62, 0 }
 0x21c   : > { %686 = vmatpush.bf16.xpose.msra.mxu3 %v677_v63 }
 0x222   : > { %v832_v1 = vpop.permute.xlu2 %831 }
 0x223   : > { %v837_v3 = vsel %vm600_vm8, %v832_v1, 0 }
 0x224   : > { %846 = vmatpush.bf16.xpose.msrb.mxu0 %v837_v3 }
 0x229   : > { %v752_v4 = vpop.permute.xlu1 %751  ;;  %v670_v5 = vpop.permute.xlu0 %669 }
 0x22a   : > { %v750_v6 = vpop.permute.xlu2 %749  ;;  %1938 = vmatmul.msk.bf16.vlgmr.msra.gmra.mxu3 %vm600_vm8, %v670_v5  ;;  %v757_v7 = vsel %vm600_vm8, %v752_v4, 0 }
 0x22b   : > { %766 = vmatpush.bf16.xpose.msrb.mxu1 %v757_v7 }
 0x232   : > { %v830_v8 = vpop.permute.xlu2 %829  ;;  %1940 = vmatmul.msk.bf16.vlgmr.msrb.gmra.mxu1 %vm600_vm8, %v750_v6 }
 0x233   : > { %1942 = vmatmul.msk.bf16.vlgmr.msrb.gmra.mxu0 %vm600_vm8, %v830_v8 }
 0x298   : > { %v616_v9 = vpop.f32.mrf.mxu1 }
 0x299   : > { %v621_v11 = vmul.f32 0.35355338, %v616_v9 }
 0x29b   : > { %v624_v12 = vsel %vm623_vm9, %v621_v11, -inf }
 0x29c   : > { %625 = vmax.xlane.f32.xlu0 %v624_v12 }
 0x2a0   : > { %v618_v13 = vpop.f32.mrf.mxu1 }
 0x2a1   : > { %v622_v14 = vmul.f32 0.35355338, %v618_v13 }
 0x2a3   : > { %v627_v15 = vsel %vm623_vm9, %v622_v14, -inf }
 0x2a4   : > { %628 = vmax.xlane.f32.xlu2 %v627_v15 }
 0x2ad   : > { %v688_v16 = vpop.f32.mrf.mxu3 }
 0x2ae   : > { %v693_v17 = vmul.f32 0.35355338, %v688_v16 }
 0x2af   : > { %v768_v18 = vpop.f32.mrf.mxu1 }
 0x2b0   : > { %v848_v19 = vpop.f32.mrf.mxu0  ;;  %v695_v20 = vsel %vm623_vm9, %v693_v17, -inf  ;;  %v773_v32 = vmul.f32 0.35355338, %v768_v18 }
 0x2b1   : > { %v853_v21 = vmul.f32 0.35355338, %v848_v19  ;;  %696 = vmax.xlane.f32.xlu1 %v695_v20 }
 0x2b2   : > { %v775_v33 = vsel %vm623_vm9, %v773_v32, -inf }
 0x2b3   : > { %v855_v22 = vsel %vm623_vm9, %v853_v21, -inf }
 0x2b4   : > { %856 = vmax.xlane.f32.xlu0 %v855_v22 }
 0x2b5   : > { %v690_v23 = vpop.f32.mrf.mxu3 }
 0x2b6   : > { %v694_v24 = vmul.f32 0.35355338, %v690_v23 }
 0x2b7   : > { %v770_v25 = vpop.f32.mrf.mxu1 }
 0x2b8   : > { %v2560_v26 = vmul.f32 0.35355338, %v770_v25  ;;  %v850_v27 = vpop.f32.mrf.mxu0  ;;  %v698_v30 = vsel %vm623_vm9, %v694_v24, -inf }
 0x2b9   : > { %v854_v28 = vmul.f32 0.35355338, %v850_v27 }
 0x2ba   : > { %v778_v29 = vsel %vm623_vm9, %v2560_v26, -inf }
 0x2bb   : > { %779 = vmax.xlane.f32.xlu1 %v778_v29  ;;  %v858_v31 = vsel %vm623_vm9, %v854_v28, -inf }
 0x2bc   : > { %699 = vmax.xlane.f32.xlu0 %v698_v30  ;;  %859 = vmax.xlane.f32.xlu2 %v858_v31 }
 0x2c4   : > { %776 = vmax.xlane.f32.xlu2 %v775_v33 }
 0x2d4   : > { %718 = vrot.lane.b32.xlu1 %v2531_v59, %s2382_s19 }
 0x2dc   : > { %647 = vrot.lane.b32.xlu2 %v2531_v59, %s2882_s20 }
 0x30f   : > { %v626_v34 = vpop.xlane.xlu0 %625 }
 0x310   : > { %v630_v35 = vsub.f32 %v621_v11, %v626_v34 }
 0x312   : > { %v632_v36 = vmul.f32 1.442695, %v630_v35 }
 0x314   : > { %2210 = vpow2.f32 %v632_v36 }
 0x317   : > { %v629_v37 = vpop.xlane.xlu2 %628 }
 0x318   : > { %v631_v38 = vsub.f32 %v622_v14, %v629_v37 }
 0x31a   : > { %v2571_v39 = vpop.eup %2210  ;;  %v634_v40 = vmul.f32 1.442695, %v631_v38 }
 0x31b   : > { %v636_v41 = vsel %vm623_vm9, %v2571_v39, 0.0 }
 0x31c   : > { %2212 = vpow2.f32 %v634_v40  ;;  %637 = vadd.xlane.f32.xlu1 %v636_v41 }
 0x322   : > { %v2213_v42 = vpop.eup %2212 }
 0x323   : > { %v639_v43 = vsel %vm623_vm9, %v2213_v42, 0.0 }
 0x324   : > { %640 = vadd.xlane.f32.xlu0 %v639_v43  ;;  %v697_v44 = vpop.xlane.xlu1 %696 }
 0x325   : > { %v701_v45 = vsub.f32 %v693_v17, %v697_v44 }
 0x327   : > { %v703_v46 = vmul.f32 1.442695, %v701_v45  ;;  %v857_v47 = vpop.xlane.xlu0 %856 }
 0x328   : > { %v861_v48 = vsub.f32 %v853_v21, %v857_v47 }
 0x329   : > { %2214 = vpow2.f32 %v703_v46 }
 0x32a   : > { %v863_v49 = vmul.f32 1.442695, %v861_v48 }
 0x32c   : > { %2216 = vpow2.f32 %v863_v49 }
 0x32e   : > { %v780_v3 = vpop.xlane.xlu1 %779 }
 0x32f   : > { %v2215_v50 = vpop.eup %2214  ;;  %v860_v51 = vpop.xlane.xlu2 %859  ;;  %v782_v7 = vsub.f32 %v2560_v26, %v780_v3 }
 0x330   : > { %v700_v52 = vpop.xlane.xlu0 %699  ;;  %v862_v53 = vsub.f32 %v854_v28, %v860_v51  ;;  %v707_v54 = vsel %vm623_vm9, %v2215_v50, 0.0 }
 0x331   : > { %708 = vadd.xlane.f32.xlu1 %v707_v54  ;;  %v702_v57 = vsub.f32 %v694_v24, %v700_v52  ;;  %v785_v11 = vmul.f32 1.442695, %v782_v7  ;;  %v2119_v54 = vld [vmem:[%s2870_s5 + $0x10] sm:$0xff] }
 0x332   : > { %v2577_v55 = vpop.eup %2216  ;;  %v865_v56 = vmul.f32 1.442695, %v862_v53  ;;  %v2120_v53 = vld [vmem:[%s2870_s5 + $0x18] sm:$0xff] }
 0x333   : > { %v867_v58 = vsel %vm623_vm9, %v2577_v55, 0.0  ;;  %v705_v60 = vmul.f32 1.442695, %v702_v57  ;;  %951 = vmatpush.bf16.msra.mxu1 %v2120_v53 }
 0x334   : > { %868 = vadd.xlane.f32.xlu2 %v867_v58  ;;  %2218 = vpow2.f32 %v865_v56  ;;  %v2117_v56 = vld [vmem:[%s2870_s5] sm:$0xff] }
 0x335   : > { %2220 = vpow2.f32 %v705_v60 }
 0x337   : > { %v777_v61 = vpop.xlane.xlu2 %776  ;;  %952 = vmatpush.bf16.msra.mxu1 %v2119_v54 }
 0x338   : > { %v781_v63 = vsub.f32 %v773_v32, %v777_v61 }
 0x33a   : > { %v2581_v62 = vpop.eup %2218  ;;  %v783_v4 = vmul.f32 1.442695, %v781_v63 }
 0x33b   : > { %v870_v1 = vsel %vm623_vm9, %v2581_v62, 0.0  ;;  %v2221_v6 = vpop.eup %2220 }
 0x33c   : > { %871 = vadd.xlane.f32.xlu0 %v870_v1  ;;  %2222 = vpow2.f32 %v783_v4  ;;  %v710_v8 = vsel %vm623_vm9, %v2221_v6, 0.0 }
 0x33d   : > { %2224 = vpow2.f32 %v785_v11 }
 0x33f   : > { %v648_v5 = vpop.permute.xlu2 %647 }
 0x340   : > { %660 = vmatpush.bf16.msra.mxu2 %v648_v5  ;;  %v2191_v5 = vld [vmem:[%s2871_s6] ss:$0 sm:$0xff] }
 0x342   : > { %v2223_v12 = vpop.eup %2222 }
 0x343   : > { %v787_v13 = vsel %vm623_vm9, %v2223_v12, 0.0  ;;  %v2225_v14 = vpop.eup %2224 }
 0x344   : > { %711 = vadd.xlane.f32.xlu0 %v710_v8  ;;  %v790_v15 = vsel %vm623_vm9, %v2225_v14, 0.0 }
 0x346   : > { %v719_v9 = vpop.permute.xlu1 %718 }
 0x347   : > { %731 = vmatpush.bf16.msrb.mxu2 %v719_v9 }
 0x34a   : > { %798 = vrot.lane.b32.xlu1 %v2531_v59, %s2883_s21 }
 0x34c   : > { %788 = vadd.xlane.f32.xlu0 %v787_v13 }
 0x354   : > { %791 = vadd.xlane.f32.xlu0 %v790_v15 }
 0x368   : > { %878 = vrot.lane.b32.xlu0 %v2531_v59, %s2880_s22 }
 0x38f   : > { %v638_v16 = vpop.xlane.xlu1 %637 }
 0x390   : > { %2226 = vrcp.f32 %v638_v16 }
 0x396   : > { %v2227_v18 = vpop.eup %2226 }
 0x397   : > { %v641_v17 = vpop.xlane.xlu0 %640  ;;  %v644_v20 = vmul.f32 %v2227_v18, %v2571_v39 }
 0x398   : > { %2228 = vrcp.f32 %v641_v17 }
 0x39e   : > { %v2229_v19 = vpop.eup %2228 }
 0x39f   : > { %v645_v21 = vmul.f32 %v2229_v19, %v2213_v42 }
 0x3a1   : > { %v646_v22 = vpack.c.bf16 %v645_v21, %v644_v20 }
 0x3a3   : > { %1937 = vmatmul.msk.bf16.vlgmr.msra.gmra.mxu2 %vm623_vm9, %v646_v22 }
 0x3a4   : > { %v709_v24 = vpop.xlane.xlu1 %708 }
 0x3a5   : > { %2230 = vrcp.f32 %v709_v24  ;;  %v2123_v24 = vld [vmem:[%s2874_s9 + $0x10] sm:$0xff] }
 0x3a7   : > { %v869_v35 = vpop.xlane.xlu2 %868 }
 0x3ab   : > { %v2231_v27 = vpop.eup %2230 }
 0x3ac   : > { %v715_v28 = vmul.f32 %v2231_v27, %v2215_v50 }
 0x3af   : > { %v872_v23 = vpop.xlane.xlu0 %871 }
 0x3b7   : > { %v712_v25 = vpop.xlane.xlu0 %711 }
 0x3b8   : > { %2232 = vrcp.f32 %v712_v25  ;;  %v2122_v25 = vld [vmem:[%s2874_s9 + $0x8] sm:$0xff] }
 0x3bc   : > { %v799_v26 = vpop.permute.xlu1 %798 }
 0x3bd   : > { %811 = vmatpush.bf16.msrb.mxu3 %v799_v26 }
 0x3be   : > { %v2233_v59 = vpop.eup %2232 }
 0x3bf   : > { %v716_v29 = vmul.f32 %v2233_v59, %v2221_v6  ;;  %v789_v30 = vpop.xlane.xlu0 %788  ;;  %v2121_v59 = vld [vmem:[%s2874_s9] sm:$0xff] }
 0x3c0   : > { %2234 = vrcp.f32 %v789_v30 }
 0x3c1   : > { %v717_v31 = vpack.c.bf16 %v716_v29, %v715_v28 }
 0x3c3   : > { %1939 = vmatmul.msk.bf16.vlgmr.msrb.gmra.mxu2 %vm623_vm9, %v717_v31 }
 0x3c6   : > { %v2235_v33 = vpop.eup %2234 }
 0x3c7   : > { %v792_v32 = vpop.xlane.xlu0 %791  ;;  %v795_v36 = vmul.f32 %v2235_v33, %v2223_v12 }
 0x3c8   : > { %2236 = vrcp.f32 %v792_v32 }
 0x3c9   : > { %2238 = vrcp.f32 %v872_v23  ;;  %v2124_v23 = vld [vmem:[%s2874_s9 + $0x18] sm:$0xff] }
 0x3ca   : > { %2240 = vrcp.f32 %v869_v35  ;;  %1078 = vmatpush.bf16.msra.mxu3 %v2124_v23  ;;  %v2195_v23 = vld [vmem:[#allocation5] ss:$0 sm:$0xff] }
 0x3ce   : > { %v2237_v34 = vpop.eup %2236  ;;  %1079 = vmatpush.bf16.msra.mxu3 %v2123_v24 }
 0x3cf   : > { %v796_v37 = vmul.f32 %v2237_v34, %v2225_v14  ;;  %v2239_v39 = vpop.eup %2238 }
 0x3d0   : > { %v2241_v40 = vpop.eup %2240  ;;  %v876_v41 = vmul.f32 %v2239_v39, %v2581_v62 }
 0x3d1   : > { %v797_v38 = vpack.c.bf16 %v796_v37, %v795_v36  ;;  %v875_v42 = vmul.f32 %v2241_v40, %v2577_v55  ;;  %v2118_v55 = vld [vmem:[%s2870_s5 + $0x8] sm:$0xff] }
 0x3d2   : > { %953 = vmatpush.bf16.msra.mxu1 %v2118_v55  ;;  %1080 = vmatpush.bf16.msra.mxu3 %v2122_v25  ;;  %v2128_v55 = vld [vmem:[%s2876_s11 + $0x18] sm:$0xff] }
 0x3d3   : > { %1941 = vmatmul.msk.bf16.vlgmr.msrb.gmra.mxu3 %vm623_vm9, %v797_v38  ;;  %v877_v44 = vpack.c.bf16 %v876_v41, %v875_v42  ;;  %1141 = vmatpush.bf16.msra.mxu0 %v2128_v55 }
 0x3d6   : > { %954 = vmatpush.bf16.msra.mxu1 %v2117_v56  ;;  %1081 = vmatpush.bf16.msra.mxu3 %v2121_v59  ;;  %v2127_v56 = vld [vmem:[%s2876_s11 + $0x10] sm:$0xff] }
 0x3d7   : > { %1142 = vmatpush.bf16.msra.mxu0 %v2127_v56 }
 0x3da   : > { %v879_v43 = vpop.permute.xlu0 %878 }
 0x3db   : > { %891 = vmatpush.bf16.msra.mxu2 %v879_v43 }
 0x3de   : > { %1943 = vmatmul.msk.bf16.vlgmr.msra.gmra.mxu2 %vm623_vm9, %v877_v44  ;;  %v2192_v44 = vld [vmem:[%s2872_s7] ss:$0 sm:$0xff] }
 0x426   : > { %v662_v45 = vpop.f32.mrf.mxu2 }
 0x427   : > { %667 = vst.msk [vmem:[#allocation2] sm:$0xff] %vm623_vm9, %v662_v45 }
 0x42e   : > { %v664_v46 = vpop.f32.mrf.mxu2 }
 0x42f   : > { %668 = vst.msk [vmem:[#allocation2 + $0x8] sm:$0xff] %vm623_vm9, %v664_v46 }
 0x446   : > { %v733_v47 = vpop.f32.mrf.mxu2 }
 0x447   : > { %740 = vrot.lane.b32.xlu1 %v733_v47, %s2880_s22 }
 0x44e   : > { %v735_v48 = vpop.f32.mrf.mxu2 }
 0x44f   : > { %742 = vrot.lane.b32.xlu1 %v735_v48, %s2880_s22  ;;  %v2193_v48 = vld [vmem:[%s2873_s8] ss:$0 sm:$0xff]  ;;  %s2887_s22 = smov 104  }
 0x456   : > { %v813_v49 = vpop.f32.mrf.mxu3 }
 0x457   : > { %820 = vrot.lane.b32.xlu0 %v813_v49, %s2883_s21 }
 0x45e   : > { %v815_v50 = vpop.f32.mrf.mxu3 }
 0x45f   : > { %822 = vrot.lane.b32.xlu1 %v815_v50, %s2883_s21 }
 0x461   : > { %v893_v51 = vpop.f32.mrf.mxu2 }
 0x462   : > { %900 = vrot.lane.b32.xlu0 %v893_v51, %s2382_s19 }
 0x469   : > { %v895_v52 = vpop.f32.mrf.mxu2 }
 0x46a   : > { %902 = vrot.lane.b32.xlu2 %v895_v52, %s2382_s19 }
 0x4b9   : > { %v741_v57 = vpop.permute.xlu1 %740 }
 0x4ba   : > { %747 = vst.msk [vmem:[#allocation2] sm:$0xff] %vm746_vm10, %v741_v57  ;;  %v2126_v57 = vld [vmem:[%s2876_s11 + $0x8] sm:$0xff] }
 0x4bb   : > { %1143 = vmatpush.bf16.msra.mxu0 %v2126_v57 }
 0x4c1   : > { %v743_v58 = vpop.permute.xlu1 %742 }
 0x4c2   : > { %748 = vst.msk [vmem:[#allocation2 + $0x8] sm:$0xff] %vm746_vm10, %v743_v58  ;;  %v2125_v58 = vld [vmem:[%s2876_s11] sm:$0xff] }
 0x4c3   : > { %1144 = vmatpush.bf16.msra.mxu0 %v2125_v58 }
 0x4c4   : > { %v903_v62 = vpop.permute.xlu2 %902 }
 0x4c9   : > { %v821_v60 = vpop.permute.xlu0 %820 }
 0x4ca   : > { %827 = vst.msk [vmem:[#allocation2] sm:$0xff] %vm826_vm11, %v821_v60  ;;  %v2194_v60 = vld [vmem:[#allocation3] ss:$0 sm:$0xff] }
 0x4d1   : > { %v823_v61 = vpop.permute.xlu1 %822 }
 0x4d2   : > { %828 = vst.msk [vmem:[#allocation2 + $0x8] sm:$0xff] %vm826_vm11, %v823_v61 }
 0x4d3   : > { %908 = vst.msk [vmem:[#allocation2 + $0x8] sm:$0xff] %vm906_vm12, %v903_v62 }
 0x4d4   : > { %v901_v63 = vpop.permute.xlu0 %900 }
 0x4d5   : > { %907 = vst.msk [vmem:[#allocation2] sm:$0xff] %vm906_vm12, %v901_v63 }
 0x4da   : > { %v910_v3 = vld [vmem:[#allocation2 + $0x8] sm:$0xff] }
 0x4dc   : > { %v909_v1 = vld [vmem:[#allocation2] sm:$0xff] }
 0x4dd   : > { %v911_v4 = vpack.c.bf16 %v910_v3, %v909_v1 }
 0x4df   : > { %1960 = vmatmul.msk.bf16.vlgmr.msra.gmra.mxu1 %vm480_vm0, %v911_v4 }
 0x55c   : > { %v956_v6 = vpop.f32.mrf.mxu1 }
 0x55d   : > { %v961_v7 = vadd.f32 %v956_v6, %v2491_v0 }
 0x55f   : > { %v2631_v8 = vadd.f32 %v2191_v5, %v961_v7 }
 0x561   : > { %v989_v9 = vsel %vm480_vm0, %v2631_v8, 0.0 }
 0x562   : > { %990 = vadd.xlane.f32.xlu1 %v989_v9 }
 0x564   : > { %v958_v11 = vpop.f32.mrf.mxu1 }
 0x565   : > { %v962_v12 = vadd.f32 %v958_v11, %v2495_v2 }
 0x567   : > { %v2636_v13 = vadd.f32 %v2191_v5, %v962_v12 }
 0x569   : > { %v992_v14 = vsel %vm480_vm0, %v2636_v13, 0.0 }
 0x56a   : > { %993 = vadd.xlane.f32.xlu0 %v992_v14 }
 0x5d5   : > { %v991_v15 = vpop.xlane.xlu1 %990 }
 0x5d6   : > { %v995_v16 = vmul.f32 %v991_v15, %v2499_v10 }
 0x5d8   : > { %v997_v0 = vsub.f32 %v2631_v8, %v995_v16 }
 0x5da   : > { %v999_v17 = vmul.f32 %v997_v0, %v997_v0 }
 0x5dc   : > { %v1001_v18 = vsel %vm480_vm0, %v999_v17, 0.0 }
 0x5dd   : > { %1002 = vadd.xlane.f32.xlu2 %v1001_v18  ;;  %v994_v19 = vpop.xlane.xlu0 %993 }
 0x5de   : > { %v996_v20 = vmul.f32 %v994_v19, %v2499_v10 }
 0x5e0   : > { %v998_v2 = vsub.f32 %v2636_v13, %v996_v20 }
 0x5e2   : > { %v1000_v21 = vmul.f32 %v998_v2, %v998_v2 }
 0x5e4   : > { %v1004_v22 = vsel %vm480_vm0, %v1000_v21, 0.0 }
 0x5e5   : > { %1005 = vadd.xlane.f32.xlu1 %v1004_v22 }
 0x650   : > { %v1003_v26 = vpop.xlane.xlu2 %1002 }
 0x651   : > { %v1007_v27 = vmul.f32 %v1003_v26, %v2499_v10 }
 0x653   : > { %v1009_v28 = vadd.f32 1e-05, %v1007_v27 }
 0x655   : > { %2242 = vrsqrt.f32 %v1009_v28  ;;  %vm1017_vm14 = vweird.f32 %v1009_v28 }
 0x658   : > { %v1006_v29 = vpop.xlane.xlu1 %1005 }
 0x659   : > { %v1008_v30 = vmul.f32 %v1006_v29, %v2499_v10 }
 0x65b   : > { %v2243_v31 = vpop.eup %2242  ;;  %v1010_v32 = vadd.f32 1e-05, %v1008_v30 }
 0x65c   : > { %v1012_v33 = vmul.f32 %v2243_v31, %v1009_v28  ;;  %vm1018_vm13 = vweird.f32 %v2243_v31 }
 0x65d   : > { %2244 = vrsqrt.f32 %v1010_v32  ;;  %vm1019_vm15 = vmor %vm1017_vm14, %vm1018_vm13  ;;  %vm1027_vm2 = vweird.f32 %v1010_v32 }
 0x65e   : > { %v1013_v34 = vmul.f32 %v2243_v31, %v1012_v33 }
 0x660   : > { %v1014_v35 = vmul.f32 0.5, %v1013_v34 }
 0x662   : > { %v1015_v36 = vsub.f32 1.5, %v1014_v35 }
 0x663   : > { %v2245_v37 = vpop.eup %2244 }
 0x664   : > { %v1016_v38 = vmul.f32 %v2243_v31, %v1015_v36  ;;  %v1022_v39 = vmul.f32 %v2245_v37, %v1010_v32  ;;  %vm1028_vm1 = vweird.f32 %v2245_v37 }
 0x665   : > { %vm1029_vm3 = vmor %vm1027_vm2, %vm1028_vm1 }
 0x666   : > { %v1023_v40 = vmul.f32 %v2245_v37, %v1022_v39  ;;  %v1020_v41 = vsel %vm1019_vm15, %v2243_v31, %v1016_v38  ;;  %v2132_v39 = vld [vmem:[%s2868_s3 + $0x38] sm:$0xff] }
 0x667   : > { %v1031_v45 = vmul.f32 %v1020_v41, %v997_v0  ;;  %1257 = vmatpush.bf16.msrb.mxu2 %v2132_v39  ;;  %v2130_v41 = vld [vmem:[%s2868_s3 + $0x28] sm:$0xff] }
 0x668   : > { %v1024_v42 = vmul.f32 0.5, %v1023_v40  ;;  %v2131_v40 = vld [vmem:[%s2868_s3 + $0x30] sm:$0xff] }
 0x669   : > { %v1036_v49 = vmul.f32 %v2192_v44, %v1031_v45 }
 0x66a   : > { %v1025_v43 = vsub.f32 1.5, %v1024_v42 }
 0x66b   : > { %v1041_v52 = vadd.f32 %v2193_v48, %v1036_v49  ;;  %1258 = vmatpush.bf16.msrb.mxu2 %v2131_v40 }
 0x66c   : > { %v1026_v46 = vmul.f32 %v2245_v37, %v1025_v43 }
 0x66e   : > { %v1030_v47 = vsel %vm1029_vm3, %v2245_v37, %v1026_v46 }
 0x66f   : > { %v1032_v50 = vmul.f32 %v1030_v47, %v998_v2  ;;  %1259 = vmatpush.bf16.msrb.mxu2 %v2130_v41 }
 0x671   : > { %v1037_v51 = vmul.f32 %v2192_v44, %v1032_v50  ;;  %v2129_v44 = vld [vmem:[%s2868_s3 + $0x20] sm:$0xff] }
 0x673   : > { %v1042_v53 = vadd.f32 %v2193_v48, %v1037_v51  ;;  %1260 = vmatpush.bf16.msrb.mxu2 %v2129_v44 }
 0x675   : > { %v1043_v54 = vpack.c.bf16 %v1042_v53, %v1041_v52 }
 0x677   : > { %1977 = vmatmul.msk.bf16.vlgmr.msra.gmra.mxu3 %vm480_vm0, %v1043_v54 }
 0x6fa   : > { %v1083_v61 = vpop.f32.mrf.mxu3 }
 0x6fb   : > { %v1084_v62 = vadd.f32 %v2194_v60, %v1083_v61 }
 0x6fd   : > { %v1090_v63 = vmul.f32 0.044715, %v1084_v62  ;;  %v1088_v18 = vmul.f32 0.5, %v1084_v62 }
 0x6ff   : > { %v1092_v1 = vmul.f32 %v1090_v63, %v1084_v62 }
 0x701   : > { %v1094_v3 = vmul.f32 %v1092_v1, %v1084_v62 }
 0x702   : > { %v1085_v4 = vpop.f32.mrf.mxu3 }
 0x703   : > { %v1096_v5 = vadd.f32 %v1094_v3, %v1084_v62  ;;  %v1086_v6 = vadd.f32 %v2194_v60, %v1085_v4  ;;  %v2196_v62 = vld [vmem:[%s2866_s1 + $0x1] ss:$0 sm:$0xff] }
 0x704   : > { %v2197_v4 = vld [vmem:[%s2867_s2 + $0x1] ss:$0 sm:$0xff] }
 0x705   : > { %v1091_v7 = vmul.f32 0.044715, %v1086_v6  ;;  %v1098_v9 = vmul.f32 0.7978846, %v1096_v5  ;;  %v1089_v19 = vmul.f32 0.5, %v1086_v6 }
 0x707   : > { %v1093_v11 = vmul.f32 %v1091_v7, %v1086_v6  ;;  %2246 = vtanh.f32 %v1098_v9 }
 0x709   : > { %v1095_v12 = vmul.f32 %v1093_v11, %v1086_v6 }
 0x70b   : > { %v1097_v14 = vadd.f32 %v1095_v12, %v1086_v6 }
 0x70d   : > { %v1099_v15 = vmul.f32 0.7978846, %v1097_v14  ;;  %v2247_v16 = vpop.eup %2246 }
 0x70e   : > { %v1102_v0 = vadd.f32 1.0, %v2247_v16 }
 0x70f   : > { %2248 = vtanh.f32 %v1099_v15  ;;  %v2198_v15 = vld [vmem:[%s2869_s4 + $0x1] ss:$0 sm:$0xff] }
 0x710   : > { %v1104_v2 = vmul.f32 %v1102_v0, %v1088_v18 }
 0x715   : > { %v2249_v17 = vpop.eup %2248 }
 0x716   : > { %v1103_v20 = vadd.f32 1.0, %v2249_v17 }
 0x718   : > { %v1105_v21 = vmul.f32 %v1103_v20, %v1089_v19 }
 0x71a   : > { %v1106_v22 = vpack.c.bf16 %v1105_v21, %v1104_v2 }
 0x71c   : > { %1994 = vmatmul.msk.bf16.vlgmr.msra.gmra.mxu0 %vm480_vm0, %v1106_v22 }
 0x799   : > { %v1146_v24 = vpop.f32.mrf.mxu0 }
 0x79a   : > { %v1147_v25 = vadd.f32 %v2195_v23, %v1146_v24 }
 0x79c   : > { %v2681_v26 = vadd.f32 %v1147_v25, %v2631_v8 }
 0x79e   : > { %v1157_v27 = vsel %vm480_vm0, %v2681_v26, 0.0 }
 0x79f   : > { %1158 = vadd.xlane.f32.xlu0 %v1157_v27 }
 0x7a1   : > { %v1148_v59 = vpop.f32.mrf.mxu0 }
 0x7a2   : > { %v1149_v28 = vadd.f32 %v2195_v23, %v1148_v59 }
 0x7a4   : > { %v2686_v29 = vadd.f32 %v1149_v28, %v2636_v13 }
 0x7a6   : > { %v1160_v30 = vsel %vm480_vm0, %v2686_v29, 0.0 }
 0x7a7   : > { %1161 = vadd.xlane.f32.xlu1 %v1160_v30 }
 0x812   : > { %v1159_v31 = vpop.xlane.xlu0 %1158 }
 0x813   : > { %v1163_v32 = vmul.f32 %v1159_v31, %v2499_v10 }
 0x815   : > { %v1165_v33 = vsub.f32 %v2681_v26, %v1163_v32 }
 0x817   : > { %v1167_v8 = vmul.f32 %v1165_v33, %v1165_v33 }
 0x819   : > { %v1169_v34 = vsel %vm480_vm0, %v1167_v8, 0.0 }
 0x81a   : > { %v1162_v35 = vpop.xlane.xlu1 %1161  ;;  %1170 = vadd.xlane.f32.xlu0 %v1169_v34 }
 0x81b   : > { %v1164_v36 = vmul.f32 %v1162_v35, %v2499_v10 }
 0x81d   : > { %v1166_v37 = vsub.f32 %v2686_v29, %v1164_v36 }
 0x81f   : > { %v1168_v13 = vmul.f32 %v1166_v37, %v1166_v37 }
 0x821   : > { %v1172_v38 = vsel %vm480_vm0, %v1168_v13, 0.0 }
 0x822   : > { %1173 = vadd.xlane.f32.xlu1 %v1172_v38 }
 0x88d   : > { %v1171_v42 = vpop.xlane.xlu0 %1170 }
 0x88e   : > { %v1175_v43 = vmul.f32 %v1171_v42, %v2499_v10 }
 0x890   : > { %v1177_v45 = vadd.f32 1e-05, %v1175_v43 }
 0x892   : > { %2250 = vrsqrt.f32 %v1177_v45  ;;  %vm1185_vm5 = vweird.f32 %v1177_v45 }
 0x895   : > { %v1174_v46 = vpop.xlane.xlu1 %1173 }
 0x896   : > { %v1176_v47 = vmul.f32 %v1174_v46, %v2499_v10 }
 0x898   : > { %v2251_v48 = vpop.eup %2250  ;;  %v1178_v49 = vadd.f32 1e-05, %v1176_v47 }
 0x899   : > { %v1180_v50 = vmul.f32 %v2251_v48, %v1177_v45  ;;  %vm1186_vm4 = vweird.f32 %v2251_v48 }
 0x89a   : > { %2252 = vrsqrt.f32 %v1178_v49  ;;  %vm1187_vm6 = vmor %vm1185_vm5, %vm1186_vm4  ;;  %vm1195_vm13 = vweird.f32 %v1178_v49 }
 0x89b   : > { %v1181_v51 = vmul.f32 %v2251_v48, %v1180_v50 }
 0x89d   : > { %v1182_v52 = vmul.f32 0.5, %v1181_v51 }
 0x89f   : > { %v1183_v53 = vsub.f32 1.5, %v1182_v52 }
 0x8a0   : > { %v2253_v54 = vpop.eup %2252 }
 0x8a1   : > { %v1184_v55 = vmul.f32 %v2251_v48, %v1183_v53  ;;  %v1190_v56 = vmul.f32 %v2253_v54, %v1178_v49  ;;  %vm1196_vm7 = vweird.f32 %v2253_v54 }
 0x8a2   : > { %vm1197_vm14 = vmor %vm1195_vm13, %vm1196_vm7 }
 0x8a3   : > { %v1191_v57 = vmul.f32 %v2253_v54, %v1190_v56  ;;  %v1188_v58 = vsel %vm1187_vm6, %v2251_v48, %v1184_v55 }
 0x8a4   : > { %v1199_v63 = vmul.f32 %v1188_v58, %v1165_v33 }
 0x8a5   : > { %v1192_v60 = vmul.f32 0.5, %v1191_v57 }
 0x8a6   : > { %v1204_v5 = vmul.f32 %v2196_v62, %v1199_v63 }
 0x8a7   : > { %v1193_v61 = vsub.f32 1.5, %v1192_v60 }
 0x8a8   : > { %v1209_v9 = vadd.f32 %v2197_v4, %v1204_v5 }
 0x8a9   : > { %v1194_v1 = vmul.f32 %v2253_v54, %v1193_v61 }
 0x8ab   : > { %v1198_v3 = vsel %vm1197_vm14, %v2253_v54, %v1194_v1 }
 0x8ac   : > { %v1200_v6 = vmul.f32 %v1198_v3, %v1166_v37 }
 0x8ae   : > { %v1205_v7 = vmul.f32 %v2196_v62, %v1200_v6 }
 0x8b0   : > { %v1210_v11 = vadd.f32 %v2197_v4, %v1205_v7 }
 0x8b2   : > { %v1211_v12 = vpack.c.bf16 %v1210_v11, %v1209_v9 }
 0x8b4   : > { %2022 = vmatmul.msk.bf16.vlgmr.msrb.gmra.mxu2 %vm480_vm0, %v1211_v12 }
 0x937   : > { %v1262_v14 = vpop.f32.mrf.mxu2 }
 0x938   : > { %v1263_v0 = vadd.f32 %v2198_v15, %v1262_v14 }
 0x93f   : > { %v1264_v16 = vpop.f32.mrf.mxu2 }
 0x940   : > { %v1265_v17 = vadd.f32 %v2198_v15, %v1264_v16 }
 0x942   : > { %v2720_v18 = vpack.c.bf16 %v1265_v17, %v1263_v0 }
 0x944   : > { %1338 = vrot.lane.b32.xlu1 %v2720_v18, %s2376_s30  ;;  %1340 = vrot.lane.b32.xlu0 %v2720_v18, %s2378_s15  ;;  %s2889_s30 = smov 16   ;;  %s2891_s15 = sshll.u32 %s2893_s29, 4 }
 0x945   : > { %1269 = vrot.lane.b32.xlu2 %v2720_v18, %s2377_s14  ;;  %s2890_s14 = smov 32   ;;  %s474_s24 = scalar_lea.vmem %s2878_s13, %s2891_s15 }
 0x94c   : > { %1417 = vrot.lane.b32.xlu1 %v2720_v18, %s2380_s17  ;;  %1419 = vrot.lane.b32.xlu0 %v2720_v18, %s2375_s28  ;;  %s2888_s28 = smov 64  }
 0x94d   : > { %1498 = vrot.lane.b32.xlu2 %v2720_v18, %s2379_s16 }
 0x954   : > { %1496 = vrot.lane.b32.xlu0 %v2720_v18, %s2887_s22 }
 0x99f   : > { %v1270_v19 = vpop.permute.xlu2 %1269 }
 0x9a0   : > { %v1275_v20 = vsel %vm600_vm8, %v1270_v19, 0 }
 0x9a1   : > { %1284 = vmatpush.bf16.xpose.msrb.mxu1 %v1275_v20 }
 0x9a7   : > { %v1499_v2 = vpop.permute.xlu2 %1498 }
 0x9a8   : > { %2023 = vmatmul.msk.bf16.vlgmr.msrb.gmra.mxu1 %vm600_vm8, %v2720_v18  ;;  %v1504_v23 = vsel %vm600_vm8, %v1499_v2, 0 }
 0x9b6   : > { %v1341_v21 = vpop.permute.xlu0 %1340  ;;  %v1339_v24 = vpop.permute.xlu1 %1338 }
 0x9b7   : > { %v1346_v22 = vsel %vm600_vm8, %v1341_v21, 0 }
 0x9b8   : > { %1355 = vmatpush.bf16.xpose.msrb.mxu0 %v1346_v22 }
 0x9be   : > { %v1420_v25 = vpop.permute.xlu0 %1419  ;;  %v1418_v59 = vpop.permute.xlu1 %1417 }
 0x9bf   : > { %v1425_v27 = vsel %vm600_vm8, %v1420_v25, 0  ;;  %2025 = vmatmul.msk.bf16.vlgmr.msrb.gmra.mxu0 %vm600_vm8, %v1339_v24 }
 0x9c0   : > { %1513 = vmatpush.bf16.xpose.msra.mxu0 %v1504_v23  ;;  %1434 = vmatpush.bf16.xpose.msra.mxu1 %v1425_v27 }
 0x9c6   : > { %v1497_v28 = vpop.permute.xlu0 %1496 }
 0x9c7   : > { %2027 = vmatmul.msk.bf16.vlgmr.msra.gmra.mxu1 %vm600_vm8, %v1418_v59 }
 0x9cf   : > { %2029 = vmatmul.msk.bf16.vlgmr.msra.gmra.mxu0 %vm600_vm8, %v1497_v28 }
 0xa25   : > { %v1286_v30 = vpop.f32.mrf.mxu1 }
 0xa26   : > { %v1291_v31 = vmul.f32 0.35355338, %v1286_v30 }
 0xa28   : > { %v1293_v32 = vsel %vm623_vm9, %v1291_v31, -inf }
 0xa29   : > { %1294 = vmax.xlane.f32.xlu2 %v1293_v32 }
 0xa2d   : > { %v1288_v33 = vpop.f32.mrf.mxu1 }
 0xa2e   : > { %v1292_v8 = vmul.f32 0.35355338, %v1288_v33 }
 0xa30   : > { %v1296_v34 = vsel %vm623_vm9, %v1292_v8, -inf }
 0xa31   : > { %1297 = vmax.xlane.f32.xlu1 %v1296_v34 }
 0xa3c   : > { %v1357_v35 = vpop.f32.mrf.mxu0 }
 0xa3d   : > { %v1362_v36 = vmul.f32 0.35355338, %v1357_v35 }
 0xa3f   : > { %v1364_v37 = vsel %vm623_vm9, %v1362_v36, -inf }
 0xa40   : > { %1365 = vmax.xlane.f32.xlu0 %v1364_v37 }
 0xa44   : > { %v1359_v13 = vpop.f32.mrf.mxu0  ;;  %v1436_v38 = vpop.f32.mrf.mxu1 }
 0xa45   : > { %v1363_v39 = vmul.f32 0.35355338, %v1359_v13  ;;  %v1441_v40 = vmul.f32 0.35355338, %v1436_v38 }
 0xa47   : > { %v1367_v41 = vsel %vm623_vm9, %v1363_v39, -inf  ;;  %v1443_v42 = vsel %vm623_vm9, %v1441_v40, -inf }
 0xa48   : > { %1368 = vmax.xlane.f32.xlu2 %v1367_v41  ;;  %1444 = vmax.xlane.f32.xlu1 %v1443_v42 }
 0xa4c   : > { %v1438_v43 = vpop.f32.mrf.mxu1  ;;  %v1515_v44 = vpop.f32.mrf.mxu0 }
 0xa4d   : > { %v1442_v45 = vmul.f32 0.35355338, %v1438_v43  ;;  %v1520_v46 = vmul.f32 0.35355338, %v1515_v44 }
 0xa4f   : > { %v1446_v47 = vsel %vm623_vm9, %v1442_v45, -inf  ;;  %v1522_v48 = vsel %vm623_vm9, %v1520_v46, -inf }
 0xa50   : > { %1447 = vmax.xlane.f32.xlu0 %v1446_v47  ;;  %1523 = vmax.xlane.f32.xlu2 %v1522_v48 }
 0xa54   : > { %v1517_v49 = vpop.f32.mrf.mxu0 }
 0xa55   : > { %v1521_v50 = vmul.f32 0.35355338, %v1517_v49 }
 0xa57   : > { %v1525_v51 = vsel %vm623_vm9, %v1521_v50, -inf }
 0xa58   : > { %1526 = vmax.xlane.f32.xlu1 %v1525_v51 }
 0xa9c   : > { %v1295_v52 = vpop.xlane.xlu2 %1294 }
 0xa9d   : > { %v1299_v53 = vsub.f32 %v1291_v31, %v1295_v52 }
 0xa9f   : > { %v1301_v54 = vmul.f32 1.442695, %v1299_v53 }
 0xaa1   : > { %2254 = vpow2.f32 %v1301_v54 }
 0xaa4   : > { %v1298_v55 = vpop.xlane.xlu1 %1297 }
 0xaa5   : > { %v1300_v56 = vsub.f32 %v1292_v8, %v1298_v55 }
 0xaa7   : > { %v2255_v57 = vpop.eup %2254  ;;  %v1303_v58 = vmul.f32 1.442695, %v1300_v56 }
 0xaa8   : > { %v1305_v60 = vsel %vm623_vm9, %v2255_v57, 0.0 }
 0xaa9   : > { %2256 = vpow2.f32 %v1303_v58  ;;  %1306 = vadd.xlane.f32.xlu0 %v1305_v60 }
 0xaaf   : > { %v2257_v61 = vpop.eup %2256 }
 0xab0   : > { %v1308_v62 = vsel %vm623_vm9, %v2257_v61, 0.0 }
 0xab1   : > { %1309 = vadd.xlane.f32.xlu2 %v1308_v62 }
 0xab3   : > { %v1366_v63 = vpop.xlane.xlu0 %1365 }
 0xab4   : > { %v1370_v1 = vsub.f32 %v1362_v36, %v1366_v63 }
 0xab6   : > { %v1372_v3 = vmul.f32 1.442695, %v1370_v1 }
 0xab8   : > { %2258 = vpow2.f32 %v1372_v3 }
 0xabb   : > { %v1369_v4 = vpop.xlane.xlu2 %1368  ;;  %v1445_v5 = vpop.xlane.xlu1 %1444 }
 0xabc   : > { %v1371_v6 = vsub.f32 %v1363_v39, %v1369_v4  ;;  %v1449_v11 = vsub.f32 %v1441_v40, %v1445_v5 }
 0xabe   : > { %v2259_v7 = vpop.eup %2258  ;;  %v1374_v9 = vmul.f32 1.442695, %v1371_v6  ;;  %v1451_v14 = vmul.f32 1.442695, %v1449_v11 }
 0xabf   : > { %v1376_v12 = vsel %vm623_vm9, %v2259_v7, 0.0 }
 0xac0   : > { %1377 = vadd.xlane.f32.xlu1 %v1376_v12  ;;  %2260 = vpow2.f32 %v1374_v9 }
 0xac1   : > { %2262 = vpow2.f32 %v1451_v14  ;;  %v2136_v14 = vld [vmem:[%s2870_s5 + $0x38] sm:$0xff] }
 0xac2   : > { %1618 = vmatpush.bf16.msrb.mxu1 %v2136_v14  ;;  %v2144_v14 = vld [vmem:[%s2876_s11 + $0x38] sm:$0xff] }
 0xac3   : > { %v1524_v15 = vpop.xlane.xlu2 %1523  ;;  %v1448_v20 = vpop.xlane.xlu0 %1447  ;;  %1815 = vmatpush.bf16.msrb.mxu0 %v2144_v14 }
 0xac4   : > { %v1528_v0 = vsub.f32 %v1520_v46, %v1524_v15  ;;  %v1450_v21 = vsub.f32 %v1442_v45, %v1448_v20 }
 0xac6   : > { %v2261_v16 = vpop.eup %2260  ;;  %v1530_v19 = vmul.f32 1.442695, %v1528_v0  ;;  %v1453_v23 = vmul.f32 1.442695, %v1450_v21  ;;  %v2134_v0 = vld [vmem:[%s2870_s5 + $0x28] sm:$0xff] }
 0xac7   : > { %v1379_v17 = vsel %vm623_vm9, %v2261_v16, 0.0  ;;  %v2263_v2 = vpop.eup %2262 }
 0xac8   : > { %1380 = vadd.xlane.f32.xlu0 %v1379_v17  ;;  %2264 = vpow2.f32 %v1530_v19  ;;  %v1455_v22 = vsel %vm623_vm9, %v2263_v2, 0.0  ;;  %v2133_v17 = vld [vmem:[%s2870_s5 + $0x20] sm:$0xff] }
 0xac9   : > { %1316 = vrot.lane.b32.xlu2 %v2720_v18, %s2888_s28  ;;  %2266 = vpow2.f32 %v1453_v23 }
 0xacb   : > { %v1527_v59 = vpop.xlane.xlu1 %1526 }
 0xacc   : > { %v1529_v28 = vsub.f32 %v1521_v50, %v1527_v59 }
 0xace   : > { %v2265_v24 = vpop.eup %2264  ;;  %v1532_v31 = vmul.f32 1.442695, %v1529_v28 }
 0xacf   : > { %v1534_v25 = vsel %vm623_vm9, %v2265_v24, 0.0  ;;  %v2267_v27 = vpop.eup %2266 }
 0xad0   : > { %1456 = vadd.xlane.f32.xlu0 %v1455_v22  ;;  %v1458_v30 = vsel %vm623_vm9, %v2267_v27, 0.0  ;;  %2268 = vpow2.f32 %v1532_v31 }
 0xad6   : > { %v2269_v32 = vpop.eup %2268 }
 0xad7   : > { %v1537_v33 = vsel %vm623_vm9, %v2269_v32, 0.0 }
 0xad8   : > { %1535 = vadd.xlane.f32.xlu0 %v1534_v25  ;;  %v2199_v25 = vld [vmem:[%s2871_s6 + $0x1] ss:$0 sm:$0xff] }
 0xad9   : > { %1387 = vrot.lane.b32.xlu1 %v2720_v18, %s2382_s19 }
 0xae0   : > { %1459 = vadd.xlane.f32.xlu0 %v1458_v30 }
 0xae1   : > { %1545 = vrot.lane.b32.xlu1 %v2720_v18, %s2889_s30 }
 0xaf2   : > { %1538 = vadd.xlane.f32.xlu2 %v1537_v33 }
 0xaf4   : > { %1466 = vrot.lane.b32.xlu0 %v2720_v18, %s2890_s14 }
 0xb1c   : > { %v1307_v8 = vpop.xlane.xlu0 %1306 }
 0xb1d   : > { %2270 = vrcp.f32 %v1307_v8 }
 0xb23   : > { %v2271_v35 = vpop.eup %2270 }
 0xb24   : > { %v1310_v34 = vpop.xlane.xlu2 %1309  ;;  %v1313_v37 = vmul.f32 %v2271_v35, %v2255_v57 }
 0xb25   : > { %2272 = vrcp.f32 %v1310_v34 }
 0xb2b   : > { %v2273_v36 = vpop.eup %2272 }
 0xb2c   : > { %v1314_v13 = vmul.f32 %v2273_v36, %v2257_v61  ;;  %v1317_v38 = vpop.permute.xlu2 %1316 }
 0xb2d   : > { %1329 = vmatpush.bf16.msrb.mxu3 %v1317_v38 }
 0xb2e   : > { %v1315_v39 = vpack.c.bf16 %v1314_v13, %v1313_v37 }
 0xb30   : > { %2024 = vmatmul.msk.bf16.vlgmr.msrb.gmra.mxu3 %vm623_vm9, %v1315_v39 }
 0xb33   : > { %v1378_v41 = vpop.xlane.xlu1 %1377 }
 0xb3b   : > { %v1381_v40 = vpop.xlane.xlu0 %1380 }
 0xb3c   : > { %2274 = vrcp.f32 %v1381_v40 }
 0xb3d   : > { %2276 = vrcp.f32 %v1378_v41  ;;  %v2140_v41 = vld [vmem:[%s2874_s9 + $0x38] sm:$0xff] }
 0xb42   : > { %v2275_v43 = vpop.eup %2274 }
 0xb43   : > { %v1457_v42 = vpop.xlane.xlu0 %1456  ;;  %v2277_v18 = vpop.eup %2276  ;;  %v1385_v44 = vmul.f32 %v2275_v43, %v2261_v16  ;;  %v2135_v16 = vld [vmem:[%s2870_s5 + $0x30] sm:$0xff]  ;;  %v2138_v43 = vld [vmem:[%s2874_s9 + $0x28] sm:$0xff] }
 0xb44   : > { %v1384_v45 = vmul.f32 %v2277_v18, %v2259_v7  ;;  %1619 = vmatpush.bf16.msrb.mxu1 %v2135_v16  ;;  %v2142_v16 = vld [vmem:[%s2876_s11 + $0x28] sm:$0xff] }
 0xb46   : > { %v1386_v47 = vpack.c.bf16 %v1385_v44, %v1384_v45 }
 0xb48   : > { %1620 = vmatpush.bf16.msrb.mxu1 %v2134_v0  ;;  %v2141_v0 = vld [vmem:[%s2876_s11 + $0x20] sm:$0xff] }
 0xb4b   : > { %v1388_v46 = vpop.permute.xlu1 %1387  ;;  %v1536_v48 = vpop.xlane.xlu0 %1535 }
 0xb4c   : > { %1400 = vmatpush.bf16.msra.mxu2 %v1388_v46  ;;  %1621 = vmatpush.bf16.msrb.mxu1 %v2133_v17  ;;  %v2137_v46 = vld [vmem:[%s2874_s9 + $0x20] sm:$0xff]  ;;  %v2202_v17 = vld [vmem:[#allocation3 + $0x1] ss:$0 sm:$0xff] }
 0xb4f   : > { %2026 = vmatmul.msk.bf16.vlgmr.msra.gmra.mxu2 %vm623_vm9, %v1386_v47 }
 0xb53   : > { %v1546_v49 = vpop.permute.xlu1 %1545  ;;  %v1460_v50 = vpop.xlane.xlu0 %1459 }
 0xb54   : > { %1558 = vmatpush.bf16.msrb.mxu2 %v1546_v49  ;;  %2278 = vrcp.f32 %v1460_v50 }
 0xb55   : > { %2280 = vrcp.f32 %v1457_v42  ;;  %v2139_v42 = vld [vmem:[%s2874_s9 + $0x30] sm:$0xff] }
 0xb56   : > { %2282 = vrcp.f32 %v1536_v48 }
 0xb5a   : > { %v2279_v51 = vpop.eup %2278 }
 0xb5b   : > { %v2281_v52 = vpop.eup %2280  ;;  %v1464_v53 = vmul.f32 %v2279_v51, %v2267_v27 }
 0xb5c   : > { %v1463_v55 = vmul.f32 %v2281_v52, %v2263_v2  ;;  %v2283_v58 = vpop.eup %2282 }
 0xb5d   : > { %v1542_v61 = vmul.f32 %v2283_v58, %v2265_v24 }
 0xb5e   : > { %v1465_v57 = vpack.c.bf16 %v1464_v53, %v1463_v55 }
 0xb65   : > { %v1539_v54 = vpop.xlane.xlu2 %1538 }
 0xb66   : > { %2284 = vrcp.f32 %v1539_v54  ;;  %v1467_v56 = vpop.permute.xlu0 %1466 }
 0xb67   : > { %1479 = vmatpush.bf16.msra.mxu3 %v1467_v56 }
 0xb6a   : > { %2028 = vmatmul.msk.bf16.vlgmr.msra.gmra.mxu3 %vm623_vm9, %v1465_v57 }
 0xb6b   : > { %1752 = vmatpush.bf16.msrb.mxu3 %v2140_v41 }
 0xb6c   : > { %v2285_v60 = vpop.eup %2284 }
 0xb6d   : > { %v1543_v62 = vmul.f32 %v2285_v60, %v2269_v32 }
 0xb6f   : > { %v1544_v63 = vpack.c.bf16 %v1543_v62, %v1542_v61  ;;  %1753 = vmatpush.bf16.msrb.mxu3 %v2139_v42 }
 0xb71   : > { %2030 = vmatmul.msk.bf16.vlgmr.msrb.gmra.mxu2 %vm623_vm9, %v1544_v63 }
 0xb73   : > { %1754 = vmatpush.bf16.msrb.mxu3 %v2138_v43 }
 0xb77   : > { %1755 = vmatpush.bf16.msrb.mxu3 %v2137_v46 }
 0xbb3   : > { %v1331_v1 = vpop.f32.mrf.mxu3 }
 0xbb4   : > { %1336 = vst.msk [vmem:[#allocation2] sm:$0xff] %vm623_vm9, %v1331_v1 }
 0xbbb   : > { %v1333_v3 = vpop.f32.mrf.mxu3 }
 0xbbc   : > { %1337 = vst.msk [vmem:[#allocation2 + $0x8] sm:$0xff] %vm623_vm9, %v1333_v3 }
 0xbd2   : > { %v1402_v4 = vpop.f32.mrf.mxu2 }
 0xbd3   : > { %1409 = vrot.lane.b32.xlu1 %v1402_v4, %s2889_s30  ;;  %v2201_v4 = vld [vmem:[%s2873_s8 + $0x1] ss:$0 sm:$0xff] }
 0xbda   : > { %v1404_v5 = vpop.f32.mrf.mxu2 }
 0xbdb   : > { %1411 = vrot.lane.b32.xlu1 %v1404_v5, %s2889_s30 }
 0xbed   : > { %v1481_v6 = vpop.f32.mrf.mxu3 }
 0xbee   : > { %1488 = vrot.lane.b32.xlu0 %v1481_v6, %s2890_s14 }
 0xbf4   : > { %v1560_v7 = vpop.f32.mrf.mxu2 }
 0xbf5   : > { %v1483_v9 = vpop.f32.mrf.mxu3 }
 0xbf6   : > { %1490 = vrot.lane.b32.xlu1 %v1483_v9, %s2890_s14  ;;  %1567 = vrot.lane.b32.xlu0 %v1560_v7, %s2382_s19 }
 0xbfc   : > { %v1562_v11 = vpop.f32.mrf.mxu2 }
 0xbfe   : > { %1569 = vrot.lane.b32.xlu1 %v1562_v11, %s2382_s19 }
 0xc45   : > { %v1410_v12 = vpop.permute.xlu1 %1409 }
 0xc46   : > { %1415 = vst.msk [vmem:[#allocation2] sm:$0xff] %vm746_vm10, %v1410_v12 }
 0xc4d   : > { %v1412_v15 = vpop.permute.xlu1 %1411 }
 0xc4e   : > { %1416 = vst.msk [vmem:[#allocation2 + $0x8] sm:$0xff] %vm746_vm10, %v1412_v15  ;;  %v2143_v15 = vld [vmem:[%s2876_s11 + $0x30] sm:$0xff] }
 0xc4f   : > { %1816 = vmatpush.bf16.msrb.mxu0 %v2143_v15 }
 0xc53   : > { %1817 = vmatpush.bf16.msrb.mxu0 %v2142_v16 }
 0xc57   : > { %1818 = vmatpush.bf16.msrb.mxu0 %v2141_v0 }
 0xc60   : > { %v1489_v19 = vpop.permute.xlu0 %1488 }
 0xc61   : > { %1494 = vst.msk [vmem:[#allocation2] sm:$0xff] %vm826_vm11, %v1489_v19 }
 0xc68   : > { %v1491_v20 = vpop.permute.xlu1 %1490  ;;  %v1568_v2 = vpop.permute.xlu0 %1567 }
 0xc69   : > { %1495 = vst.msk [vmem:[#allocation2 + $0x8] sm:$0xff] %vm826_vm11, %v1491_v20 }
 0xc6a   : > { %1573 = vst.msk [vmem:[#allocation2] sm:$0xff] %vm906_vm12, %v1568_v2 }
 0xc70   : > { %v1570_v21 = vpop.permute.xlu1 %1569 }
 0xc71   : > { %1574 = vst.msk [vmem:[#allocation2 + $0x8] sm:$0xff] %vm906_vm12, %v1570_v21  ;;  %v1575_v22 = vld [vmem:[#allocation2] sm:$0xff] }
 0xc78   : > { %v1576_v23 = vld [vmem:[#allocation2 + $0x8] sm:$0xff] }
 0xc79   : > { %v1577_v24 = vpack.c.bf16 %v1576_v23, %v1575_v22 }
 0xc7b   : > { %2055 = vmatmul.msk.bf16.vlgmr.msrb.gmra.mxu1 %vm480_vm0, %v1577_v24 }
 0xcf8   : > { %v1623_v27 = vpop.f32.mrf.mxu1 }
 0xcf9   : > { %v1628_v59 = vadd.f32 %v1623_v27, %v2681_v26 }
 0xcfb   : > { %v2804_v28 = vadd.f32 %v2199_v25, %v1628_v59 }
 0xcfd   : > { %v1663_v30 = vsel %vm480_vm0, %v2804_v28, 0.0 }
 0xcfe   : > { %1664 = vadd.xlane.f32.xlu2 %v1663_v30 }
 0xd00   : > { %v1625_v31 = vpop.f32.mrf.mxu1 }
 0xd01   : > { %v1629_v32 = vadd.f32 %v1625_v31, %v2686_v29 }
 0xd03   : > { %v2809_v33 = vadd.f32 %v2199_v25, %v1629_v32 }
 0xd05   : > { %v1666_v8 = vsel %vm480_vm0, %v2809_v33, 0.0 }
 0xd06   : > { %1667 = vadd.xlane.f32.xlu0 %v1666_v8 }
 0xd71   : > { %v1665_v34 = vpop.xlane.xlu2 %1664 }
 0xd72   : > { %v1669_v35 = vmul.f32 %v1665_v34, %v2499_v10 }
 0xd74   : > { %v1671_v26 = vsub.f32 %v2804_v28, %v1669_v35 }
 0xd76   : > { %v1673_v36 = vmul.f32 %v1671_v26, %v1671_v26 }
 0xd78   : > { %v1675_v37 = vsel %vm480_vm0, %v1673_v36, 0.0 }
 0xd79   : > { %1676 = vadd.xlane.f32.xlu1 %v1675_v37  ;;  %v1668_v13 = vpop.xlane.xlu0 %1667 }
 0xd7a   : > { %v1670_v38 = vmul.f32 %v1668_v13, %v2499_v10 }
 0xd7c   : > { %v1672_v29 = vsub.f32 %v2809_v33, %v1670_v38 }
 0xd7e   : > { %v1674_v39 = vmul.f32 %v1672_v29, %v1672_v29 }
 0xd80   : > { %v1678_v40 = vsel %vm480_vm0, %v1674_v39, 0.0 }
 0xd81   : > { %1679 = vadd.xlane.f32.xlu2 %v1678_v40  ;;  %v2203_v40 = vld [vmem:[#allocation5 + $0x1] ss:$0 sm:$0xff] }
 0xdec   : > { %v1677_v18 = vpop.xlane.xlu1 %1676 }
 0xded   : > { %v1681_v44 = vmul.f32 %v1677_v18, %v2499_v10 }
 0xdef   : > { %v1683_v45 = vadd.f32 1e-05, %v1681_v44 }
 0xdf1   : > { %2286 = vrsqrt.f32 %v1683_v45  ;;  %vm1691_vm9 = vweird.f32 %v1683_v45 }
 0xdf4   : > { %v1680_v47 = vpop.xlane.xlu2 %1679 }
 0xdf5   : > { %v1682_v48 = vmul.f32 %v1680_v47, %v2499_v10  ;;  %v2200_v10 = vld [vmem:[%s2872_s7 + $0x1] ss:$0 sm:$0xff] }
 0xdf7   : > { %v2287_v49 = vpop.eup %2286  ;;  %v1684_v50 = vadd.f32 1e-05, %v1682_v48 }
 0xdf8   : > { %v1686_v51 = vmul.f32 %v2287_v49, %v1683_v45  ;;  %vm1692_vm8 = vweird.f32 %v2287_v49 }
 0xdf9   : > { %2288 = vrsqrt.f32 %v1684_v50  ;;  %vm1693_vm10 = vmor %vm1691_vm9, %vm1692_vm8  ;;  %vm1701_vm12 = vweird.f32 %v1684_v50 }
 0xdfa   : > { %v1687_v52 = vmul.f32 %v2287_v49, %v1686_v51 }
 0xdfc   : > { %v1688_v53 = vmul.f32 0.5, %v1687_v52 }
 0xdfe   : > { %v1689_v54 = vsub.f32 1.5, %v1688_v53 }
 0xdff   : > { %v2289_v55 = vpop.eup %2288 }
 0xe00   : > { %v1690_v56 = vmul.f32 %v2287_v49, %v1689_v54  ;;  %v1696_v57 = vmul.f32 %v2289_v55, %v1684_v50  ;;  %vm1702_vm11 = vweird.f32 %v2289_v55 }
 0xe01   : > { %vm1703_vm15 = vmor %vm1701_vm12, %vm1702_vm11 }
 0xe02   : > { %v1697_v58 = vmul.f32 %v2289_v55, %v1696_v57  ;;  %v1694_v60 = vsel %vm1693_vm10, %v2287_v49, %v1690_v56 }
 0xe03   : > { %v1705_v63 = vmul.f32 %v1694_v60, %v1671_v26 }
 0xe04   : > { %v1698_v61 = vmul.f32 0.5, %v1697_v58 }
 0xe05   : > { %v1710_v5 = vmul.f32 %v2200_v10, %v1705_v63 }
 0xe06   : > { %v1699_v62 = vsub.f32 1.5, %v1698_v61 }
 0xe07   : > { %v1715_v9 = vadd.f32 %v2201_v4, %v1710_v5 }
 0xe08   : > { %v1700_v1 = vmul.f32 %v2289_v55, %v1699_v62 }
 0xe0a   : > { %v1704_v3 = vsel %vm1703_vm15, %v2289_v55, %v1700_v1 }
 0xe0b   : > { %v1706_v6 = vmul.f32 %v1704_v3, %v1672_v29 }
 0xe0d   : > { %v1711_v7 = vmul.f32 %v2200_v10, %v1706_v6 }
 0xe0f   : > { %v1716_v11 = vadd.f32 %v2201_v4, %v1711_v7 }
 0xe11   : > { %v1717_v12 = vpack.c.bf16 %v1716_v11, %v1715_v9 }
 0xe13   : > { %2091 = vmatmul.msk.bf16.vlgmr.msrb.gmra.mxu3 %vm480_vm0, %v1717_v12 }
 0xe96   : > { %v1757_v19 = vpop.f32.mrf.mxu3 }
 0xe97   : > { %v1758_v20 = vadd.f32 %v2202_v17, %v1757_v19 }
 0xe99   : > { %v1764_v2 = vmul.f32 0.044715, %v1758_v20  ;;  %v1762_v36 = vmul.f32 0.5, %v1758_v20 }
 0xe9b   : > { %v1766_v21 = vmul.f32 %v1764_v2, %v1758_v20 }
 0xe9d   : > { %v1768_v22 = vmul.f32 %v1766_v21, %v1758_v20 }
 0xe9e   : > { %v1759_v23 = vpop.f32.mrf.mxu3 }
 0xe9f   : > { %v1770_v24 = vadd.f32 %v1768_v22, %v1758_v20  ;;  %v1760_v25 = vadd.f32 %v2202_v17, %v1759_v23 }
 0xea1   : > { %v1765_v27 = vmul.f32 0.044715, %v1760_v25  ;;  %v1772_v59 = vmul.f32 0.7978846, %v1770_v24  ;;  %v1763_v37 = vmul.f32 0.5, %v1760_v25 }
 0xea3   : > { %v1767_v30 = vmul.f32 %v1765_v27, %v1760_v25  ;;  %2290 = vtanh.f32 %v1772_v59 }
 0xea5   : > { %v1769_v31 = vmul.f32 %v1767_v30, %v1760_v25 }
 0xea7   : > { %v1771_v32 = vadd.f32 %v1769_v31, %v1760_v25 }
 0xea9   : > { %v1773_v8 = vmul.f32 0.7978846, %v1771_v32  ;;  %v2291_v34 = vpop.eup %2290 }
 0xeaa   : > { %v1776_v35 = vadd.f32 1.0, %v2291_v34 }
 0xeab   : > { %2292 = vtanh.f32 %v1773_v8 }
 0xeac   : > { %v1778_v38 = vmul.f32 %v1776_v35, %v1762_v36 }
 0xeb1   : > { %v2293_v26 = vpop.eup %2292 }
 0xeb2   : > { %v1777_v13 = vadd.f32 1.0, %v2293_v26 }
 0xeb4   : > { %v1779_v29 = vmul.f32 %v1777_v13, %v1763_v37 }
 0xeb6   : > { %v1780_v39 = vpack.c.bf16 %v1779_v29, %v1778_v38 }
 0xeb8   : > { %2108 = vmatmul.msk.bf16.vlgmr.msrb.gmra.mxu0 %vm480_vm0, %v1780_v39 }
 0xf35   : > { %v1820_v41 = vpop.f32.mrf.mxu0 }
 0xf36   : > { %v1821_v42 = vadd.f32 %v2203_v40, %v1820_v41 }
 0xf38   : > { %v1825_v43 = vadd.f32 %v1821_v42, %v2804_v28 }
 0xf3a   : > { %1827 = vst.msk [vmem:[%s474_s24] sm:$0xff] %vm480_vm0, %v1825_v43 }
 0xf3d   : > { %v1822_v18 = vpop.f32.mrf.mxu0 }
 0xf3e   : > { %v1823_v44 = vadd.f32 %v2203_v40, %v1822_v18 }
 0xf40   : > { %v1826_v45 = vadd.f32 %v1823_v44, %v2809_v33 }
 0xf42   : > { %1828 = vst.msk [vmem:[%s474_s24 + $0x8] sm:$0xff] %vm480_vm0, %v1826_v45 }
 0xf43 PF: > { %s25_s25 = sadd.s32 1, %s2368_s25  }
 0xf44   : > { %p22_p7 = scmp.ge.s32.totalorder %s25_s25, 4  }
 0xf46   :  { %24 = sbr.rel (!%p22_p7) target bundleno = 2 (0x2), region = 123 }
 0xf4b   :  { %1850 = vsyncpa [#allocation4], 1 }
 0xf4c   :  { %1852 = vsyncpa [#allocation4 + $0x1], 1 }
 0xf4d   :  { %1853 = vsyncpa [#allocation6], 1 }

</bundles_post_ra>
